<compile_context>
chip_gen: v7x
topology: tpu7x:2x2x1
jax: 0.10.0
libtpu: 0.0.40
codegen_flags: <defaults>
</compile_context>

<pallas_src>
import functools
import math

import jax
import jax.numpy as jnp
from jax import lax
from jax.experimental import pallas as pl
from jax.experimental.pallas import tpu as pltpu

D_MODEL = 32
N_HEADS = 4
D_HEAD = D_MODEL // N_HEADS
D_FF = 64
NUM_LAYERS = 2
EPS = 1e-5

# Matmul-operand dtype (f32 accumulation via preferred_element_type).  bf16 is
# native on the v5e/v6e/v7x MXU; MXU_DTYPE=float32 would force the slow
# multi-pass f32 MXU path -- only pay that if bit-parity with PyTorch matters.
MXU_DTYPE = jnp.bfloat16

# ---- packed parameter stacks -------------------------------------------------
# Every weight matrix is zero-padded into a [SLOT_R, SLOT_C] slot of ONE bf16
# stack; every bias / LayerNorm / folded-BatchNorm vector goes into ONE f32
# [n_vecs, SLOT_C] stack.  The kernel therefore has 3 inputs total.
SLOT_R, SLOT_C = 64, 128
N_MAT_ATTN = 4      # wqkv | wo | w1 | w2
N_MAT_CONV = 4      # conv w0 | w1 | w2 | maxpool row-pick "sel"
N_VEC_ATTN = 8      # bqkv | bo | b1 | b2 | ln1g | ln1b | ln2g | ln2b
N_VEC_CONV = 3      # conv bias | bn_scale | bn_bias  (BatchNorm folded on host)


# ------------------------------ in-kernel math --------------------------------
def _layernorm(x, g, b):
    mu = jnp.mean(x, axis=-1, keepdims=True)
    var = jnp.mean((x - mu) ** 2, axis=-1, keepdims=True)
    return (x - mu) * lax.rsqrt(var + EPS) * g + b


def _mm(a, b):
    """MXU matmul on pre-cast operands, f32 accumulation."""
    return jnp.dot(a, b, preferred_element_type=jnp.float32)


def _encoder_layer(x, w_ref, v_ref, mat0, vec0, bt, l, head_masks):
    """One Informer EncoderLayer on a flattened [bt*l, D] f32 activation."""
    wqkv = w_ref[mat0 + 0, 0:D_MODEL, 0:3 * D_MODEL]          # [D, 3D] bf16
    wo = w_ref[mat0 + 1, 0:D_MODEL, 0:D_MODEL]
    w1 = w_ref[mat0 + 2, 0:D_MODEL, 0:D_FF]
    w2 = w_ref[mat0 + 3, 0:D_FF, 0:D_MODEL]
    bqkv = v_ref[vec0 + 0:vec0 + 1, 0:3 * D_MODEL]
    bo = v_ref[vec0 + 1:vec0 + 2, 0:D_MODEL]
    b1 = v_ref[vec0 + 2:vec0 + 3, 0:D_FF]
    b2 = v_ref[vec0 + 3:vec0 + 4, 0:D_MODEL]
    ln1g = v_ref[vec0 + 4:vec0 + 5, 0:D_MODEL]
    ln1b = v_ref[vec0 + 5:vec0 + 6, 0:D_MODEL]
    ln2g = v_ref[vec0 + 6:vec0 + 7, 0:D_MODEL]
    ln2b = v_ref[vec0 + 7:vec0 + 8, 0:D_MODEL]

    # ---- multi-head self-attention (scale folded into the Q block) ----------
    xb = x.astype(MXU_DTYPE)                                  # cast once, reused
    qkv = _mm(xb, wqkv) + bqkv                                # [bt*l, 3D] f32
    qb = qkv[:, 0:D_MODEL].reshape(bt, l, D_MODEL).astype(MXU_DTYPE)
    kb = qkv[:, D_MODEL:2 * D_MODEL].reshape(bt, l, D_MODEL).astype(MXU_DTYPE)
    vb = qkv[:, 2 * D_MODEL:3 * D_MODEL].reshape(bt, l, D_MODEL).astype(MXU_DTYPE)

    acc = jnp.zeros((bt, l, D_MODEL), jnp.float32)
    for m in head_masks:                                      # static head unroll
        # masked lanes -> q_h . k_h^T without 8-lane slices / concat
        s = jnp.einsum('bqd,bkd->bqk', qb * m, kb,
                       preferred_element_type=jnp.float32)    # [bt, l, l]
        s = s - jnp.max(s, axis=-1, keepdims=True)
        p = jnp.exp(s)
        p = p * pl.reciprocal(jnp.sum(p, axis=-1, keepdims=True), approx=True)
        # v masked to the head's lanes: each head lands in its natural lanes
        acc = acc + jnp.einsum('bqk,bkd->bqd', p.astype(MXU_DTYPE), vb * m,
                               preferred_element_type=jnp.float32)
    attn = acc.reshape(bt * l, D_MODEL)

    x = _layernorm(x + _mm(attn.astype(MXU_DTYPE), wo) + bo, ln1g, ln1b)

    # ---- position-wise FFN (Conv1d k=1 == matmul), ReLU ----------------------
    y = jnp.maximum(_mm(x.astype(MXU_DTYPE), w1) + b1, 0.0)
    y = _mm(y.astype(MXU_DTYPE), w2) + b2
    return _layernorm(x + y, ln2g, ln2b)


def _conv_layer(x, w_ref, v_ref, mat0, vec0, bt, l):
    """Distilling ConvLayer: circular Conv1d(k=3) -> BN(eval) -> ELU -> MaxPool(k=3,s=2,p=1)."""
    l_out = (l - 1) // 2 + 1
    w0 = w_ref[mat0 + 0, 0:D_MODEL, 0:D_MODEL]
    w1 = w_ref[mat0 + 1, 0:D_MODEL, 0:D_MODEL]
    w2 = w_ref[mat0 + 2, 0:D_MODEL, 0:D_MODEL]
    sel = w_ref[mat0 + 3, 0:l_out, 0:l]                       # bf16 one-hot pick
    cb = v_ref[vec0 + 0:vec0 + 1, 0:D_MODEL]
    bns = v_ref[vec0 + 1:vec0 + 2, 0:D_MODEL]                 # gamma * rsqrt(var+eps)
    bnb = v_ref[vec0 + 2:vec0 + 3, 0:D_MODEL]                 # beta - mean * bns

    # channel matmuls on the flattened batch (shifts commute with the 1x1 part)
    xb = x.astype(MXU_DTYPE)                                  # [bt*l, D], cast once
    z0 = _mm(xb, w0)
    z1 = _mm(xb, w1)
    z2 = _mm(xb, w2)

    NEG = jnp.float32(-1e30)                                  # safe: ELU output >= -1
    li = lax.broadcasted_iota(jnp.int32, (l, D_MODEL), 0)
    outs = []
    for b in range(bt):                                       # static per-batch loop
        sl = slice(b * l, (b + 1) * l)
        # circular conv along L: y[t] = x[t-1]@W0 + x[t]@W1 + x[t+1]@W2 + bias
        y = (pltpu.roll(z0[sl], shift=1, axis=0) + z1[sl]
             + pltpu.roll(z2[sl], shift=l - 1, axis=0) + cb)
        # BatchNorm1d (inference, folded) + ELU(alpha=1)
        y = y * bns + bnb
        y = jnp.where(y > 0, y, jnp.exp(y) - 1.0)
        # MaxPool1d(k=3, stride=2, padding=1): stride-1 max with -inf edges ...
        y_m1 = jnp.where(li == 0, NEG, pltpu.roll(y, shift=1, axis=0))
        y_p1 = jnp.where(li == l - 1, NEG, pltpu.roll(y, shift=l - 1, axis=0))
        m = jnp.maximum(jnp.maximum(y_m1, y), y_p1)           # [l, D]
        # ... then pick rows 0, 2, 4, ... (tiny bf16 matmul; see TODO re: strided read)
        outs.append(_mm(sel, m.astype(MXU_DTYPE)))            # [l_out, D]
    return jnp.concatenate(outs, axis=0)                      # [bt*l_out, D]


# --------------------------- fused Encoder kernel ------------------------------
def _make_kernel(bt, seq_len):
    def kernel(x_ref, w_ref, v_ref, o_ref):
        # 0/1 lane masks for the 4 heads, built once per kernel invocation.
        lane = lax.broadcasted_iota(jnp.int32, (1, 1, D_MODEL), 2)
        head_masks = [
            ((lane >= h * D_HEAD) & (lane < (h + 1) * D_HEAD)).astype(MXU_DTYPE)
            for h in range(N_HEADS)
        ]

        l = seq_len
        h = x_ref[...].reshape(bt * l, D_MODEL)               # flatten batch for matmuls
        for i in range(NUM_LAYERS - 1):                       # static layer loop
            h = _encoder_layer(h, w_ref, v_ref,
                               i * N_MAT_ATTN, i * N_VEC_ATTN, bt, l, head_masks)
            h = _conv_layer(h, w_ref, v_ref,
                            NUM_LAYERS * N_MAT_ATTN + i * N_MAT_CONV,
                            NUM_LAYERS * N_VEC_ATTN + i * N_VEC_CONV, bt, l)
            l = (l - 1) // 2 + 1                              # distilling halves L
        i = NUM_LAYERS - 1
        h = _encoder_layer(h, w_ref, v_ref,
                           i * N_MAT_ATTN, i * N_VEC_ATTN, bt, l, head_masks)

        vec0 = NUM_LAYERS * N_VEC_ATTN + (NUM_LAYERS - 1) * N_VEC_CONV
        lng = v_ref[vec0:vec0 + 1, 0:D_MODEL]
        lnb = v_ref[vec0 + 1:vec0 + 2, 0:D_MODEL]
        h = _layernorm(h, lng, lnb)
        # NOTE: the only HBM store is this [bt, l_out, D] tile; at toy sizes a
        # lane-dense relayout would cost more than the masked store it replaces.
        o_ref[...] = h.reshape(bt, l, D_MODEL)
    return kernel


# ------------------------------- wrappers --------------------------------------
def prepare_params(attn_layers, conv_layers, norm, seq_len):
    """Host-side parameter prep:
       * fuse Wq|Wk|Wv (and biases) into one [D, 3D] matrix, fold 1/sqrt(d_head)
         into the Q block,
       * fold BatchNorm running stats into a single scale/bias pair,
       * build the stride-2 MaxPool row-pick matrix per conv layer,
       * pack all matrices into ONE zero-padded bf16 stack and all vectors into
         ONE f32 stack.
    Returns (w_stack, v_stack)."""
    scale = 1.0 / math.sqrt(D_HEAD)
    mats, vecs = [], []
    for p in attn_layers:
        wqkv = jnp.concatenate([p["wq"] * scale, p["wk"], p["wv"]], axis=1)   # [D, 3D]
        bqkv = jnp.concatenate([p["bq"] * scale, p["bk"], p["bv"]], axis=1)   # [1, 3D]
        mats += [wqkv, p["wo"], p["w1"], p["w2"]]
        vecs += [bqkv, p["bo"], p["b1"], p["b2"],
                 p["ln1g"], p["ln1b"], p["ln2g"], p["ln2b"]]
    l = seq_len
    for p in conv_layers:
        l_out = (l - 1) // 2 + 1
        assert l <= SLOT_C and l_out <= SLOT_R, "toy-size slots; tile L for real shapes"
        r = jnp.arange(l_out, dtype=jnp.int32)[:, None]
        c = jnp.arange(l, dtype=jnp.int32)[None, :]
        sel = (c == 2 * r).astype(jnp.float32)                # [l_out, l] one-hot
        bn_scale = p["bng"] * lax.rsqrt(p["bnv"] + EPS)
        bn_bias = p["bnb"] - p["bnm"] * bn_scale
        mats += [p["w0"], p["w1"], p["w2"], sel]
        vecs += [p["cb"], bn_scale, bn_bias]
        l = l_out
    vecs += [norm["g"], norm["b"]]

    def pad_mat(a):
        a = jnp.asarray(a, jnp.float32)
        return jnp.pad(a, ((0, SLOT_R - a.shape[0]), (0, SLOT_C - a.shape[1])))

    def pad_vec(a):
        a = jnp.asarray(a, jnp.float32).reshape(1, -1)
        return jnp.pad(a, ((0, 0), (0, SLOT_C - a.shape[1])))

    w_stack = jnp.stack([pad_mat(m) for m in mats]).astype(MXU_DTYPE)   # [n_mats, 64, 128]
    v_stack = jnp.concatenate([pad_vec(v) for v in vecs], axis=0)       # [n_vecs, 128] f32
    return w_stack, v_stack


@functools.partial(jax.jit, static_argnames=("b_tile",))
def encoder_forward(src, w_stack, v_stack, attn_mask=None, b_tile=None):
    """Mirrors Encoder.forward: (attn, conv)*, attn[-1], final norm -- one fused kernel."""
    if attn_mask is not None:
        raise NotImplementedError("attn_mask is not supported (reference uses None)")
    bsz, seq_len, d = src.shape
    assert d == D_MODEL
    bt = bsz if b_tile is None else b_tile                    # whole batch per grid step
    assert bsz % bt == 0
    n_tiles = bsz // bt

    l_out = seq_len
    for _ in range(NUM_LAYERS - 1):
        l_out = (l_out - 1) // 2 + 1

    return pl.pallas_call(
        _make_kernel(bt, seq_len),
        out_shape=jax.ShapeDtypeStruct((bsz, l_out, d), jnp.float32),
        grid_spec=pltpu.PrefetchScalarGridSpec(
            num_scalar_prefetch=0,
            grid=(n_tiles,),
            in_specs=[
                pl.BlockSpec((bt, seq_len, d), lambda i: (i, 0, 0)),
                # packed weight stacks: constant index_maps -> DMA'd once, VMEM-resident
                pl.BlockSpec(w_stack.shape, lambda i: (0, 0, 0)),
                pl.BlockSpec(v_stack.shape, lambda i: (0, 0)),
            ],
            out_specs=pl.BlockSpec((bt, l_out, d), lambda i: (i, 0, 0)),
        ),
        compiler_params=pltpu.CompilerParams(
            # With b_tile=B the grid has a single step; for larger batches set
            # b_tile=B//2 so the two v7x TensorCores each take a tile.
            dimension_semantics=("parallel",),
        ),
    )(src, w_stack, v_stack)


# ---------------------------- deterministic init --------------------------------
def init_params(key):
    d, f = D_MODEL, D_FF
    keys = jax.random.split(key, 64)
    it = iter(keys)

    def rnd(shape, scale=0.1):
        return jax.random.normal(next(it), shape, jnp.float32) * scale

    attn_layers = []
    for _ in range(NUM_LAYERS):
        attn_layers.append(dict(
            wq=rnd((d, d)), wk=rnd((d, d)), wv=rnd((d, d)), wo=rnd((d, d)),
            bq=rnd((1, d)), bk=rnd((1, d)), bv=rnd((1, d)), bo=rnd((1, d)),
            w1=rnd((d, f)), b1=rnd((1, f)), w2=rnd((f, d)), b2=rnd((1, d)),
            ln1g=jnp.ones((1, d), jnp.float32), ln1b=jnp.zeros((1, d), jnp.float32),
            ln2g=jnp.ones((1, d), jnp.float32), ln2b=jnp.zeros((1, d), jnp.float32),
        ))
    conv_layers = []
    for _ in range(NUM_LAYERS - 1):
        conv_layers.append(dict(
            w0=rnd((d, d)), w1=rnd((d, d)), w2=rnd((d, d)), cb=rnd((1, d)),
            bng=jnp.ones((1, d), jnp.float32), bnb=jnp.zeros((1, d), jnp.float32),
            bnm=jnp.zeros((1, d), jnp.float32), bnv=jnp.ones((1, d), jnp.float32),
        ))
    norm = dict(g=jnp.ones((1, d), jnp.float32), b=jnp.zeros((1, d), jnp.float32))
    return attn_layers, conv_layers, norm


# -------------------------- pure-JAX reference (f32) ----------------------------
def reference_encoder(src, attn_layers, conv_layers, norm):
    def ln(x, g, b):
        mu = x.mean(-1, keepdims=True)
        var = ((x - mu) ** 2).mean(-1, keepdims=True)
        return (x - mu) / jnp.sqrt(var + EPS) * g + b

    def attn_layer(x, p):
        B, L, D = x.shape
        q = x @ p["wq"] + p["bq"]
        k = x @ p["wk"] + p["bk"]
        v = x @ p["wv"] + p["bv"]
        qh = q.reshape(B, L, N_HEADS, D_HEAD)
        kh = k.reshape(B, L, N_HEADS, D_HEAD)
        vh = v.reshape(B, L, N_HEADS, D_HEAD)
        s = jnp.einsum('blhd,bmhd->bhlm', qh, kh) / math.sqrt(D_HEAD)
        a = jax.nn.softmax(s, axis=-1)
        o = jnp.einsum('bhlm,bmhd->blhd', a, vh).reshape(B, L, D)
        x = ln(x + o @ p["wo"] + p["bo"], p["ln1g"], p["ln1b"])
        y = jnp.maximum(x @ p["w1"] + p["b1"], 0.0) @ p["w2"] + p["b2"]
        return ln(x + y, p["ln2g"], p["ln2b"])

    def conv_layer(x, p):
        y = (jnp.roll(x, 1, axis=1) @ p["w0"] + x @ p["w1"]
             + jnp.roll(x, -1, axis=1) @ p["w2"] + p["cb"])
        y = (y - p["bnm"]) / jnp.sqrt(p["bnv"] + EPS) * p["bng"] + p["bnb"]
        y = jnp.where(y > 0, y, jnp.exp(y) - 1.0)
        yp = jnp.pad(y, ((0, 0), (1, 1), (0, 0)), constant_values=-1e30)
        m = jnp.maximum(jnp.maximum(yp[:, :-2], yp[:, 1:-1]), yp[:, 2:])
        return m[:, ::2]

    h = src
    for i in range(NUM_LAYERS - 1):
        h = attn_layer(h, attn_layers[i])
        h = conv_layer(h, conv_layers[i])
    h = attn_layer(h, attn_layers[-1])
    return ln(h, norm["g"], norm["b"])


if __name__ == "__main__":
    key = jax.random.PRNGKey(0)
    k_param, k_x = jax.random.split(key)
    attn_layers, conv_layers, norm = init_params(k_param)

    B, L = 2, 16
    src = jax.random.normal(k_x, (B, L, D_MODEL), jnp.float32)

    w_stack, v_stack = prepare_params(attn_layers, conv_layers, norm, L)
    out = encoder_forward(src, w_stack, v_stack)
    out = jax.block_until_ready(out)

    expected_l = (L - 1) // 2 + 1        # one distilling conv halves the sequence
    assert out.shape == (B, expected_l, D_MODEL), out.shape
    assert bool(jnp.all(jnp.isfinite(out)))

    # Tolerance-based check vs. a pure-JAX reference (bf16 MXU operands and the
    # approximate softmax reciprocal give small, expected deviations).
    ref = reference_encoder(src, attn_layers, conv_layers, norm)
    err = jnp.max(jnp.abs(out - ref) / (1.0 + jnp.abs(ref)))
    assert bool(err < 0.1), f"kernel/reference mismatch: {float(err)}"

    print("KERNEL_OK")
</pallas_src>

<mosaic_0001>
module attributes {stable_mosaic.version = 11 : i64} {
  func.func @kernel(%arg0: i32, %arg1: memref<2x16x32xf32, #tpu.memory_space<vmem>>, %arg2: memref<12x64x128xbf16, #tpu.memory_space<vmem>>, %arg3: memref<21x128xf32, #tpu.memory_space<vmem>>, %arg4: memref<2x8x32xf32, #tpu.memory_space<vmem>>) attributes {dimension_semantics = [#tpu.dimension_semantics<parallel>], iteration_bounds = array<i64: 1>, scalar_prefetch = 0 : i64, scratch_operands = 0 : i64, tpu.core_type = #tpu.core_type<tc>, window_params = [{transform_indices = @transform_0, window_bounds = array<i64: 2, 16, 32>}, {pipeline_mode = #tpu.pipeline_mode<synchronous>, transform_indices = @transform_1, window_bounds = array<i64: 12, 64, 128>}, {pipeline_mode = #tpu.pipeline_mode<synchronous>, transform_indices = @transform_2, window_bounds = array<i64: 21, 128>}, {transform_indices = @transform_3, window_bounds = array<i64: 2, 8, 32>}]} {
    %0 = tpu.iota {dimensions = array<i32: 2>} : vector<1x1x32xi32>
    %c0_i32 = arith.constant 0 : i32
    %1 = vector.broadcast %c0_i32 : i32 to vector<1x1x32xi32>
    %2 = arith.cmpi sge, %0, %1 : vector<1x1x32xi32>
    %c8_i32 = arith.constant 8 : i32
    %3 = vector.broadcast %c8_i32 : i32 to vector<1x1x32xi32>
    %4 = arith.cmpi slt, %0, %3 : vector<1x1x32xi32>
    %5 = arith.andi %2, %4 : vector<1x1x32xi1>
    %6 = arith.extui %5 : vector<1x1x32xi1> to vector<1x1x32xi32>
    %7 = arith.sitofp %6 : vector<1x1x32xi32> to vector<1x1x32xf32>
    %8 = arith.truncf %7 : vector<1x1x32xf32> to vector<1x1x32xbf16>
    %c8_i32_0 = arith.constant 8 : i32
    %9 = vector.broadcast %c8_i32_0 : i32 to vector<1x1x32xi32>
    %10 = arith.cmpi sge, %0, %9 : vector<1x1x32xi32>
    %c16_i32 = arith.constant 16 : i32
    %11 = vector.broadcast %c16_i32 : i32 to vector<1x1x32xi32>
    %12 = arith.cmpi slt, %0, %11 : vector<1x1x32xi32>
    %13 = arith.andi %10, %12 : vector<1x1x32xi1>
    %14 = arith.extui %13 : vector<1x1x32xi1> to vector<1x1x32xi32>
    %15 = arith.sitofp %14 : vector<1x1x32xi32> to vector<1x1x32xf32>
    %16 = arith.truncf %15 : vector<1x1x32xf32> to vector<1x1x32xbf16>
    %c16_i32_1 = arith.constant 16 : i32
    %17 = vector.broadcast %c16_i32_1 : i32 to vector<1x1x32xi32>
    %18 = arith.cmpi sge, %0, %17 : vector<1x1x32xi32>
    %c24_i32 = arith.constant 24 : i32
    %19 = vector.broadcast %c24_i32 : i32 to vector<1x1x32xi32>
    %20 = arith.cmpi slt, %0, %19 : vector<1x1x32xi32>
    %21 = arith.andi %18, %20 : vector<1x1x32xi1>
    %22 = arith.extui %21 : vector<1x1x32xi1> to vector<1x1x32xi32>
    %23 = arith.sitofp %22 : vector<1x1x32xi32> to vector<1x1x32xf32>
    %24 = arith.truncf %23 : vector<1x1x32xf32> to vector<1x1x32xbf16>
    %c24_i32_2 = arith.constant 24 : i32
    %25 = vector.broadcast %c24_i32_2 : i32 to vector<1x1x32xi32>
    %26 = arith.cmpi sge, %0, %25 : vector<1x1x32xi32>
    %c32_i32 = arith.constant 32 : i32
    %27 = vector.broadcast %c32_i32 : i32 to vector<1x1x32xi32>
    %28 = arith.cmpi slt, %0, %27 : vector<1x1x32xi32>
    %29 = arith.andi %26, %28 : vector<1x1x32xi1>
    %30 = arith.extui %29 : vector<1x1x32xi1> to vector<1x1x32xi32>
    %31 = arith.sitofp %30 : vector<1x1x32xi32> to vector<1x1x32xf32>
    %32 = arith.truncf %31 : vector<1x1x32xf32> to vector<1x1x32xbf16>
    %c0 = arith.constant 0 : index
    %c0_3 = arith.constant 0 : index
    %c0_4 = arith.constant 0 : index
    %33 = vector.load %arg1[%c0, %c0_3, %c0_4] : memref<2x16x32xf32, #tpu.memory_space<vmem>>, vector<2x16x32xf32>
    %34 = vector.shape_cast %33 : vector<2x16x32xf32> to vector<32x32xf32>
    %c0_5 = arith.constant 0 : index
    %c0_6 = arith.constant 0 : index
    %c0_7 = arith.constant 0 : index
    %35 = vector.load %arg2[%c0_5, %c0_6, %c0_7] : memref<12x64x128xbf16, #tpu.memory_space<vmem>>, vector<1x32x96xbf16>
    %36 = vector.shape_cast %35 : vector<1x32x96xbf16> to vector<32x96xbf16>
    %c1 = arith.constant 1 : index
    %c0_8 = arith.constant 0 : index
    %c0_9 = arith.constant 0 : index
    %37 = vector.load %arg2[%c1, %c0_8, %c0_9] : memref<12x64x128xbf16, #tpu.memory_space<vmem>>, vector<1x32x32xbf16>
    %38 = vector.shape_cast %37 : vector<1x32x32xbf16> to vector<32x32xbf16>
    %c2 = arith.constant 2 : index
    %c0_10 = arith.constant 0 : index
    %c0_11 = arith.constant 0 : index
    %39 = vector.load %arg2[%c2, %c0_10, %c0_11] : memref<12x64x128xbf16, #tpu.memory_space<vmem>>, vector<1x32x64xbf16>
    %40 = vector.shape_cast %39 : vector<1x32x64xbf16> to vector<32x64xbf16>
    %c3 = arith.constant 3 : index
    %c0_12 = arith.constant 0 : index
    %c0_13 = arith.constant 0 : index
    %41 = vector.load %arg2[%c3, %c0_12, %c0_13] : memref<12x64x128xbf16, #tpu.memory_space<vmem>>, vector<1x64x32xbf16>
    %42 = vector.shape_cast %41 : vector<1x64x32xbf16> to vector<64x32xbf16>
    %c0_14 = arith.constant 0 : index
    %c0_15 = arith.constant 0 : index
    %43 = vector.load %arg3[%c0_14, %c0_15] : memref<21x128xf32, #tpu.memory_space<vmem>>, vector<1x96xf32>
    %c1_16 = arith.constant 1 : index
    %c0_17 = arith.constant 0 : index
    %44 = vector.load %arg3[%c1_16, %c0_17] : memref<21x128xf32, #tpu.memory_space<vmem>>, vector<1x32xf32>
    %c2_18 = arith.constant 2 : index
    %c0_19 = arith.constant 0 : index
    %45 = vector.load %arg3[%c2_18, %c0_19] : memref<21x128xf32, #tpu.memory_space<vmem>>, vector<1x64xf32>
    %c3_20 = arith.constant 3 : index
    %c0_21 = arith.constant 0 : index
    %46 = vector.load %arg3[%c3_20, %c0_21] : memref<21x128xf32, #tpu.memory_space<vmem>>, vector<1x32xf32>
    %c4 = arith.constant 4 : index
    %c0_22 = arith.constant 0 : index
    %47 = vector.load %arg3[%c4, %c0_22] : memref<21x128xf32, #tpu.memory_space<vmem>>, vector<1x32xf32>
    %c5 = arith.constant 5 : index
    %c0_23 = arith.constant 0 : index
    %48 = vector.load %arg3[%c5, %c0_23] : memref<21x128xf32, #tpu.memory_space<vmem>>, vector<1x32xf32>
    %c6 = arith.constant 6 : index
    %c0_24 = arith.constant 0 : index
    %49 = vector.load %arg3[%c6, %c0_24] : memref<21x128xf32, #tpu.memory_space<vmem>>, vector<1x32xf32>
    %c7 = arith.constant 7 : index
    %c0_25 = arith.constant 0 : index
    %50 = vector.load %arg3[%c7, %c0_25] : memref<21x128xf32, #tpu.memory_space<vmem>>, vector<1x32xf32>
    %51 = arith.truncf %34 : vector<32x32xf32> to vector<32x32xbf16>
    %cst = arith.constant dense<0.000000e+00> : vector<32x96xf32>
    %52 = tpu.matmul %51, %36, %cst {dimension_numbers = #tpu.dot_dimension_numbers<[1], [0], [0], [1], [0, 0, 1, 1], [], []>} : vector<32x32xbf16>, vector<32x96xbf16>, vector<32x96xf32> -> vector<32x96xf32>
    %53 = vector.broadcast %43 : vector<1x96xf32> to vector<32x96xf32>
    %54 = arith.addf %52, %53 : vector<32x96xf32>
    %55 = vector.extract_strided_slice %54 {offsets = [0, 0], sizes = [32, 32], strides = [1, 1]} : vector<32x96xf32> to vector<32x32xf32>
    %56 = vector.shape_cast %55 : vector<32x32xf32> to vector<2x16x32xf32>
    %57 = arith.truncf %56 : vector<2x16x32xf32> to vector<2x16x32xbf16>
    %58 = vector.extract_strided_slice %54 {offsets = [0, 32], sizes = [32, 32], strides = [1, 1]} : vector<32x96xf32> to vector<32x32xf32>
    %59 = vector.shape_cast %58 : vector<32x32xf32> to vector<2x16x32xf32>
    %60 = arith.truncf %59 : vector<2x16x32xf32> to vector<2x16x32xbf16>
    %61 = vector.extract_strided_slice %54 {offsets = [0, 64], sizes = [32, 32], strides = [1, 1]} : vector<32x96xf32> to vector<32x32xf32>
    %62 = vector.shape_cast %61 : vector<32x32xf32> to vector<2x16x32xf32>
    %63 = arith.truncf %62 : vector<2x16x32xf32> to vector<2x16x32xbf16>
    %cst_26 = arith.constant 0.000000e+00 : f32
    %64 = vector.broadcast %cst_26 : f32 to vector<2x16x32xf32>
    %65 = vector.broadcast %8 : vector<1x1x32xbf16> to vector<2x16x32xbf16>
    %66 = arith.mulf %57, %65 : vector<2x16x32xbf16>
    "tpu.trace_start"() <{level = 10 : i32, message = "bqd,bkd->bqk"}> : () -> ()
    %cst_27 = arith.constant dense<0.000000e+00> : vector<2x16x16xf32>
    %67 = tpu.matmul %66, %60, %cst_27 {dimension_numbers = #tpu.dot_dimension_numbers<[2], [2], [1], [1], [0, 0, 0, 1, 1, 1], [0], [0]>} : vector<2x16x32xbf16>, vector<2x16x32xbf16>, vector<2x16x16xf32> -> vector<2x16x16xf32>
    "tpu.trace_stop"() : () -> ()
    %cst_28 = arith.constant dense<0xFF800000> : vector<2x16xf32>
    %68 = vector.multi_reduction <maximumf>, %67, %cst_28 [2] : vector<2x16x16xf32> to vector<2x16xf32>
    %69 = vector.shape_cast %68 : vector<2x16xf32> to vector<2x16x1xf32>
    %70 = vector.broadcast %69 : vector<2x16x1xf32> to vector<2x16x16xf32>
    %71 = arith.subf %67, %70 : vector<2x16x16xf32>
    %72 = math.exp %71 : vector<2x16x16xf32>
    %cst_29 = arith.constant dense<0.000000e+00> : vector<2x16xf32>
    %73 = vector.multi_reduction <add>, %72, %cst_29 [2] : vector<2x16x16xf32> to vector<2x16xf32>
    %74 = vector.shape_cast %73 : vector<2x16xf32> to vector<2x16x1xf32>
    %75 = tpu.reciprocal %74 {approx = true} : vector<2x16x1xf32> -> vector<2x16x1xf32>
    %76 = vector.broadcast %75 : vector<2x16x1xf32> to vector<2x16x16xf32>
    %77 = arith.mulf %72, %76 : vector<2x16x16xf32>
    %78 = arith.truncf %77 : vector<2x16x16xf32> to vector<2x16x16xbf16>
    %79 = vector.broadcast %8 : vector<1x1x32xbf16> to vector<2x16x32xbf16>
    %80 = arith.mulf %63, %79 : vector<2x16x32xbf16>
    "tpu.trace_start"() <{level = 10 : i32, message = "bqk,bkd->bqd"}> : () -> ()
    %cst_30 = arith.constant dense<0.000000e+00> : vector<2x16x32xf32>
    %81 = tpu.matmul %78, %80, %cst_30 {dimension_numbers = #tpu.dot_dimension_numbers<[2], [1], [1], [2], [0, 0, 0, 1, 1, 2], [0], [0]>} : vector<2x16x16xbf16>, vector<2x16x32xbf16>, vector<2x16x32xf32> -> vector<2x16x32xf32>
    "tpu.trace_stop"() : () -> ()
    %82 = arith.addf %64, %81 : vector<2x16x32xf32>
    %83 = vector.broadcast %16 : vector<1x1x32xbf16> to vector<2x16x32xbf16>
    %84 = arith.mulf %57, %83 : vector<2x16x32xbf16>
    "tpu.trace_start"() <{level = 10 : i32, message = "bqd,bkd->bqk"}> : () -> ()
    %cst_31 = arith.constant dense<0.000000e+00> : vector<2x16x16xf32>
    %85 = tpu.matmul %84, %60, %cst_31 {dimension_numbers = #tpu.dot_dimension_numbers<[2], [2], [1], [1], [0, 0, 0, 1, 1, 1], [0], [0]>} : vector<2x16x32xbf16>, vector<2x16x32xbf16>, vector<2x16x16xf32> -> vector<2x16x16xf32>
    "tpu.trace_stop"() : () -> ()
    %cst_32 = arith.constant dense<0xFF800000> : vector<2x16xf32>
    %86 = vector.multi_reduction <maximumf>, %85, %cst_32 [2] : vector<2x16x16xf32> to vector<2x16xf32>
    %87 = vector.shape_cast %86 : vector<2x16xf32> to vector<2x16x1xf32>
    %88 = vector.broadcast %87 : vector<2x16x1xf32> to vector<2x16x16xf32>
    %89 = arith.subf %85, %88 : vector<2x16x16xf32>
    %90 = math.exp %89 : vector<2x16x16xf32>
    %cst_33 = arith.constant dense<0.000000e+00> : vector<2x16xf32>
    %91 = vector.multi_reduction <add>, %90, %cst_33 [2] : vector<2x16x16xf32> to vector<2x16xf32>
    %92 = vector.shape_cast %91 : vector<2x16xf32> to vector<2x16x1xf32>
    %93 = tpu.reciprocal %92 {approx = true} : vector<2x16x1xf32> -> vector<2x16x1xf32>
    %94 = vector.broadcast %93 : vector<2x16x1xf32> to vector<2x16x16xf32>
    %95 = arith.mulf %90, %94 : vector<2x16x16xf32>
    %96 = arith.truncf %95 : vector<2x16x16xf32> to vector<2x16x16xbf16>
    %97 = vector.broadcast %16 : vector<1x1x32xbf16> to vector<2x16x32xbf16>
    %98 = arith.mulf %63, %97 : vector<2x16x32xbf16>
    "tpu.trace_start"() <{level = 10 : i32, message = "bqk,bkd->bqd"}> : () -> ()
    %cst_34 = arith.constant dense<0.000000e+00> : vector<2x16x32xf32>
    %99 = tpu.matmul %96, %98, %cst_34 {dimension_numbers = #tpu.dot_dimension_numbers<[2], [1], [1], [2], [0, 0, 0, 1, 1, 2], [0], [0]>} : vector<2x16x16xbf16>, vector<2x16x32xbf16>, vector<2x16x32xf32> -> vector<2x16x32xf32>
    "tpu.trace_stop"() : () -> ()
    %100 = arith.addf %82, %99 : vector<2x16x32xf32>
    %101 = vector.broadcast %24 : vector<1x1x32xbf16> to vector<2x16x32xbf16>
    %102 = arith.mulf %57, %101 : vector<2x16x32xbf16>
    "tpu.trace_start"() <{level = 10 : i32, message = "bqd,bkd->bqk"}> : () -> ()
    %cst_35 = arith.constant dense<0.000000e+00> : vector<2x16x16xf32>
    %103 = tpu.matmul %102, %60, %cst_35 {dimension_numbers = #tpu.dot_dimension_numbers<[2], [2], [1], [1], [0, 0, 0, 1, 1, 1], [0], [0]>} : vector<2x16x32xbf16>, vector<2x16x32xbf16>, vector<2x16x16xf32> -> vector<2x16x16xf32>
    "tpu.trace_stop"() : () -> ()
    %cst_36 = arith.constant dense<0xFF800000> : vector<2x16xf32>
    %104 = vector.multi_reduction <maximumf>, %103, %cst_36 [2] : vector<2x16x16xf32> to vector<2x16xf32>
    %105 = vector.shape_cast %104 : vector<2x16xf32> to vector<2x16x1xf32>
    %106 = vector.broadcast %105 : vector<2x16x1xf32> to vector<2x16x16xf32>
    %107 = arith.subf %103, %106 : vector<2x16x16xf32>
    %108 = math.exp %107 : vector<2x16x16xf32>
    %cst_37 = arith.constant dense<0.000000e+00> : vector<2x16xf32>
    %109 = vector.multi_reduction <add>, %108, %cst_37 [2] : vector<2x16x16xf32> to vector<2x16xf32>
    %110 = vector.shape_cast %109 : vector<2x16xf32> to vector<2x16x1xf32>
    %111 = tpu.reciprocal %110 {approx = true} : vector<2x16x1xf32> -> vector<2x16x1xf32>
    %112 = vector.broadcast %111 : vector<2x16x1xf32> to vector<2x16x16xf32>
    %113 = arith.mulf %108, %112 : vector<2x16x16xf32>
    %114 = arith.truncf %113 : vector<2x16x16xf32> to vector<2x16x16xbf16>
    %115 = vector.broadcast %24 : vector<1x1x32xbf16> to vector<2x16x32xbf16>
    %116 = arith.mulf %63, %115 : vector<2x16x32xbf16>
    "tpu.trace_start"() <{level = 10 : i32, message = "bqk,bkd->bqd"}> : () -> ()
    %cst_38 = arith.constant dense<0.000000e+00> : vector<2x16x32xf32>
    %117 = tpu.matmul %114, %116, %cst_38 {dimension_numbers = #tpu.dot_dimension_numbers<[2], [1], [1], [2], [0, 0, 0, 1, 1, 2], [0], [0]>} : vector<2x16x16xbf16>, vector<2x16x32xbf16>, vector<2x16x32xf32> -> vector<2x16x32xf32>
    "tpu.trace_stop"() : () -> ()
    %118 = arith.addf %100, %117 : vector<2x16x32xf32>
    %119 = vector.broadcast %32 : vector<1x1x32xbf16> to vector<2x16x32xbf16>
    %120 = arith.mulf %57, %119 : vector<2x16x32xbf16>
    "tpu.trace_start"() <{level = 10 : i32, message = "bqd,bkd->bqk"}> : () -> ()
    %cst_39 = arith.constant dense<0.000000e+00> : vector<2x16x16xf32>
    %121 = tpu.matmul %120, %60, %cst_39 {dimension_numbers = #tpu.dot_dimension_numbers<[2], [2], [1], [1], [0, 0, 0, 1, 1, 1], [0], [0]>} : vector<2x16x32xbf16>, vector<2x16x32xbf16>, vector<2x16x16xf32> -> vector<2x16x16xf32>
    "tpu.trace_stop"() : () -> ()
    %cst_40 = arith.constant dense<0xFF800000> : vector<2x16xf32>
    %122 = vector.multi_reduction <maximumf>, %121, %cst_40 [2] : vector<2x16x16xf32> to vector<2x16xf32>
    %123 = vector.shape_cast %122 : vector<2x16xf32> to vector<2x16x1xf32>
    %124 = vector.broadcast %123 : vector<2x16x1xf32> to vector<2x16x16xf32>
    %125 = arith.subf %121, %124 : vector<2x16x16xf32>
    %126 = math.exp %125 : vector<2x16x16xf32>
    %cst_41 = arith.constant dense<0.000000e+00> : vector<2x16xf32>
    %127 = vector.multi_reduction <add>, %126, %cst_41 [2] : vector<2x16x16xf32> to vector<2x16xf32>
    %128 = vector.shape_cast %127 : vector<2x16xf32> to vector<2x16x1xf32>
    %129 = tpu.reciprocal %128 {approx = true} : vector<2x16x1xf32> -> vector<2x16x1xf32>
    %130 = vector.broadcast %129 : vector<2x16x1xf32> to vector<2x16x16xf32>
    %131 = arith.mulf %126, %130 : vector<2x16x16xf32>
    %132 = arith.truncf %131 : vector<2x16x16xf32> to vector<2x16x16xbf16>
    %133 = vector.broadcast %32 : vector<1x1x32xbf16> to vector<2x16x32xbf16>
    %134 = arith.mulf %63, %133 : vector<2x16x32xbf16>
    "tpu.trace_start"() <{level = 10 : i32, message = "bqk,bkd->bqd"}> : () -> ()
    %cst_42 = arith.constant dense<0.000000e+00> : vector<2x16x32xf32>
    %135 = tpu.matmul %132, %134, %cst_42 {dimension_numbers = #tpu.dot_dimension_numbers<[2], [1], [1], [2], [0, 0, 0, 1, 1, 2], [0], [0]>} : vector<2x16x16xbf16>, vector<2x16x32xbf16>, vector<2x16x32xf32> -> vector<2x16x32xf32>
    "tpu.trace_stop"() : () -> ()
    %136 = arith.addf %118, %135 : vector<2x16x32xf32>
    %137 = vector.shape_cast %136 : vector<2x16x32xf32> to vector<32x32xf32>
    %138 = arith.truncf %137 : vector<32x32xf32> to vector<32x32xbf16>
    %cst_43 = arith.constant dense<0.000000e+00> : vector<32x32xf32>
    %139 = tpu.matmul %138, %38, %cst_43 {dimension_numbers = #tpu.dot_dimension_numbers<[1], [0], [0], [1], [0, 0, 1, 1], [], []>} : vector<32x32xbf16>, vector<32x32xbf16>, vector<32x32xf32> -> vector<32x32xf32>
    %140 = arith.addf %34, %139 : vector<32x32xf32>
    %141 = vector.broadcast %44 : vector<1x32xf32> to vector<32x32xf32>
    %142 = arith.addf %140, %141 : vector<32x32xf32>
    %cst_44 = arith.constant dense<0.000000e+00> : vector<32xf32>
    %143 = vector.multi_reduction <add>, %142, %cst_44 [1] : vector<32x32xf32> to vector<32xf32>
    %144 = vector.shape_cast %143 : vector<32xf32> to vector<32x1xf32>
    %cst_45 = arith.constant 3.200000e+01 : f32
    %145 = vector.broadcast %cst_45 : f32 to vector<32x1xf32>
    %146 = arith.divf %144, %145 : vector<32x1xf32>
    %147 = vector.broadcast %146 : vector<32x1xf32> to vector<32x32xf32>
    %148 = arith.subf %142, %147 : vector<32x32xf32>
    %149 = arith.mulf %148, %148 : vector<32x32xf32>
    %cst_46 = arith.constant dense<0.000000e+00> : vector<32xf32>
    %150 = vector.multi_reduction <add>, %149, %cst_46 [1] : vector<32x32xf32> to vector<32xf32>
    %151 = vector.shape_cast %150 : vector<32xf32> to vector<32x1xf32>
    %cst_47 = arith.constant 3.200000e+01 : f32
    %152 = vector.broadcast %cst_47 : f32 to vector<32x1xf32>
    %153 = arith.divf %151, %152 : vector<32x1xf32>
    %154 = vector.broadcast %146 : vector<32x1xf32> to vector<32x32xf32>
    %155 = arith.subf %142, %154 : vector<32x32xf32>
    %cst_48 = arith.constant 9.99999974E-6 : f32
    %156 = vector.broadcast %cst_48 : f32 to vector<32x1xf32>
    %157 = arith.addf %153, %156 : vector<32x1xf32>
    %158 = math.rsqrt %157 : vector<32x1xf32>
    %159 = vector.broadcast %158 : vector<32x1xf32> to vector<32x32xf32>
    %160 = arith.mulf %155, %159 : vector<32x32xf32>
    %161 = vector.broadcast %47 : vector<1x32xf32> to vector<32x32xf32>
    %162 = arith.mulf %160, %161 : vector<32x32xf32>
    %163 = vector.broadcast %48 : vector<1x32xf32> to vector<32x32xf32>
    %164 = arith.addf %162, %163 : vector<32x32xf32>
    %165 = arith.truncf %164 : vector<32x32xf32> to vector<32x32xbf16>
    %cst_49 = arith.constant dense<0.000000e+00> : vector<32x64xf32>
    %166 = tpu.matmul %165, %40, %cst_49 {dimension_numbers = #tpu.dot_dimension_numbers<[1], [0], [0], [1], [0, 0, 1, 1], [], []>} : vector<32x32xbf16>, vector<32x64xbf16>, vector<32x64xf32> -> vector<32x64xf32>
    %167 = vector.broadcast %45 : vector<1x64xf32> to vector<32x64xf32>
    %168 = arith.addf %166, %167 : vector<32x64xf32>
    %cst_50 = arith.constant 0.000000e+00 : f32
    %169 = vector.broadcast %cst_50 : f32 to vector<32x64xf32>
    %170 = arith.maximumf %168, %169 : vector<32x64xf32>
    %171 = arith.truncf %170 : vector<32x64xf32> to vector<32x64xbf16>
    %cst_51 = arith.constant dense<0.000000e+00> : vector<32x32xf32>
    %172 = tpu.matmul %171, %42, %cst_51 {dimension_numbers = #tpu.dot_dimension_numbers<[1], [0], [0], [1], [0, 0, 1, 1], [], []>} : vector<32x64xbf16>, vector<64x32xbf16>, vector<32x32xf32> -> vector<32x32xf32>
    %173 = vector.broadcast %46 : vector<1x32xf32> to vector<32x32xf32>
    %174 = arith.addf %172, %173 : vector<32x32xf32>
    %175 = arith.addf %164, %174 : vector<32x32xf32>
    %cst_52 = arith.constant dense<0.000000e+00> : vector<32xf32>
    %176 = vector.multi_reduction <add>, %175, %cst_52 [1] : vector<32x32xf32> to vector<32xf32>
    %177 = vector.shape_cast %176 : vector<32xf32> to vector<32x1xf32>
    %cst_53 = arith.constant 3.200000e+01 : f32
    %178 = vector.broadcast %cst_53 : f32 to vector<32x1xf32>
    %179 = arith.divf %177, %178 : vector<32x1xf32>
    %180 = vector.broadcast %179 : vector<32x1xf32> to vector<32x32xf32>
    %181 = arith.subf %175, %180 : vector<32x32xf32>
    %182 = arith.mulf %181, %181 : vector<32x32xf32>
    %cst_54 = arith.constant dense<0.000000e+00> : vector<32xf32>
    %183 = vector.multi_reduction <add>, %182, %cst_54 [1] : vector<32x32xf32> to vector<32xf32>
    %184 = vector.shape_cast %183 : vector<32xf32> to vector<32x1xf32>
    %cst_55 = arith.constant 3.200000e+01 : f32
    %185 = vector.broadcast %cst_55 : f32 to vector<32x1xf32>
    %186 = arith.divf %184, %185 : vector<32x1xf32>
    %187 = vector.broadcast %179 : vector<32x1xf32> to vector<32x32xf32>
    %188 = arith.subf %175, %187 : vector<32x32xf32>
    %cst_56 = arith.constant 9.99999974E-6 : f32
    %189 = vector.broadcast %cst_56 : f32 to vector<32x1xf32>
    %190 = arith.addf %186, %189 : vector<32x1xf32>
    %191 = math.rsqrt %190 : vector<32x1xf32>
    %192 = vector.broadcast %191 : vector<32x1xf32> to vector<32x32xf32>
    %193 = arith.mulf %188, %192 : vector<32x32xf32>
    %194 = vector.broadcast %49 : vector<1x32xf32> to vector<32x32xf32>
    %195 = arith.mulf %193, %194 : vector<32x32xf32>
    %196 = vector.broadcast %50 : vector<1x32xf32> to vector<32x32xf32>
    %197 = arith.addf %195, %196 : vector<32x32xf32>
    %c8 = arith.constant 8 : index
    %c0_57 = arith.constant 0 : index
    %c0_58 = arith.constant 0 : index
    %198 = vector.load %arg2[%c8, %c0_57, %c0_58] : memref<12x64x128xbf16, #tpu.memory_space<vmem>>, vector<1x32x32xbf16>
    %199 = vector.shape_cast %198 : vector<1x32x32xbf16> to vector<32x32xbf16>
    %c9 = arith.constant 9 : index
    %c0_59 = arith.constant 0 : index
    %c0_60 = arith.constant 0 : index
    %200 = vector.load %arg2[%c9, %c0_59, %c0_60] : memref<12x64x128xbf16, #tpu.memory_space<vmem>>, vector<1x32x32xbf16>
    %201 = vector.shape_cast %200 : vector<1x32x32xbf16> to vector<32x32xbf16>
    %c10 = arith.constant 10 : index
    %c0_61 = arith.constant 0 : index
    %c0_62 = arith.constant 0 : index
    %202 = vector.load %arg2[%c10, %c0_61, %c0_62] : memref<12x64x128xbf16, #tpu.memory_space<vmem>>, vector<1x32x32xbf16>
    %203 = vector.shape_cast %202 : vector<1x32x32xbf16> to vector<32x32xbf16>
    %c11 = arith.constant 11 : index
    %c0_63 = arith.constant 0 : index
    %c0_64 = arith.constant 0 : index
    %204 = vector.load %arg2[%c11, %c0_63, %c0_64] : memref<12x64x128xbf16, #tpu.memory_space<vmem>>, vector<1x8x16xbf16>
    %205 = vector.shape_cast %204 : vector<1x8x16xbf16> to vector<8x16xbf16>
    %c16 = arith.constant 16 : index
    %c0_65 = arith.constant 0 : index
    %206 = vector.load %arg3[%c16, %c0_65] : memref<21x128xf32, #tpu.memory_space<vmem>>, vector<1x32xf32>
    %c17 = arith.constant 17 : index
    %c0_66 = arith.constant 0 : index
    %207 = vector.load %arg3[%c17, %c0_66] : memref<21x128xf32, #tpu.memory_space<vmem>>, vector<1x32xf32>
    %c18 = arith.constant 18 : index
    %c0_67 = arith.constant 0 : index
    %208 = vector.load %arg3[%c18, %c0_67] : memref<21x128xf32, #tpu.memory_space<vmem>>, vector<1x32xf32>
    %209 = arith.truncf %197 : vector<32x32xf32> to vector<32x32xbf16>
    %cst_68 = arith.constant dense<0.000000e+00> : vector<32x32xf32>
    %210 = tpu.matmul %209, %199, %cst_68 {dimension_numbers = #tpu.dot_dimension_numbers<[1], [0], [0], [1], [0, 0, 1, 1], [], []>} : vector<32x32xbf16>, vector<32x32xbf16>, vector<32x32xf32> -> vector<32x32xf32>
    %cst_69 = arith.constant dense<0.000000e+00> : vector<32x32xf32>
    %211 = tpu.matmul %209, %201, %cst_69 {dimension_numbers = #tpu.dot_dimension_numbers<[1], [0], [0], [1], [0, 0, 1, 1], [], []>} : vector<32x32xbf16>, vector<32x32xbf16>, vector<32x32xf32> -> vector<32x32xf32>
    %cst_70 = arith.constant dense<0.000000e+00> : vector<32x32xf32>
    %212 = tpu.matmul %209, %203, %cst_70 {dimension_numbers = #tpu.dot_dimension_numbers<[1], [0], [0], [1], [0, 0, 1, 1], [], []>} : vector<32x32xbf16>, vector<32x32xbf16>, vector<32x32xf32> -> vector<32x32xf32>
    %213 = tpu.iota {dimensions = array<i32: 0>} : vector<16x32xi32>
    %214 = vector.extract_strided_slice %210 {offsets = [0, 0], sizes = [16, 32], strides = [1, 1]} : vector<32x32xf32> to vector<16x32xf32>
    %c1_i32 = arith.constant 1 : i32
    %215 = tpu.dynamic_rotate %214 by %c1_i32 dim 0 : vector<16x32xf32>, i32 -> vector<16x32xf32>
    %216 = vector.extract_strided_slice %211 {offsets = [0, 0], sizes = [16, 32], strides = [1, 1]} : vector<32x32xf32> to vector<16x32xf32>
    %217 = arith.addf %215, %216 : vector<16x32xf32>
    %218 = vector.extract_strided_slice %212 {offsets = [0, 0], sizes = [16, 32], strides = [1, 1]} : vector<32x32xf32> to vector<16x32xf32>
    %c15_i32 = arith.constant 15 : i32
    %219 = tpu.dynamic_rotate %218 by %c15_i32 dim 0 : vector<16x32xf32>, i32 -> vector<16x32xf32>
    %220 = arith.addf %217, %219 : vector<16x32xf32>
    %221 = vector.broadcast %206 : vector<1x32xf32> to vector<16x32xf32>
    %222 = arith.addf %220, %221 : vector<16x32xf32>
    %223 = vector.broadcast %207 : vector<1x32xf32> to vector<16x32xf32>
    %224 = arith.mulf %222, %223 : vector<16x32xf32>
    %225 = vector.broadcast %208 : vector<1x32xf32> to vector<16x32xf32>
    %226 = arith.addf %224, %225 : vector<16x32xf32>
    %cst_71 = arith.constant 0.000000e+00 : f32
    %227 = vector.broadcast %cst_71 : f32 to vector<16x32xf32>
    %228 = arith.cmpf ogt, %226, %227 : vector<16x32xf32>
    %229 = math.exp %226 : vector<16x32xf32>
    %cst_72 = arith.constant 1.000000e+00 : f32
    %230 = vector.broadcast %cst_72 : f32 to vector<16x32xf32>
    %231 = arith.subf %229, %230 : vector<16x32xf32>
    %232 = arith.select %228, %226, %231 : vector<16x32xi1>, vector<16x32xf32>
    %c0_i32_73 = arith.constant 0 : i32
    %233 = vector.broadcast %c0_i32_73 : i32 to vector<16x32xi32>
    %234 = arith.cmpi eq, %213, %233 : vector<16x32xi32>
    %c1_i32_74 = arith.constant 1 : i32
    %235 = tpu.dynamic_rotate %232 by %c1_i32_74 dim 0 : vector<16x32xf32>, i32 -> vector<16x32xf32>
    %cst_75 = arith.constant -1.000000e+30 : f32
    %236 = vector.broadcast %cst_75 : f32 to vector<16x32xf32>
    %237 = arith.select %234, %236, %235 : vector<16x32xi1>, vector<16x32xf32>
    %c15_i32_76 = arith.constant 15 : i32
    %238 = vector.broadcast %c15_i32_76 : i32 to vector<16x32xi32>
    %239 = arith.cmpi eq, %213, %238 : vector<16x32xi32>
    %c15_i32_77 = arith.constant 15 : i32
    %240 = tpu.dynamic_rotate %232 by %c15_i32_77 dim 0 : vector<16x32xf32>, i32 -> vector<16x32xf32>
    %cst_78 = arith.constant -1.000000e+30 : f32
    %241 = vector.broadcast %cst_78 : f32 to vector<16x32xf32>
    %242 = arith.select %239, %241, %240 : vector<16x32xi1>, vector<16x32xf32>
    %243 = arith.maximumf %237, %232 : vector<16x32xf32>
    %244 = arith.maximumf %243, %242 : vector<16x32xf32>
    %245 = arith.truncf %244 : vector<16x32xf32> to vector<16x32xbf16>
    %cst_79 = arith.constant dense<0.000000e+00> : vector<8x32xf32>
    %246 = tpu.matmul %205, %245, %cst_79 {dimension_numbers = #tpu.dot_dimension_numbers<[1], [0], [0], [1], [0, 0, 1, 1], [], []>} : vector<8x16xbf16>, vector<16x32xbf16>, vector<8x32xf32> -> vector<8x32xf32>
    %247 = vector.extract_strided_slice %210 {offsets = [16, 0], sizes = [16, 32], strides = [1, 1]} : vector<32x32xf32> to vector<16x32xf32>
    %c1_i32_80 = arith.constant 1 : i32
    %248 = tpu.dynamic_rotate %247 by %c1_i32_80 dim 0 : vector<16x32xf32>, i32 -> vector<16x32xf32>
    %249 = vector.extract_strided_slice %211 {offsets = [16, 0], sizes = [16, 32], strides = [1, 1]} : vector<32x32xf32> to vector<16x32xf32>
    %250 = arith.addf %248, %249 : vector<16x32xf32>
    %251 = vector.extract_strided_slice %212 {offsets = [16, 0], sizes = [16, 32], strides = [1, 1]} : vector<32x32xf32> to vector<16x32xf32>
    %c15_i32_81 = arith.constant 15 : i32
    %252 = tpu.dynamic_rotate %251 by %c15_i32_81 dim 0 : vector<16x32xf32>, i32 -> vector<16x32xf32>
    %253 = arith.addf %250, %252 : vector<16x32xf32>
    %254 = vector.broadcast %206 : vector<1x32xf32> to vector<16x32xf32>
    %255 = arith.addf %253, %254 : vector<16x32xf32>
    %256 = vector.broadcast %207 : vector<1x32xf32> to vector<16x32xf32>
    %257 = arith.mulf %255, %256 : vector<16x32xf32>
    %258 = vector.broadcast %208 : vector<1x32xf32> to vector<16x32xf32>
    %259 = arith.addf %257, %258 : vector<16x32xf32>
    %cst_82 = arith.constant 0.000000e+00 : f32
    %260 = vector.broadcast %cst_82 : f32 to vector<16x32xf32>
    %261 = arith.cmpf ogt, %259, %260 : vector<16x32xf32>
    %262 = math.exp %259 : vector<16x32xf32>
    %cst_83 = arith.constant 1.000000e+00 : f32
    %263 = vector.broadcast %cst_83 : f32 to vector<16x32xf32>
    %264 = arith.subf %262, %263 : vector<16x32xf32>
    %265 = arith.select %261, %259, %264 : vector<16x32xi1>, vector<16x32xf32>
    %c0_i32_84 = arith.constant 0 : i32
    %266 = vector.broadcast %c0_i32_84 : i32 to vector<16x32xi32>
    %267 = arith.cmpi eq, %213, %266 : vector<16x32xi32>
    %c1_i32_85 = arith.constant 1 : i32
    %268 = tpu.dynamic_rotate %265 by %c1_i32_85 dim 0 : vector<16x32xf32>, i32 -> vector<16x32xf32>
    %cst_86 = arith.constant -1.000000e+30 : f32
    %269 = vector.broadcast %cst_86 : f32 to vector<16x32xf32>
    %270 = arith.select %267, %269, %268 : vector<16x32xi1>, vector<16x32xf32>
    %c15_i32_87 = arith.constant 15 : i32
    %271 = vector.broadcast %c15_i32_87 : i32 to vector<16x32xi32>
    %272 = arith.cmpi eq, %213, %271 : vector<16x32xi32>
    %c15_i32_88 = arith.constant 15 : i32
    %273 = tpu.dynamic_rotate %265 by %c15_i32_88 dim 0 : vector<16x32xf32>, i32 -> vector<16x32xf32>
    %cst_89 = arith.constant -1.000000e+30 : f32
    %274 = vector.broadcast %cst_89 : f32 to vector<16x32xf32>
    %275 = arith.select %272, %274, %273 : vector<16x32xi1>, vector<16x32xf32>
    %276 = arith.maximumf %270, %265 : vector<16x32xf32>
    %277 = arith.maximumf %276, %275 : vector<16x32xf32>
    %278 = arith.truncf %277 : vector<16x32xf32> to vector<16x32xbf16>
    %cst_90 = arith.constant dense<0.000000e+00> : vector<8x32xf32>
    %279 = tpu.matmul %205, %278, %cst_90 {dimension_numbers = #tpu.dot_dimension_numbers<[1], [0], [0], [1], [0, 0, 1, 1], [], []>} : vector<8x16xbf16>, vector<16x32xbf16>, vector<8x32xf32> -> vector<8x32xf32>
    %280 = tpu.concatenate %246, %279 in 0 : vector<8x32xf32>, vector<8x32xf32> -> vector<16x32xf32>
    %c4_91 = arith.constant 4 : index
    %c0_92 = arith.constant 0 : index
    %c0_93 = arith.constant 0 : index
    %281 = vector.load %arg2[%c4_91, %c0_92, %c0_93] : memref<12x64x128xbf16, #tpu.memory_space<vmem>>, vector<1x32x96xbf16>
    %282 = vector.shape_cast %281 : vector<1x32x96xbf16> to vector<32x96xbf16>
    %c5_94 = arith.constant 5 : index
    %c0_95 = arith.constant 0 : index
    %c0_96 = arith.constant 0 : index
    %283 = vector.load %arg2[%c5_94, %c0_95, %c0_96] : memref<12x64x128xbf16, #tpu.memory_space<vmem>>, vector<1x32x32xbf16>
    %284 = vector.shape_cast %283 : vector<1x32x32xbf16> to vector<32x32xbf16>
    %c6_97 = arith.constant 6 : index
    %c0_98 = arith.constant 0 : index
    %c0_99 = arith.constant 0 : index
    %285 = vector.load %arg2[%c6_97, %c0_98, %c0_99] : memref<12x64x128xbf16, #tpu.memory_space<vmem>>, vector<1x32x64xbf16>
    %286 = vector.shape_cast %285 : vector<1x32x64xbf16> to vector<32x64xbf16>
    %c7_100 = arith.constant 7 : index
    %c0_101 = arith.constant 0 : index
    %c0_102 = arith.constant 0 : index
    %287 = vector.load %arg2[%c7_100, %c0_101, %c0_102] : memref<12x64x128xbf16, #tpu.memory_space<vmem>>, vector<1x64x32xbf16>
    %288 = vector.shape_cast %287 : vector<1x64x32xbf16> to vector<64x32xbf16>
    %c8_103 = arith.constant 8 : index
    %c0_104 = arith.constant 0 : index
    %289 = vector.load %arg3[%c8_103, %c0_104] : memref<21x128xf32, #tpu.memory_space<vmem>>, vector<1x96xf32>
    %c9_105 = arith.constant 9 : index
    %c0_106 = arith.constant 0 : index
    %290 = vector.load %arg3[%c9_105, %c0_106] : memref<21x128xf32, #tpu.memory_space<vmem>>, vector<1x32xf32>
    %c10_107 = arith.constant 10 : index
    %c0_108 = arith.constant 0 : index
    %291 = vector.load %arg3[%c10_107, %c0_108] : memref<21x128xf32, #tpu.memory_space<vmem>>, vector<1x64xf32>
    %c11_109 = arith.constant 11 : index
    %c0_110 = arith.constant 0 : index
    %292 = vector.load %arg3[%c11_109, %c0_110] : memref<21x128xf32, #tpu.memory_space<vmem>>, vector<1x32xf32>
    %c12 = arith.constant 12 : index
    %c0_111 = arith.constant 0 : index
    %293 = vector.load %arg3[%c12, %c0_111] : memref<21x128xf32, #tpu.memory_space<vmem>>, vector<1x32xf32>
    %c13 = arith.constant 13 : index
    %c0_112 = arith.constant 0 : index
    %294 = vector.load %arg3[%c13, %c0_112] : memref<21x128xf32, #tpu.memory_space<vmem>>, vector<1x32xf32>
    %c14 = arith.constant 14 : index
    %c0_113 = arith.constant 0 : index
    %295 = vector.load %arg3[%c14, %c0_113] : memref<21x128xf32, #tpu.memory_space<vmem>>, vector<1x32xf32>
    %c15 = arith.constant 15 : index
    %c0_114 = arith.constant 0 : index
    %296 = vector.load %arg3[%c15, %c0_114] : memref<21x128xf32, #tpu.memory_space<vmem>>, vector<1x32xf32>
    %297 = arith.truncf %280 : vector<16x32xf32> to vector<16x32xbf16>
    %cst_115 = arith.constant dense<0.000000e+00> : vector<16x96xf32>
    %298 = tpu.matmul %297, %282, %cst_115 {dimension_numbers = #tpu.dot_dimension_numbers<[1], [0], [0], [1], [0, 0, 1, 1], [], []>} : vector<16x32xbf16>, vector<32x96xbf16>, vector<16x96xf32> -> vector<16x96xf32>
    %299 = vector.broadcast %289 : vector<1x96xf32> to vector<16x96xf32>
    %300 = arith.addf %298, %299 : vector<16x96xf32>
    %301 = vector.extract_strided_slice %300 {offsets = [0, 0], sizes = [16, 32], strides = [1, 1]} : vector<16x96xf32> to vector<16x32xf32>
    %302 = vector.shape_cast %301 : vector<16x32xf32> to vector<2x8x32xf32>
    %303 = arith.truncf %302 : vector<2x8x32xf32> to vector<2x8x32xbf16>
    %304 = vector.extract_strided_slice %300 {offsets = [0, 32], sizes = [16, 32], strides = [1, 1]} : vector<16x96xf32> to vector<16x32xf32>
    %305 = vector.shape_cast %304 : vector<16x32xf32> to vector<2x8x32xf32>
    %306 = arith.truncf %305 : vector<2x8x32xf32> to vector<2x8x32xbf16>
    %307 = vector.extract_strided_slice %300 {offsets = [0, 64], sizes = [16, 32], strides = [1, 1]} : vector<16x96xf32> to vector<16x32xf32>
    %308 = vector.shape_cast %307 : vector<16x32xf32> to vector<2x8x32xf32>
    %309 = arith.truncf %308 : vector<2x8x32xf32> to vector<2x8x32xbf16>
    %cst_116 = arith.constant 0.000000e+00 : f32
    %310 = vector.broadcast %cst_116 : f32 to vector<2x8x32xf32>
    %311 = vector.broadcast %8 : vector<1x1x32xbf16> to vector<2x8x32xbf16>
    %312 = arith.mulf %303, %311 : vector<2x8x32xbf16>
    "tpu.trace_start"() <{level = 10 : i32, message = "bqd,bkd->bqk"}> : () -> ()
    %cst_117 = arith.constant dense<0.000000e+00> : vector<2x8x8xf32>
    %313 = tpu.matmul %312, %306, %cst_117 {dimension_numbers = #tpu.dot_dimension_numbers<[2], [2], [1], [1], [0, 0, 0, 1, 1, 1], [0], [0]>} : vector<2x8x32xbf16>, vector<2x8x32xbf16>, vector<2x8x8xf32> -> vector<2x8x8xf32>
    "tpu.trace_stop"() : () -> ()
    %cst_118 = arith.constant dense<0xFF800000> : vector<2x8xf32>
    %314 = vector.multi_reduction <maximumf>, %313, %cst_118 [2] : vector<2x8x8xf32> to vector<2x8xf32>
    %315 = vector.shape_cast %314 : vector<2x8xf32> to vector<2x8x1xf32>
    %316 = vector.broadcast %315 : vector<2x8x1xf32> to vector<2x8x8xf32>
    %317 = arith.subf %313, %316 : vector<2x8x8xf32>
    %318 = math.exp %317 : vector<2x8x8xf32>
    %cst_119 = arith.constant dense<0.000000e+00> : vector<2x8xf32>
    %319 = vector.multi_reduction <add>, %318, %cst_119 [2] : vector<2x8x8xf32> to vector<2x8xf32>
    %320 = vector.shape_cast %319 : vector<2x8xf32> to vector<2x8x1xf32>
    %321 = tpu.reciprocal %320 {approx = true} : vector<2x8x1xf32> -> vector<2x8x1xf32>
    %322 = vector.broadcast %321 : vector<2x8x1xf32> to vector<2x8x8xf32>
    %323 = arith.mulf %318, %322 : vector<2x8x8xf32>
    %324 = arith.truncf %323 : vector<2x8x8xf32> to vector<2x8x8xbf16>
    %325 = vector.broadcast %8 : vector<1x1x32xbf16> to vector<2x8x32xbf16>
    %326 = arith.mulf %309, %325 : vector<2x8x32xbf16>
    "tpu.trace_start"() <{level = 10 : i32, message = "bqk,bkd->bqd"}> : () -> ()
    %cst_120 = arith.constant dense<0.000000e+00> : vector<2x8x32xf32>
    %327 = tpu.matmul %324, %326, %cst_120 {dimension_numbers = #tpu.dot_dimension_numbers<[2], [1], [1], [2], [0, 0, 0, 1, 1, 2], [0], [0]>} : vector<2x8x8xbf16>, vector<2x8x32xbf16>, vector<2x8x32xf32> -> vector<2x8x32xf32>
    "tpu.trace_stop"() : () -> ()
    %328 = arith.addf %310, %327 : vector<2x8x32xf32>
    %329 = vector.broadcast %16 : vector<1x1x32xbf16> to vector<2x8x32xbf16>
    %330 = arith.mulf %303, %329 : vector<2x8x32xbf16>
    "tpu.trace_start"() <{level = 10 : i32, message = "bqd,bkd->bqk"}> : () -> ()
    %cst_121 = arith.constant dense<0.000000e+00> : vector<2x8x8xf32>
    %331 = tpu.matmul %330, %306, %cst_121 {dimension_numbers = #tpu.dot_dimension_numbers<[2], [2], [1], [1], [0, 0, 0, 1, 1, 1], [0], [0]>} : vector<2x8x32xbf16>, vector<2x8x32xbf16>, vector<2x8x8xf32> -> vector<2x8x8xf32>
    "tpu.trace_stop"() : () -> ()
    %cst_122 = arith.constant dense<0xFF800000> : vector<2x8xf32>
    %332 = vector.multi_reduction <maximumf>, %331, %cst_122 [2] : vector<2x8x8xf32> to vector<2x8xf32>
    %333 = vector.shape_cast %332 : vector<2x8xf32> to vector<2x8x1xf32>
    %334 = vector.broadcast %333 : vector<2x8x1xf32> to vector<2x8x8xf32>
    %335 = arith.subf %331, %334 : vector<2x8x8xf32>
    %336 = math.exp %335 : vector<2x8x8xf32>
    %cst_123 = arith.constant dense<0.000000e+00> : vector<2x8xf32>
    %337 = vector.multi_reduction <add>, %336, %cst_123 [2] : vector<2x8x8xf32> to vector<2x8xf32>
    %338 = vector.shape_cast %337 : vector<2x8xf32> to vector<2x8x1xf32>
    %339 = tpu.reciprocal %338 {approx = true} : vector<2x8x1xf32> -> vector<2x8x1xf32>
    %340 = vector.broadcast %339 : vector<2x8x1xf32> to vector<2x8x8xf32>
    %341 = arith.mulf %336, %340 : vector<2x8x8xf32>
    %342 = arith.truncf %341 : vector<2x8x8xf32> to vector<2x8x8xbf16>
    %343 = vector.broadcast %16 : vector<1x1x32xbf16> to vector<2x8x32xbf16>
    %344 = arith.mulf %309, %343 : vector<2x8x32xbf16>
    "tpu.trace_start"() <{level = 10 : i32, message = "bqk,bkd->bqd"}> : () -> ()
    %cst_124 = arith.constant dense<0.000000e+00> : vector<2x8x32xf32>
    %345 = tpu.matmul %342, %344, %cst_124 {dimension_numbers = #tpu.dot_dimension_numbers<[2], [1], [1], [2], [0, 0, 0, 1, 1, 2], [0], [0]>} : vector<2x8x8xbf16>, vector<2x8x32xbf16>, vector<2x8x32xf32> -> vector<2x8x32xf32>
    "tpu.trace_stop"() : () -> ()
    %346 = arith.addf %328, %345 : vector<2x8x32xf32>
    %347 = vector.broadcast %24 : vector<1x1x32xbf16> to vector<2x8x32xbf16>
    %348 = arith.mulf %303, %347 : vector<2x8x32xbf16>
    "tpu.trace_start"() <{level = 10 : i32, message = "bqd,bkd->bqk"}> : () -> ()
    %cst_125 = arith.constant dense<0.000000e+00> : vector<2x8x8xf32>
    %349 = tpu.matmul %348, %306, %cst_125 {dimension_numbers = #tpu.dot_dimension_numbers<[2], [2], [1], [1], [0, 0, 0, 1, 1, 1], [0], [0]>} : vector<2x8x32xbf16>, vector<2x8x32xbf16>, vector<2x8x8xf32> -> vector<2x8x8xf32>
    "tpu.trace_stop"() : () -> ()
    %cst_126 = arith.constant dense<0xFF800000> : vector<2x8xf32>
    %350 = vector.multi_reduction <maximumf>, %349, %cst_126 [2] : vector<2x8x8xf32> to vector<2x8xf32>
    %351 = vector.shape_cast %350 : vector<2x8xf32> to vector<2x8x1xf32>
    %352 = vector.broadcast %351 : vector<2x8x1xf32> to vector<2x8x8xf32>
    %353 = arith.subf %349, %352 : vector<2x8x8xf32>
    %354 = math.exp %353 : vector<2x8x8xf32>
    %cst_127 = arith.constant dense<0.000000e+00> : vector<2x8xf32>
    %355 = vector.multi_reduction <add>, %354, %cst_127 [2] : vector<2x8x8xf32> to vector<2x8xf32>
    %356 = vector.shape_cast %355 : vector<2x8xf32> to vector<2x8x1xf32>
    %357 = tpu.reciprocal %356 {approx = true} : vector<2x8x1xf32> -> vector<2x8x1xf32>
    %358 = vector.broadcast %357 : vector<2x8x1xf32> to vector<2x8x8xf32>
    %359 = arith.mulf %354, %358 : vector<2x8x8xf32>
    %360 = arith.truncf %359 : vector<2x8x8xf32> to vector<2x8x8xbf16>
    %361 = vector.broadcast %24 : vector<1x1x32xbf16> to vector<2x8x32xbf16>
    %362 = arith.mulf %309, %361 : vector<2x8x32xbf16>
    "tpu.trace_start"() <{level = 10 : i32, message = "bqk,bkd->bqd"}> : () -> ()
    %cst_128 = arith.constant dense<0.000000e+00> : vector<2x8x32xf32>
    %363 = tpu.matmul %360, %362, %cst_128 {dimension_numbers = #tpu.dot_dimension_numbers<[2], [1], [1], [2], [0, 0, 0, 1, 1, 2], [0], [0]>} : vector<2x8x8xbf16>, vector<2x8x32xbf16>, vector<2x8x32xf32> -> vector<2x8x32xf32>
    "tpu.trace_stop"() : () -> ()
    %364 = arith.addf %346, %363 : vector<2x8x32xf32>
    %365 = vector.broadcast %32 : vector<1x1x32xbf16> to vector<2x8x32xbf16>
    %366 = arith.mulf %303, %365 : vector<2x8x32xbf16>
    "tpu.trace_start"() <{level = 10 : i32, message = "bqd,bkd->bqk"}> : () -> ()
    %cst_129 = arith.constant dense<0.000000e+00> : vector<2x8x8xf32>
    %367 = tpu.matmul %366, %306, %cst_129 {dimension_numbers = #tpu.dot_dimension_numbers<[2], [2], [1], [1], [0, 0, 0, 1, 1, 1], [0], [0]>} : vector<2x8x32xbf16>, vector<2x8x32xbf16>, vector<2x8x8xf32> -> vector<2x8x8xf32>
    "tpu.trace_stop"() : () -> ()
    %cst_130 = arith.constant dense<0xFF800000> : vector<2x8xf32>
    %368 = vector.multi_reduction <maximumf>, %367, %cst_130 [2] : vector<2x8x8xf32> to vector<2x8xf32>
    %369 = vector.shape_cast %368 : vector<2x8xf32> to vector<2x8x1xf32>
    %370 = vector.broadcast %369 : vector<2x8x1xf32> to vector<2x8x8xf32>
    %371 = arith.subf %367, %370 : vector<2x8x8xf32>
    %372 = math.exp %371 : vector<2x8x8xf32>
    %cst_131 = arith.constant dense<0.000000e+00> : vector<2x8xf32>
    %373 = vector.multi_reduction <add>, %372, %cst_131 [2] : vector<2x8x8xf32> to vector<2x8xf32>
    %374 = vector.shape_cast %373 : vector<2x8xf32> to vector<2x8x1xf32>
    %375 = tpu.reciprocal %374 {approx = true} : vector<2x8x1xf32> -> vector<2x8x1xf32>
    %376 = vector.broadcast %375 : vector<2x8x1xf32> to vector<2x8x8xf32>
    %377 = arith.mulf %372, %376 : vector<2x8x8xf32>
    %378 = arith.truncf %377 : vector<2x8x8xf32> to vector<2x8x8xbf16>
    %379 = vector.broadcast %32 : vector<1x1x32xbf16> to vector<2x8x32xbf16>
    %380 = arith.mulf %309, %379 : vector<2x8x32xbf16>
    "tpu.trace_start"() <{level = 10 : i32, message = "bqk,bkd->bqd"}> : () -> ()
    %cst_132 = arith.constant dense<0.000000e+00> : vector<2x8x32xf32>
    %381 = tpu.matmul %378, %380, %cst_132 {dimension_numbers = #tpu.dot_dimension_numbers<[2], [1], [1], [2], [0, 0, 0, 1, 1, 2], [0], [0]>} : vector<2x8x8xbf16>, vector<2x8x32xbf16>, vector<2x8x32xf32> -> vector<2x8x32xf32>
    "tpu.trace_stop"() : () -> ()
    %382 = arith.addf %364, %381 : vector<2x8x32xf32>
    %383 = vector.shape_cast %382 : vector<2x8x32xf32> to vector<16x32xf32>
    %384 = arith.truncf %383 : vector<16x32xf32> to vector<16x32xbf16>
    %cst_133 = arith.constant dense<0.000000e+00> : vector<16x32xf32>
    %385 = tpu.matmul %384, %284, %cst_133 {dimension_numbers = #tpu.dot_dimension_numbers<[1], [0], [0], [1], [0, 0, 1, 1], [], []>} : vector<16x32xbf16>, vector<32x32xbf16>, vector<16x32xf32> -> vector<16x32xf32>
    %386 = arith.addf %280, %385 : vector<16x32xf32>
    %387 = vector.broadcast %290 : vector<1x32xf32> to vector<16x32xf32>
    %388 = arith.addf %386, %387 : vector<16x32xf32>
    %cst_134 = arith.constant dense<0.000000e+00> : vector<16xf32>
    %389 = vector.multi_reduction <add>, %388, %cst_134 [1] : vector<16x32xf32> to vector<16xf32>
    %390 = vector.shape_cast %389 : vector<16xf32> to vector<16x1xf32>
    %cst_135 = arith.constant 3.200000e+01 : f32
    %391 = vector.broadcast %cst_135 : f32 to vector<16x1xf32>
    %392 = arith.divf %390, %391 : vector<16x1xf32>
    %393 = vector.broadcast %392 : vector<16x1xf32> to vector<16x32xf32>
    %394 = arith.subf %388, %393 : vector<16x32xf32>
    %395 = arith.mulf %394, %394 : vector<16x32xf32>
    %cst_136 = arith.constant dense<0.000000e+00> : vector<16xf32>
    %396 = vector.multi_reduction <add>, %395, %cst_136 [1] : vector<16x32xf32> to vector<16xf32>
    %397 = vector.shape_cast %396 : vector<16xf32> to vector<16x1xf32>
    %cst_137 = arith.constant 3.200000e+01 : f32
    %398 = vector.broadcast %cst_137 : f32 to vector<16x1xf32>
    %399 = arith.divf %397, %398 : vector<16x1xf32>
    %400 = vector.broadcast %392 : vector<16x1xf32> to vector<16x32xf32>
    %401 = arith.subf %388, %400 : vector<16x32xf32>
    %cst_138 = arith.constant 9.99999974E-6 : f32
    %402 = vector.broadcast %cst_138 : f32 to vector<16x1xf32>
    %403 = arith.addf %399, %402 : vector<16x1xf32>
    %404 = math.rsqrt %403 : vector<16x1xf32>
    %405 = vector.broadcast %404 : vector<16x1xf32> to vector<16x32xf32>
    %406 = arith.mulf %401, %405 : vector<16x32xf32>
    %407 = vector.broadcast %293 : vector<1x32xf32> to vector<16x32xf32>
    %408 = arith.mulf %406, %407 : vector<16x32xf32>
    %409 = vector.broadcast %294 : vector<1x32xf32> to vector<16x32xf32>
    %410 = arith.addf %408, %409 : vector<16x32xf32>
    %411 = arith.truncf %410 : vector<16x32xf32> to vector<16x32xbf16>
    %cst_139 = arith.constant dense<0.000000e+00> : vector<16x64xf32>
    %412 = tpu.matmul %411, %286, %cst_139 {dimension_numbers = #tpu.dot_dimension_numbers<[1], [0], [0], [1], [0, 0, 1, 1], [], []>} : vector<16x32xbf16>, vector<32x64xbf16>, vector<16x64xf32> -> vector<16x64xf32>
    %413 = vector.broadcast %291 : vector<1x64xf32> to vector<16x64xf32>
    %414 = arith.addf %412, %413 : vector<16x64xf32>
    %cst_140 = arith.constant 0.000000e+00 : f32
    %415 = vector.broadcast %cst_140 : f32 to vector<16x64xf32>
    %416 = arith.maximumf %414, %415 : vector<16x64xf32>
    %417 = arith.truncf %416 : vector<16x64xf32> to vector<16x64xbf16>
    %cst_141 = arith.constant dense<0.000000e+00> : vector<16x32xf32>
    %418 = tpu.matmul %417, %288, %cst_141 {dimension_numbers = #tpu.dot_dimension_numbers<[1], [0], [0], [1], [0, 0, 1, 1], [], []>} : vector<16x64xbf16>, vector<64x32xbf16>, vector<16x32xf32> -> vector<16x32xf32>
    %419 = vector.broadcast %292 : vector<1x32xf32> to vector<16x32xf32>
    %420 = arith.addf %418, %419 : vector<16x32xf32>
    %421 = arith.addf %410, %420 : vector<16x32xf32>
    %cst_142 = arith.constant dense<0.000000e+00> : vector<16xf32>
    %422 = vector.multi_reduction <add>, %421, %cst_142 [1] : vector<16x32xf32> to vector<16xf32>
    %423 = vector.shape_cast %422 : vector<16xf32> to vector<16x1xf32>
    %cst_143 = arith.constant 3.200000e+01 : f32
    %424 = vector.broadcast %cst_143 : f32 to vector<16x1xf32>
    %425 = arith.divf %423, %424 : vector<16x1xf32>
    %426 = vector.broadcast %425 : vector<16x1xf32> to vector<16x32xf32>
    %427 = arith.subf %421, %426 : vector<16x32xf32>
    %428 = arith.mulf %427, %427 : vector<16x32xf32>
    %cst_144 = arith.constant dense<0.000000e+00> : vector<16xf32>
    %429 = vector.multi_reduction <add>, %428, %cst_144 [1] : vector<16x32xf32> to vector<16xf32>
    %430 = vector.shape_cast %429 : vector<16xf32> to vector<16x1xf32>
    %cst_145 = arith.constant 3.200000e+01 : f32
    %431 = vector.broadcast %cst_145 : f32 to vector<16x1xf32>
    %432 = arith.divf %430, %431 : vector<16x1xf32>
    %433 = vector.broadcast %425 : vector<16x1xf32> to vector<16x32xf32>
    %434 = arith.subf %421, %433 : vector<16x32xf32>
    %cst_146 = arith.constant 9.99999974E-6 : f32
    %435 = vector.broadcast %cst_146 : f32 to vector<16x1xf32>
    %436 = arith.addf %432, %435 : vector<16x1xf32>
    %437 = math.rsqrt %436 : vector<16x1xf32>
    %438 = vector.broadcast %437 : vector<16x1xf32> to vector<16x32xf32>
    %439 = arith.mulf %434, %438 : vector<16x32xf32>
    %440 = vector.broadcast %295 : vector<1x32xf32> to vector<16x32xf32>
    %441 = arith.mulf %439, %440 : vector<16x32xf32>
    %442 = vector.broadcast %296 : vector<1x32xf32> to vector<16x32xf32>
    %443 = arith.addf %441, %442 : vector<16x32xf32>
    %c19 = arith.constant 19 : index
    %c0_147 = arith.constant 0 : index
    %444 = vector.load %arg3[%c19, %c0_147] : memref<21x128xf32, #tpu.memory_space<vmem>>, vector<1x32xf32>
    %c20 = arith.constant 20 : index
    %c0_148 = arith.constant 0 : index
    %445 = vector.load %arg3[%c20, %c0_148] : memref<21x128xf32, #tpu.memory_space<vmem>>, vector<1x32xf32>
    %cst_149 = arith.constant dense<0.000000e+00> : vector<16xf32>
    %446 = vector.multi_reduction <add>, %443, %cst_149 [1] : vector<16x32xf32> to vector<16xf32>
    %447 = vector.shape_cast %446 : vector<16xf32> to vector<16x1xf32>
    %cst_150 = arith.constant 3.200000e+01 : f32
    %448 = vector.broadcast %cst_150 : f32 to vector<16x1xf32>
    %449 = arith.divf %447, %448 : vector<16x1xf32>
    %450 = vector.broadcast %449 : vector<16x1xf32> to vector<16x32xf32>
    %451 = arith.subf %443, %450 : vector<16x32xf32>
    %452 = arith.mulf %451, %451 : vector<16x32xf32>
    %cst_151 = arith.constant dense<0.000000e+00> : vector<16xf32>
    %453 = vector.multi_reduction <add>, %452, %cst_151 [1] : vector<16x32xf32> to vector<16xf32>
    %454 = vector.shape_cast %453 : vector<16xf32> to vector<16x1xf32>
    %cst_152 = arith.constant 3.200000e+01 : f32
    %455 = vector.broadcast %cst_152 : f32 to vector<16x1xf32>
    %456 = arith.divf %454, %455 : vector<16x1xf32>
    %457 = vector.broadcast %449 : vector<16x1xf32> to vector<16x32xf32>
    %458 = arith.subf %443, %457 : vector<16x32xf32>
    %cst_153 = arith.constant 9.99999974E-6 : f32
    %459 = vector.broadcast %cst_153 : f32 to vector<16x1xf32>
    %460 = arith.addf %456, %459 : vector<16x1xf32>
    %461 = math.rsqrt %460 : vector<16x1xf32>
    %462 = vector.broadcast %461 : vector<16x1xf32> to vector<16x32xf32>
    %463 = arith.mulf %458, %462 : vector<16x32xf32>
    %464 = vector.broadcast %444 : vector<1x32xf32> to vector<16x32xf32>
    %465 = arith.mulf %463, %464 : vector<16x32xf32>
    %466 = vector.broadcast %445 : vector<1x32xf32> to vector<16x32xf32>
    %467 = arith.addf %465, %466 : vector<16x32xf32>
    %468 = vector.shape_cast %467 : vector<16x32xf32> to vector<2x8x32xf32>
    %c0_154 = arith.constant 0 : index
    %c0_155 = arith.constant 0 : index
    %c0_156 = arith.constant 0 : index
    %469 = vector.load %arg4[%c0_154, %c0_155, %c0_156] : memref<2x8x32xf32, #tpu.memory_space<vmem>>, vector<2x8x32xf32>
    tpu.vector_store %arg4[%c0_154, %c0_155, %c0_156], %468 {strides = array<i32>} : memref<2x8x32xf32, #tpu.memory_space<vmem>>, vector<2x8x32xf32>,
    return
  }
  func.func @transform_0(%arg0: i32) -> (i32, i32, i32) {
    %c0_i32 = arith.constant 0 : i32
    %c0_i32_0 = arith.constant 0 : i32
    %c0_i32_1 = arith.constant 0 : i32
    return %arg0, %c0_i32, %c0_i32_0 : i32, i32, i32
  }
  func.func @transform_1(%arg0: i32) -> (i32, i32, i32) {
    %c0_i32 = arith.constant 0 : i32
    %c0_i32_0 = arith.constant 0 : i32
    %c0_i32_1 = arith.constant 0 : i32
    %c0_i32_2 = arith.constant 0 : i32
    return %c0_i32, %c0_i32_0, %c0_i32_1 : i32, i32, i32
  }
  func.func @transform_2(%arg0: i32) -> (i32, i32) {
    %c0_i32 = arith.constant 0 : i32
    %c0_i32_0 = arith.constant 0 : i32
    %c0_i32_1 = arith.constant 0 : i32
    return %c0_i32, %c0_i32_0 : i32, i32
  }
  func.func @transform_3(%arg0: i32) -> (i32, i32, i32) {
    %c0_i32 = arith.constant 0 : i32
    %c0_i32_0 = arith.constant 0 : i32
    %c0_i32_1 = arith.constant 0 : i32
    return %arg0, %c0_i32, %c0_i32_0 : i32, i32, i32
  }
}

</mosaic_0001>

<bundles_post_ra>
// kernel: encoder_forward.1
= control target key start
LH: loop header
LB: loop body
LE: loop exit
PB: predicated region body
PF: predicated region fallthrough
CT: control target
= control target key end

     0   :  { %8 = vsyncpa [#allocation3], 0  ;;  %s4690_s0 = inlined_call_operand.hbm [shape: f32[2,16,32], index: 0, kind: input, shape index: {}]   ;;  %s4691_s1 = inlined_call_operand.hbm [shape: bf16[12,64,128], index: 1, kind: input, shape index: {}]   ;;  %s4692_s2 = inlined_call_operand.hbm [shape: f32[21,128], index: 2, kind: input, shape index: {}]   ;;  %s4693_s3 = inlined_call_operand.hbm [shape: f32[2,8,32], index: 3, kind: output, shape index: {}]  }
   0x1   :  { %9 = vsyncpa [#allocation6], 0 }
   0x2   :  { %10 = vsyncpa [#allocation4], 0  ;;  %s4087_s12 = smov [#allocation5]   ;;  %s3993_s16 = scalar_lea.hbm %s4691_s1, 6144 }
   0x3   :  { %s28_s13 = sshll.u32 %s4087_s12, 4  ;;  %p3994_p0 = scmp.ne.s32.totalorder %s4691_s1, %s3993_s16  ;;  %s29_s13 = int_to_ptr.vmem [resolvable:$true] %s28_s13 }
   0x4   :  { %p3997_p1 = scmp.lt.u32.totalorder %s3993_s16, %s4691_s1 }
   0x6   :  { %p3999_p2 = pnand %p3997_p1, %p3994_p0 }
   0x8   :  { %4002 = shalt.err (!%p3999_p2)
}
   0x9   :  { %s4003_s21 = scalar_lea.vmem %s29_s13, 6144  ;;  %p4008_p4 = scmp.lt.s32.totalorder %s29_s13, %s29_s13 }
   0xa   :  { %p4004_p3 = scmp.ne.s32.totalorder %s29_s13, %s4003_s21  ;;  %p4009_p5 = scmp.lt.s32.totalorder %s4003_s21, %s4003_s21 }
   0xc   :  { %p4010_p6 = por %p4009_p5, %p4008_p4 }
   0xe   :  { %p4011_p7 = pnand %p4010_p6, %p4004_p3 }
  0x10   :  { %4014 = shalt.err (!%p4011_p7)
}
  0x11   :  { %s4088_s22 = smov 64   ;;  %s4089_s23 = smov 4  }
  0x12   :  { %34 = dma.hbm_to_vmem [thread:$0]  %s4691_s1, 6144, %s29_s13, [#allocation6], %s4088_s22, %s4088_s22, %s4089_s23  }
  0x13   :  { %s4090_s26 = smov [#allocation2]   ;;  %s4015_s30 = scalar_lea.hbm %s4690_s0, 512 }
  0x14   :  { %s16_s27 = sshll.u32 %s4090_s26, 4  ;;  %p4016_p8 = scmp.ne.s32.totalorder %s4690_s0, %s4015_s30  ;;  %s17_s27 = int_to_ptr.vmem [resolvable:$true] %s16_s27 }
  0x15   :  { %p4019_p9 = scmp.lt.u32.totalorder %s4015_s30, %s4690_s0 }
  0x17   :  { %p4021_p10 = pnand %p4019_p9, %p4016_p8 }
  0x19   :  { %4024 = shalt.err (!%p4021_p10)
}
  0x1a   :  { %s4025_s8 = scalar_lea.vmem %s17_s27, 512  ;;  %p4030_p12 = scmp.lt.s32.totalorder %s17_s27, %s17_s27 }
  0x1b   :  { %p4026_p11 = scmp.ne.s32.totalorder %s17_s27, %s4025_s8  ;;  %p4031_p13 = scmp.lt.s32.totalorder %s4025_s8, %s4025_s8 }
  0x1d   :  { %p4032_p0 = por %p4031_p13, %p4030_p12 }
  0x1f   :  { %p4033_p1 = pnand %p4032_p0, %p4026_p11 }
  0x21   :  { %4036 = shalt.err (!%p4033_p1)
}
  0x22   :  { %s4091_s1 = smov 128   ;;  %s4092_s9 = smov 8  }
  0x23   :  { %22 = dma.hbm_to_vmem [thread:$0]  %s4690_s0, 512, %s17_s27, [#allocation3], %s4091_s1, %s4091_s1, %s4092_s9  }
  0x24   :  { %s4093_s12 = smov [#allocation7]   ;;  %s4037_s16 = scalar_lea.hbm %s4692_s2, 384 }
  0x25   :  { %s40_s13 = sshll.u32 %s4093_s12, 4  ;;  %p4038_p2 = scmp.ne.s32.totalorder %s4692_s2, %s4037_s16  ;;  %s41_s13 = int_to_ptr.vmem [resolvable:$true] %s40_s13 }
  0x26   :  { %p4041_p3 = scmp.lt.u32.totalorder %s4037_s16, %s4692_s2 }
  0x28   :  { %p4043_p4 = pnand %p4041_p3, %p4038_p2 }
  0x2a   :  { %4046 = shalt.err (!%p4043_p4)
}
  0x2b   :  { %s4047_s21 = scalar_lea.vmem %s41_s13, 384  ;;  %p4052_p6 = scmp.lt.s32.totalorder %s41_s13, %s41_s13 }
  0x2c   :  { %p4048_p5 = scmp.ne.s32.totalorder %s41_s13, %s4047_s21  ;;  %p4053_p7 = scmp.lt.s32.totalorder %s4047_s21, %s4047_s21 }
  0x2e   :  { %p4054_p8 = por %p4053_p7, %p4052_p6 }
  0x30   :  { %p4055_p9 = pnand %p4054_p8, %p4048_p5 }
  0x32   :  { %4058 = shalt.err (!%p4055_p9)
}
  0x33   :  { %46 = dma.hbm_to_vmem [thread:$0]  %s4692_s2, 384, %s41_s13, [#allocation6], %s4091_s1, %s4091_s1, %s4092_s9  }
  0x34   :  { %4081 = dma.done.wait [#allocation3], 512  }
  0x35   :  { %4082 = vsyncadd [#allocation3], 4294966784 }
  0x36   :  { %4083 = dma.done.wait [#allocation6], 6528  }
  0x37   :  { %4084 = vsyncadd [#allocation6], 4294960768  ;;  %v3835_v0 = vld [vmem:[#allocation5] sm:$0xff]   ;;  %v3836_v1 = vld [vmem:[#allocation5 + $0x8] sm:$0xff]   ;;  %vm136_vm0 = vcmask 261120   ;;  %v4094_v8 = vmov 0.0   ;;  %v57_v20 = vlaneseq }
  0x38   :  { %3476 = vmatprep.subr.bf16.mxu0 %v3835_v0  ;;  %v4162_v2 = vld [vmem:[#allocation2] sm:$0xff]  ;;  %v4164_v3 = vld [vmem:[#allocation2 + $0x8] sm:$0xff]  ;;  %v4166_v4 = vld [vmem:[#allocation2 + $0x10] sm:$0xff]  ;;  %3484 = vmatprep.subr.bf16.mxu1 %v4094_v8  ;;  %vm4095_vm1 = vmmov 0   ;;  %s4096_s2 = smov 96   ;;  %vm296_vm6 = vcmask 130048  }
  0x39   :  { %3477 = vmatpush3.bf16.msra.mxu0 %v3835_v0  ;;  %v118_v5 = vpack.c.bf16 %v4164_v3, %v4162_v2  ;;  %v4170_v6 = vld [vmem:[#allocation2 + $0x18] sm:$0xff]  ;;  %v3261_v10 = vld [vmem:[#allocation7] ss:$0 sm:$0xff]  ;;  %3486 = vmatprep.mubr.msk.bf16.mxu1 %vm4095_vm1, %v4094_v8  ;;  %v4191_v21 = vand.u32 127, %v57_v20  ;;  %vm1424_vm13 = vcmask 523264  }
  0x3a   :  { %3478 = vmatprep.subr.bf16.mxu0 %v3836_v1  ;;  %v119_v7 = vpack.c.bf16 %v4170_v6, %v4166_v4 }
  0x3b   :  { %3480 = vmatprep.mubr.msk.bf16.mxu0 %vm136_vm0, %v118_v5  ;;  %vm60_vm2 = vcmp.lt.s32.totalorder %v4191_v21, 8  ;;  %vm65_vm3 = vcmp.ge.s32.totalorder %v4191_v21, 8  ;;  %vm66_vm4 = vcmp.lt.s32.totalorder %v4191_v21, 16  ;;  %vm71_vm7 = vcmp.ge.s32.totalorder %v4191_v21, 16 }
  0x3c   :  { %v3257_v23 = vsel %vm60_vm2, 1.0, %v4094_v8  ;;  %vm67_vm5 = vmand %vm65_vm3, %vm66_vm4  ;;  %vm72_vm8 = vcmp.lt.s32.totalorder %v4191_v21, 24  ;;  %vm77_vm10 = vcmp.ge.s32.totalorder %v4191_v21, 24  ;;  %vm78_vm11 = vcmp.lt.s32.totalorder %v4191_v21, 32 }
  0x3d   :  { %3479 = vmatpush3.bf16.msra.mxu0 %v3836_v1  ;;  %v4201_v25 = vpack.c.bf16 %v3257_v23, %v3257_v23  ;;  %v3258_v29 = vsel %vm67_vm5, 1.0, %v4094_v8  ;;  %vm73_vm9 = vmand %vm71_vm7, %vm72_vm8 }
  0x3e   :  { %3490 = vmatprep.subr.bf16.mxu0 %v4094_v8  ;;  %v4218_v31 = vpack.c.bf16 %v3258_v29, %v3258_v29  ;;  %vm79_vm12 = vmand %vm77_vm10, %vm78_vm11 }
  0x40   :  { %3481 = vmatmul.mubr.msk.bf16.vlgmr.msra.gmra.mrb[0].mxu0 %vm136_vm0, %v119_v7 }
  0x41   :  { %3492 = vmatprep.mubr.msk.bf16.mxu0 %vm4095_vm1, %v4094_v8 }
 0x113   :  { %v3482_v9 = vpop.f32.mrb[0].mxu0 }
 0x114   :  { %v177_v11 = vpop.f32.mrb[1].mxu0  ;;  %v186_v13 = vadd.f32 %v3482_v9, %v3261_v10 }
 0x115   :  { %v3483_v12 = vpop.f32.mrb[2].mxu0  ;;  %v178_v16 = vadd.f32 %v3261_v10, %v177_v11 }
 0x116   :  { %v189_v14 = vadd.f32 %v3483_v12, %v3261_v10  ;;  %v180_v15 = vpop.f32.mrb[3].mxu0 }
 0x117   :  { %v181_v17 = vadd.f32 %v3261_v10, %v180_v15 }
 0x118   :  { %v4182_v18 = vpack.c.bf16 %v189_v14, %v186_v13 }
 0x119   :  { %v4184_v19 = vpack.c.bf16 %v181_v17, %v178_v16 }
 0x11a   :  { %v195_v30 = vmul.bf16 %v4182_v18, %v4201_v25  ;;  %v350_v33 = vmul.bf16 %v4182_v18, %v4218_v31 }
 0x11b   :  { %197 = vrot.lane.b32.xlu0 %v4184_v19, %s4096_s2  ;;  %v194_v28 = vmul.bf16 %v4184_v19, %v4201_v25  ;;  %v349_v32 = vmul.bf16 %v4184_v19, %v4218_v31 }
 0x11f   :  { %247 = vrot.lane.b32.xlu0 %v4182_v18, %s4096_s2 }
 0x18d   :  { %v198_v22 = vpop.permute.xlu0 %197 }
 0x18e   :  { %v4196_v24 = vsel %vm136_vm0, %v198_v22, 0 }
 0x18f   :  { %3485 = vmatpush3.bf16.xpose.msra.mxu1 %v4196_v24 }
 0x190   :  { %3496 = vmatprep.subr.bf16.mxu1 %v4094_v8 }
 0x191   :  { %v248_v26 = vpop.permute.xlu0 %247 }
 0x192   :  { %v4205_v27 = vsel %vm136_vm0, %v248_v26, 0 }
 0x193   :  { %3491 = vmatpush3.bf16.xpose.msra.mxu0 %v4205_v27 }
 0x194   :  { %3502 = vmatprep.subr.bf16.mxu0 %v4094_v8 }
 0x196   :  { %3487 = vmatmul.mubr.msk.bf16.vlgmr.msra.gmra.mrb[0].mxu1 %vm136_vm0, %v194_v28 }
 0x197   :  { %3497 = vmatpush3.bf16.xpose.msra.mxu1 %v4196_v24  ;;  %3498 = vmatprep.mubr.msk.bf16.mxu1 %vm4095_vm1, %v4094_v8 }
 0x198   :  { %3508 = vmatprep.subr.bf16.mxu1 %v4094_v8 }
 0x19a   :  { %3493 = vmatmul.mubr.msk.bf16.vlgmr.msra.gmra.mrb[4].mxu0 %vm136_vm0, %v195_v30 }
 0x19b   :  { %3503 = vmatpush3.bf16.xpose.msra.mxu0 %v4205_v27  ;;  %3504 = vmatprep.mubr.msk.bf16.mxu0 %vm4095_vm1, %v4094_v8 }
 0x19c   :  { %3514 = vmatprep.subr.bf16.mxu0 %v4094_v8 }
 0x19e   :  { %3499 = vmatmul.mubr.msk.bf16.vlgmr.msra.gmra.mrb[4].mxu1 %vm136_vm0, %v349_v32 }
 0x19f   :  { %3510 = vmatprep.mubr.msk.bf16.mxu1 %vm4095_vm1, %v4094_v8 }
 0x1a2   :  { %3505 = vmatmul.mubr.msk.bf16.vlgmr.msra.gmra.mrb[8].mxu0 %vm136_vm0, %v350_v33 }
 0x1a3   :  { %3516 = vmatprep.mubr.msk.bf16.mxu0 %vm4095_vm1, %v4094_v8 }
 0x269   :  { %v4236_v34 = vpop.f32.mrb[0].mxu1 }
 0x26a   :  { %v3488_v35 = vpop.f32.mrb[1].mxu1  ;;  %v297_v36 = vsel %vm296_vm6, %v4236_v34, -inf }
 0x26b   :  { %298 = vmax.xlane.f32.xlu1 %v297_v36  ;;  %v242_v37 = vpop.f32.mrb[2].mxu1 }
 0x26c   :  { %v3489_v38 = vpop.f32.mrb[3].mxu1  ;;  %v300_v55 = vsel %vm296_vm6, %v242_v37, -inf }
 0x26d   :  { %v289_v39 = vpop.f32.mrb[4].mxu0 }
 0x26e   :  { %v3494_v40 = vpop.f32.mrb[5].mxu0  ;;  %v303_v56 = vsel %vm296_vm6, %v289_v39, -inf }
 0x26f   :  { %v292_v41 = vpop.f32.mrb[6].mxu0 }
 0x270   :  { %v3495_v42 = vpop.f32.mrb[7].mxu0  ;;  %v306_v57 = vsel %vm296_vm6, %v292_v41, -inf }
 0x271   :  { %v388_v43 = vpop.f32.mrb[4].mxu1 }
 0x272   :  { %v3500_v44 = vpop.f32.mrb[5].mxu1  ;;  %v439_v45 = vsel %vm296_vm6, %v388_v43, -inf }
 0x273   :  { %440 = vmax.xlane.f32.xlu1 %v439_v45  ;;  %v391_v46 = vpop.f32.mrb[6].mxu1 }
 0x274   :  { %v3501_v47 = vpop.f32.mrb[7].mxu1  ;;  %v442_v54 = vsel %vm296_vm6, %v391_v46, -inf }
 0x275   :  { %v432_v48 = vpop.f32.mrb[8].mxu0 }
 0x276   :  { %v3506_v49 = vpop.f32.mrb[9].mxu0  ;;  %v445_v50 = vsel %vm296_vm6, %v432_v48, -inf }
 0x277   :  { %446 = vmax.xlane.f32.xlu0 %v445_v50  ;;  %v435_v51 = vpop.f32.mrb[10].mxu0 }
 0x278   :  { %v3507_v52 = vpop.f32.mrb[11].mxu0  ;;  %v448_v53 = vsel %vm296_vm6, %v435_v51, -inf }
 0x279   :  { %449 = vmax.xlane.f32.xlu1 %v448_v53 }
 0x27d   :  { %443 = vmax.xlane.f32.xlu1 %v442_v54 }
 0x281   :  { %301 = vmax.xlane.f32.xlu1 %v300_v55 }
 0x285   :  { %304 = vmax.xlane.f32.xlu1 %v303_v56 }
 0x289   :  { %307 = vmax.xlane.f32.xlu1 %v306_v57 }
 0x28d   :  { %344 = vrot.lane.b32.xlu0 %v4201_v25, %s4088_s22 }
 0x29a   :  { %486 = vrot.lane.b32.xlu1 %v4218_v31, %s4088_s22 }
 0x2f8   :  { %v299_v58 = vpop.xlane.xlu1 %298 }
 0x2f9   :  { %v309_v28 = vsub.f32 %v4236_v34, %v299_v58 }
 0x2fb   :  { %v313_v32 = vmul.f32 1.442695, %v309_v28 }
 0x300   :  { %v441_v59 = vpop.xlane.xlu1 %440 }
 0x301   :  { %v451_v35 = vsub.f32 %v388_v43, %v441_v59 }
 0x304   :  { %v447_v30 = vpop.xlane.xlu0 %446 }
 0x305   :  { %v453_v33 = vsub.f32 %v432_v48, %v447_v30 }
 0x306   :  { %v450_v60 = vpop.xlane.xlu1 %449 }
 0x307   :  { %v459_v36 = vmul.f32 1.442695, %v453_v33  ;;  %v454_v38 = vsub.f32 %v435_v51, %v450_v60 }
 0x308   :  { %v4283_v50 = vpop.permute.xlu0 %344 }
 0x309   :  { %v347_v51 = vmul.bf16 %v4283_v50, %v4184_v19  ;;  %v348_v52 = vmul.bf16 %v4283_v50, %v4182_v18 }
 0x30a   :  { %v444_v61 = vpop.xlane.xlu1 %443 }
 0x30b   :  { %v452_v7 = vsub.f32 %v391_v46, %v444_v61 }
 0x30d   :  { %v457_v13 = vmul.f32 1.442695, %v452_v7 }
 0x30e   :  { %v302_v62 = vpop.xlane.xlu1 %301 }
 0x30f   :  { %v310_v0 = vsub.f32 %v242_v37, %v302_v62  ;;  %v455_v37 = vmul.f32 1.442695, %v451_v35 }
 0x311   :  { %v315_v9 = vmul.f32 1.442695, %v310_v0 }
 0x312   :  { %v305_v63 = vpop.xlane.xlu1 %304 }
 0x313   :  { %v311_v23 = vsub.f32 %v289_v39, %v305_v63  ;;  %v461_v39 = vmul.f32 1.442695, %v454_v38 }
 0x315   :  { %v317_v29 = vmul.f32 1.442695, %v311_v23 }
 0x316   :  { %v308_v1 = vpop.xlane.xlu1 %307 }
 0x317   :  { %v312_v5 = vsub.f32 %v292_v41, %v308_v1 }
 0x319   :  { %v319_v10 = vmul.f32 1.442695, %v312_v5 }
 0x31a   :  { %v4251_v11 = vpop.permute.xlu1 %486 }
 0x31b   :  { %3861 = vpow2.f32 %v319_v10  ;;  %v489_v12 = vmul.bf16 %v4251_v11, %v4184_v19  ;;  %v490_v42 = vmul.bf16 %v4251_v11, %v4182_v18 }
 0x31c   :  { %3863 = vpow2.f32 %v315_v9 }
 0x31d   :  { %492 = vrot.lane.b32.xlu1 %v489_v12, %s4088_s22  ;;  %3865 = vpow2.f32 %v457_v13 }
 0x31e   :  { %3867 = vpow2.f32 %v317_v29 }
 0x31f   :  { %3869 = vpow2.f32 %v313_v32 }
 0x320   :  { %3871 = vpow2.f32 %v459_v36  ;;  %v3259_v36 = vsel %vm73_vm9, 1.0, %v4094_v8  ;;  %vm2299_vm9 = vcmask 1043456  }
 0x321   :  { %3873 = vpow2.f32 %v455_v37 }
 0x322   :  { %3875 = vpow2.f32 %v461_v39  ;;  %v4313_v39 = vpack.c.bf16 %v3259_v36, %v3259_v36 }
 0x325   :  { %v4256_v14 = vpop.eup %3861 }
 0x326   :  { %v330_v15 = vsel %vm296_vm6, %v4256_v14, 0.0  ;;  %v4260_v16 = vpop.eup %3863 }
 0x327   :  { %331 = vadd.xlane.f32.xlu0 %v330_v15  ;;  %v324_v17 = vsel %vm296_vm6, %v4260_v16, 0.0  ;;  %v4264_v22 = vpop.eup %3865 }
 0x328   :  { %v466_v26 = vsel %vm296_vm6, %v4264_v22, 0.0  ;;  %v4269_v40 = vpop.eup %3867 }
 0x329   :  { %v327_v41 = vsel %vm296_vm6, %v4269_v40, 0.0  ;;  %v4273_v34 = vpop.eup %3869 }
 0x32a   :  { %v321_v43 = vsel %vm296_vm6, %v4273_v34, 0.0  ;;  %v3872_v44 = vpop.eup %3871 }
 0x32b   :  { %325 = vadd.xlane.f32.xlu0 %v324_v17  ;;  %v469_v45 = vsel %vm296_vm6, %v3872_v44, 0.0  ;;  %v3874_v46 = vpop.eup %3873 }
 0x32c   :  { %v463_v47 = vsel %vm296_vm6, %v3874_v46, 0.0  ;;  %v3876_v48 = vpop.eup %3875 }
 0x32d   :  { %v472_v49 = vsel %vm296_vm6, %v3876_v48, 0.0 }
 0x32f   :  { %467 = vadd.xlane.f32.xlu0 %v466_v26 }
 0x341   :  { %328 = vadd.xlane.f32.xlu1 %v327_v41 }
 0x345   :  { %540 = vrot.lane.b32.xlu0 %v490_v42, %s4088_s22  ;;  %322 = vadd.xlane.f32.xlu1 %v321_v43 }
 0x349   :  { %470 = vadd.xlane.f32.xlu1 %v469_v45 }
 0x34d   :  { %464 = vadd.xlane.f32.xlu1 %v463_v47 }
 0x351   :  { %473 = vadd.xlane.f32.xlu1 %v472_v49 }
 0x362   :  { %588 = vrot.lane.b32.xlu1 %v347_v51, %s4088_s22 }
 0x366   :  { %636 = vrot.lane.b32.xlu1 %v348_v52, %s4088_s22 }
 0x38f   :  { %v493_v53 = vpop.permute.xlu1 %492 }
 0x390   :  { %3509 = vmatpush3.bf16.msra.mxu1 %v493_v53 }
 0x391   :  { %3520 = vmatprep.subr.bf16.mxu1 %v4094_v8 }
 0x3b4   :  { %v332_v54 = vpop.xlane.xlu0 %331 }
 0x3b8   :  { %v326_v55 = vpop.xlane.xlu0 %325 }
 0x3bc   :  { %v468_v56 = vpop.xlane.xlu0 %467 }
 0x3bd   :  { %3877 = vrcp.f32 %v468_v56 }
 0x3c0   :  { %v541_v57 = vpop.permute.xlu0 %540 }
 0x3c1   :  { %3515 = vmatpush3.bf16.msra.mxu0 %v541_v57 }
 0x3c2   :  { %3526 = vmatprep.subr.bf16.mxu0 %v4094_v8 }
 0x3c7   :  { %v3878_v63 = vpop.eup %3877 }
 0x3c8   :  { %v480_v1 = vmul.f32 %v3878_v63, %v4264_v22 }
 0x3ce   :  { %v329_v58 = vpop.xlane.xlu1 %328 }
 0x3d2   :  { %v323_v59 = vpop.xlane.xlu1 %322 }
 0x3d6   :  { %v471_v60 = vpop.xlane.xlu1 %470 }
 0x3da   :  { %v465_v61 = vpop.xlane.xlu1 %464 }
 0x3db   :  { %3879 = vrcp.f32 %v465_v61 }
 0x3dc   :  { %3881 = vrcp.f32 %v471_v60 }
 0x3de   :  { %v474_v62 = vpop.xlane.xlu1 %473 }
 0x3df   :  { %3883 = vrcp.f32 %v474_v62 }
 0x3e0   :  { %3885 = vrcp.f32 %v323_v59 }
 0x3e1   :  { %3887 = vrcp.f32 %v326_v55 }
 0x3e2   :  { %3889 = vrcp.f32 %v329_v58  ;;  %v589_v9 = vpop.permute.xlu1 %588 }
 0x3e3   :  { %3891 = vrcp.f32 %v332_v54 }
 0x3e5   :  { %v3880_v0 = vpop.eup %3879 }
 0x3e6   :  { %v479_v5 = vmul.f32 %v3880_v0, %v3874_v46  ;;  %v3882_v7 = vpop.eup %3881  ;;  %v637_v22 = vpop.permute.xlu1 %636 }
 0x3e7   :  { %v481_v13 = vmul.f32 %v3882_v7, %v3872_v44 }
 0x3e8   :  { %v483_v10 = vpack.c.bf16 %v480_v1, %v479_v5 }
 0x3e9   :  { %v3884_v12 = vpop.eup %3883 }
 0x3ea   :  { %v482_v15 = vmul.f32 %v3884_v12, %v3876_v48  ;;  %3511 = vmatmul.mubr.msk.bf16.vlgmr.msra.gmra.mrb[8].mxu1 %vm296_vm6, %v483_v10  ;;  %v3886_v23 = vpop.eup %3885 }
 0x3eb   :  { %3521 = vmatpush3.bf16.msra.mxu1 %v589_v9  ;;  %3522 = vmatprep.mubr.msk.bf16.mxu1 %vm4095_vm1, %v4094_v8  ;;  %v3888_v26 = vpop.eup %3887  ;;  %v337_v28 = vmul.f32 %v3886_v23, %v4273_v34 }
 0x3ec   :  { %v484_v17 = vpack.c.bf16 %v482_v15, %v481_v13  ;;  %3532 = vmatprep.subr.bf16.mxu1 %v4094_v8  ;;  %v3890_v29 = vpop.eup %3889  ;;  %v338_v30 = vmul.f32 %v3888_v26, %v4260_v16  ;;  %v684_v16 = vmul.bf16 %v4182_v18, %v4313_v39 }
 0x3ed   :  { %v3892_v32 = vpop.eup %3891  ;;  %v339_v33 = vmul.f32 %v3890_v29, %v4269_v40 }
 0x3ee   :  { %3517 = vmatmul.mubr.msk.bf16.vlgmr.msra.gmra.mrb[12].mxu0 %vm296_vm6, %v484_v17  ;;  %v341_v35 = vpack.c.bf16 %v338_v30, %v337_v28  ;;  %v340_v37 = vmul.f32 %v3892_v32, %v4256_v14  ;;  %v683_v14 = vmul.bf16 %v4184_v19, %v4313_v39 }
 0x3ef   :  { %3527 = vmatpush3.bf16.msra.mxu0 %v637_v22  ;;  %3528 = vmatprep.mubr.msk.bf16.mxu0 %vm4095_vm1, %v4094_v8 }
 0x3f0   :  { %3538 = vmatprep.subr.bf16.mxu0 %v4094_v8  ;;  %v342_v38 = vpack.c.bf16 %v340_v37, %v339_v33 }
 0x3f6   :  { %3523 = vmatmul.mubr.msk.bf16.vlgmr.msra.gmra.mrb[8].mxu1 %vm296_vm6, %v341_v35 }
 0x3f7   :  { %3533 = vmatpush3.bf16.xpose.msra.mxu1 %v4196_v24  ;;  %3534 = vmatprep.mubr.msk.bf16.mxu1 %vm4095_vm1, %v4094_v8 }
 0x3f8   :  { %3544 = vmatprep.subr.bf16.mxu1 %v4094_v8 }
 0x3fa   :  { %3529 = vmatmul.mubr.msk.bf16.vlgmr.msra.gmra.mrb[12].mxu0 %vm296_vm6, %v342_v38 }
 0x3fb   :  { %3539 = vmatpush3.bf16.xpose.msra.mxu0 %v4205_v27  ;;  %3540 = vmatprep.mubr.msk.bf16.mxu0 %vm4095_vm1, %v4094_v8 }
 0x3fc   :  { %3550 = vmatprep.subr.bf16.mxu0 %v4094_v8 }
 0x3fe   :  { %3535 = vmatmul.mubr.msk.bf16.vlgmr.msra.gmra.mrb[12].mxu1 %vm136_vm0, %v683_v14 }
 0x3ff   :  { %3546 = vmatprep.mubr.msk.bf16.mxu1 %vm4095_vm1, %v4094_v8 }
 0x402   :  { %3541 = vmatmul.mubr.msk.bf16.vlgmr.msra.gmra.mrb[16].mxu0 %vm136_vm0, %v684_v16 }
 0x403   :  { %3552 = vmatprep.mubr.msk.bf16.mxu0 %vm4095_vm1, %v4094_v8 }
 0x4d1   :  { %v722_v40 = vpop.f32.mrb[12].mxu1 }
 0x4d2   :  { %v3536_v41 = vpop.f32.mrb[13].mxu1  ;;  %v773_v34 = vsel %vm296_vm6, %v722_v40, -inf }
 0x4d3   :  { %774 = vmax.xlane.f32.xlu0 %v773_v34  ;;  %v725_v42 = vpop.f32.mrb[14].mxu1  ;;  %v3260_v34 = vsel %vm79_vm12, 1.0, %v4094_v8 }
 0x4d4   :  { %v3537_v43 = vpop.f32.mrb[15].mxu1  ;;  %v776_v44 = vsel %vm296_vm6, %v725_v42, -inf  ;;  %v4358_v21 = vpack.c.bf16 %v3260_v34, %v3260_v34 }
 0x4d5   :  { %v766_v45 = vpop.f32.mrb[16].mxu0  ;;  %777 = vmax.xlane.f32.xlu1 %v776_v44 }
 0x4d6   :  { %v3542_v46 = vpop.f32.mrb[17].mxu0  ;;  %v779_v47 = vsel %vm296_vm6, %v766_v45, -inf  ;;  %v926_v43 = vmul.bf16 %v4182_v18, %v4358_v21 }
 0x4d7   :  { %v769_v48 = vpop.f32.mrb[18].mxu0  ;;  %780 = vmax.xlane.f32.xlu0 %v779_v47 }
 0x4d8   :  { %v3543_v49 = vpop.f32.mrb[19].mxu0  ;;  %v782_v51 = vsel %vm296_vm6, %v769_v48, -inf }
 0x4db   :  { %783 = vmax.xlane.f32.xlu0 %v782_v51 }
 0x4e6   :  { %820 = vrot.lane.b32.xlu1 %v4313_v39, %s4088_s22 }
 0x560   :  { %v775_v52 = vpop.xlane.xlu0 %774 }
 0x561   :  { %v785_v54 = vsub.f32 %v722_v40, %v775_v52 }
 0x562   :  { %v778_v53 = vpop.xlane.xlu1 %777 }
 0x563   :  { %v789_v58 = vmul.f32 1.442695, %v785_v54  ;;  %v786_v63 = vsub.f32 %v725_v42, %v778_v53 }
 0x564   :  { %v781_v55 = vpop.xlane.xlu0 %780 }
 0x565   :  { %v787_v56 = vsub.f32 %v766_v45, %v781_v55  ;;  %v791_v1 = vmul.f32 1.442695, %v786_v63 }
 0x566   :  { %v4337_v57 = vpop.permute.xlu1 %820 }
 0x567   :  { %v793_v59 = vmul.f32 1.442695, %v787_v56  ;;  %v823_v60 = vmul.bf16 %v4337_v57, %v4184_v19  ;;  %v824_v23 = vmul.bf16 %v4337_v57, %v4182_v18 }
 0x568   :  { %v784_v61 = vpop.xlane.xlu0 %783 }
 0x569   :  { %3893 = vpow2.f32 %v793_v59  ;;  %v788_v62 = vsub.f32 %v769_v48, %v784_v61  ;;  %826 = vrot.lane.b32.xlu1 %v823_v60, %s4088_s22 }
 0x56a   :  { %3895 = vpow2.f32 %v789_v58 }
 0x56b   :  { %v795_v0 = vmul.f32 1.442695, %v788_v62 }
 0x56d   :  { %3897 = vpow2.f32 %v795_v0 }
 0x56e   :  { %3899 = vpow2.f32 %v791_v1 }
 0x573   :  { %v3894_v5 = vpop.eup %3893 }
 0x574   :  { %v803_v7 = vsel %vm296_vm6, %v3894_v5, 0.0  ;;  %v3896_v9 = vpop.eup %3895 }
 0x575   :  { %804 = vadd.xlane.f32.xlu0 %v803_v7  ;;  %v797_v10 = vsel %vm296_vm6, %v3896_v9, 0.0 }
 0x577   :  { %v3898_v12 = vpop.eup %3897 }
 0x578   :  { %v806_v13 = vsel %vm296_vm6, %v3898_v12, 0.0  ;;  %v3900_v15 = vpop.eup %3899 }
 0x579   :  { %798 = vadd.xlane.f32.xlu0 %v797_v10  ;;  %v800_v17 = vsel %vm296_vm6, %v3900_v15, 0.0 }
 0x57d   :  { %807 = vadd.xlane.f32.xlu0 %v806_v13 }
 0x581   :  { %801 = vadd.xlane.f32.xlu0 %v800_v17 }
 0x597   :  { %874 = vrot.lane.b32.xlu0 %v824_v23, %s4088_s22 }
 0x5db   :  { %v827_v22 = vpop.permute.xlu1 %826 }
 0x5dc   :  { %3545 = vmatpush3.bf16.msra.mxu1 %v827_v22 }
 0x5dd   :  { %3556 = vmatprep.subr.bf16.mxu1 %v4094_v8 }
 0x602   :  { %v805_v26 = vpop.xlane.xlu0 %804 }
 0x603   :  { %3901 = vrcp.f32 %v805_v26 }
 0x606   :  { %v799_v28 = vpop.xlane.xlu0 %798 }
 0x60a   :  { %v808_v29 = vpop.xlane.xlu0 %807 }
 0x60b   :  { %3903 = vrcp.f32 %v808_v29 }
 0x60c   :  { %3905 = vrcp.f32 %v799_v28 }
 0x60d   :  { %v3902_v33 = vpop.eup %3901 }
 0x60e   :  { %v802_v30 = vpop.xlane.xlu0 %801  ;;  %v815_v36 = vmul.f32 %v3902_v33, %v3894_v5 }
 0x60f   :  { %3907 = vrcp.f32 %v802_v30 }
 0x612   :  { %v875_v32 = vpop.permute.xlu0 %874 }
 0x613   :  { %3551 = vmatpush3.bf16.msra.mxu0 %v875_v32 }
 0x614   :  { %3562 = vmatprep.subr.bf16.mxu0 %v4094_v8 }
 0x615   :  { %v3904_v35 = vpop.eup %3903 }
 0x616   :  { %v816_v37 = vmul.f32 %v3904_v35, %v3898_v12  ;;  %v3906_v38 = vpop.eup %3905 }
 0x617   :  { %v813_v40 = vmul.f32 %v3906_v38, %v3896_v9 }
 0x618   :  { %v818_v14 = vpack.c.bf16 %v816_v37, %v815_v36 }
 0x619   :  { %v3908_v16 = vpop.eup %3907 }
 0x61a   :  { %v814_v41 = vmul.f32 %v3908_v16, %v3900_v15  ;;  %3553 = vmatmul.mubr.msk.bf16.vlgmr.msra.gmra.mrb[12].mxu0 %vm296_vm6, %v818_v14 }
 0x61b   :  { %3564 = vmatprep.mubr.msk.bf16.mxu0 %vm4095_vm1, %v4094_v8 }
 0x61c   :  { %3563 = vmatpush3.bf16.xpose.msra.mxu0 %v4205_v27  ;;  %v817_v42 = vpack.c.bf16 %v814_v41, %v813_v40  ;;  %v925_v27 = vmul.bf16 %v4184_v19, %v4358_v21 }
 0x61d   :  { %3574 = vmatprep.subr.bf16.mxu0 %v4094_v8 }
 0x61e   :  { %3547 = vmatmul.mubr.msk.bf16.vlgmr.msra.gmra.mrb[8].mxu1 %vm296_vm6, %v817_v42 }
 0x61f   :  { %3557 = vmatpush3.bf16.xpose.msra.mxu1 %v4196_v24  ;;  %3558 = vmatprep.mubr.msk.bf16.mxu1 %vm4095_vm1, %v4094_v8 }
 0x620   :  { %3568 = vmatprep.subr.bf16.mxu1 %v4094_v8 }
 0x623   :  { %3565 = vmatmul.mubr.msk.bf16.vlgmr.msra.gmra.mrb[20].mxu0 %vm136_vm0, %v926_v43 }
 0x624   :  { %3576 = vmatprep.mubr.msk.bf16.mxu0 %vm4095_vm1, %v4094_v8 }
 0x626   :  { %3559 = vmatmul.mubr.msk.bf16.vlgmr.msra.gmra.mrb[16].mxu1 %vm136_vm0, %v925_v27 }
 0x627   :  { %3570 = vmatprep.mubr.msk.bf16.mxu1 %vm4095_vm1, %v4094_v8 }
 0x6f6   :  { %v1008_v24 = vpop.f32.mrb[20].mxu0 }
 0x6f7   :  { %v3566_v44 = vpop.f32.mrb[21].mxu0  ;;  %v1021_v54 = vsel %vm296_vm6, %v1008_v24, -inf }
 0x6f8   :  { %v1011_v45 = vpop.f32.mrb[22].mxu0  ;;  %v3838_v44 = vld [vmem:[#allocation5 + $0x28] sm:$0xff]  }
 0x6f9   :  { %v964_v46 = vpop.f32.mrb[16].mxu1  ;;  %v3567_v47 = vpop.f32.mrb[23].mxu0  ;;  %v1024_v55 = vsel %vm296_vm6, %v1011_v45, -inf }
 0x6fa   :  { %v3560_v48 = vpop.f32.mrb[17].mxu1  ;;  %v1015_v49 = vsel %vm296_vm6, %v964_v46, -inf }
 0x6fb   :  { %1016 = vmax.xlane.f32.xlu1 %v1015_v49  ;;  %v967_v51 = vpop.f32.mrb[18].mxu1 }
 0x6fc   :  { %v3561_v52 = vpop.f32.mrb[19].mxu1  ;;  %v1018_v53 = vsel %vm296_vm6, %v967_v51, -inf }
 0x6fd   :  { %1019 = vmax.xlane.f32.xlu0 %v1018_v53 }
 0x6ff   :  { %1022 = vmax.xlane.f32.xlu1 %v1021_v54 }
 0x703   :  { %1025 = vmax.xlane.f32.xlu1 %v1024_v55 }
 0x714   :  { %1062 = vrot.lane.b32.xlu1 %v4358_v21, %s4088_s22 }
 0x788   :  { %v1017_v56 = vpop.xlane.xlu1 %1016 }
 0x789   :  { %v1027_v58 = vsub.f32 %v964_v46, %v1017_v56 }
 0x78a   :  { %v1020_v23 = vpop.xlane.xlu0 %1019 }
 0x78b   :  { %v1031_v61 = vmul.f32 1.442695, %v1027_v58  ;;  %v1028_v22 = vsub.f32 %v967_v51, %v1020_v23  ;;  %v3286_v58 = vld [vmem:[#allocation7 + $0x1] ss:$0 sm:$0xff] }
 0x78c   :  { %v1023_v59 = vpop.xlane.xlu1 %1022 }
 0x78d   :  { %v1029_v60 = vsub.f32 %v1008_v24, %v1023_v59  ;;  %v1033_v26 = vmul.f32 1.442695, %v1028_v22  ;;  %v3837_v24 = vld [vmem:[#allocation5 + $0x20] sm:$0xff]  }
 0x78f   :  { %v1035_v62 = vmul.f32 1.442695, %v1029_v60 }
 0x790   :  { %v1026_v63 = vpop.xlane.xlu1 %1025 }
 0x791   :  { %3909 = vpow2.f32 %v1035_v62  ;;  %v1030_v0 = vsub.f32 %v1011_v45, %v1026_v63 }
 0x792   :  { %3911 = vpow2.f32 %v1031_v61 }
 0x793   :  { %v1037_v1 = vmul.f32 1.442695, %v1030_v0 }
 0x794   :  { %v4385_v15 = vpop.permute.xlu1 %1062 }
 0x795   :  { %3913 = vpow2.f32 %v1037_v1  ;;  %v1065_v17 = vmul.bf16 %v4385_v15, %v4184_v19  ;;  %v1066_v30 = vmul.bf16 %v4385_v15, %v4182_v18 }
 0x796   :  { %3915 = vpow2.f32 %v1033_v26 }
 0x79b   :  { %v3910_v5 = vpop.eup %3909 }
 0x79c   :  { %v1045_v7 = vsel %vm296_vm6, %v3910_v5, 0.0  ;;  %v3912_v9 = vpop.eup %3911 }
 0x79d   :  { %1046 = vadd.xlane.f32.xlu0 %v1045_v7  ;;  %v1039_v13 = vsel %vm296_vm6, %v3912_v9, 0.0 }
 0x79f   :  { %v3914_v10 = vpop.eup %3913 }
 0x7a0   :  { %v1048_v12 = vsel %vm296_vm6, %v3914_v10, 0.0  ;;  %v3916_v28 = vpop.eup %3915 }
 0x7a1   :  { %1049 = vadd.xlane.f32.xlu1 %v1048_v12  ;;  %1040 = vadd.xlane.f32.xlu0 %v1039_v13  ;;  %v1042_v29 = vsel %vm296_vm6, %v3916_v28, 0.0 }
 0x7b7   :  { %1068 = vrot.lane.b32.xlu0 %v1065_v17, %s4088_s22 }
 0x7d6   :  { %1043 = vadd.xlane.f32.xlu0 %v1042_v29 }
 0x7ec   :  { %1116 = vrot.lane.b32.xlu0 %v1066_v30, %s4088_s22 }
 0x82a   :  { %v1047_v32 = vpop.xlane.xlu0 %1046 }
 0x82e   :  { %v1041_v33 = vpop.xlane.xlu0 %1040  ;;  %v1050_v19 = vpop.xlane.xlu1 %1049 }
 0x82f   :  { %3917 = vrcp.f32 %v1050_v19 }
 0x830   :  { %3919 = vrcp.f32 %v1047_v32 }
 0x831   :  { %3921 = vrcp.f32 %v1041_v33 }
 0x832   :  { %v1069_v35 = vpop.permute.xlu0 %1068 }
 0x833   :  { %3569 = vmatpush3.bf16.msra.mxu1 %v1069_v35 }
 0x834   :  { %3580 = vmatprep.subr.bf16.mxu1 %v3837_v24 }
 0x839   :  { %v3918_v36 = vpop.eup %3917 }
 0x83a   :  { %v3920_v38 = vpop.eup %3919  ;;  %v1058_v14 = vmul.f32 %v3918_v36, %v3914_v10 }
 0x83b   :  { %v1057_v16 = vmul.f32 %v3920_v38, %v3910_v5  ;;  %v3922_v18 = vpop.eup %3921 }
 0x83c   :  { %v1055_v42 = vmul.f32 %v3922_v18, %v3912_v9  ;;  %v3839_v18 = vld [vmem:[#allocation5 + $0x40] sm:$0xff]  }
 0x83d   :  { %v1060_v41 = vpack.c.bf16 %v1058_v14, %v1057_v16 }
 0x863   :  { %v1044_v37 = vpop.xlane.xlu0 %1043 }
 0x864   :  { %3923 = vrcp.f32 %v1044_v37 }
 0x867   :  { %v1117_v40 = vpop.permute.xlu0 %1116 }
 0x868   :  { %3575 = vmatpush3.bf16.msra.mxu0 %v1117_v40 }
 0x869   :  { %3588 = vmatprep.subr.bf16.mxu0 %v3839_v18 }
 0x86b   :  { %3577 = vmatmul.mubr.msk.bf16.vlgmr.msra.gmra.mrb[12].mxu0 %vm296_vm6, %v1060_v41 }
 0x86c   :  { %3589 = vmatpush3.bf16.msra.mxu0 %v3839_v18 }
 0x86e   :  { %v3924_v34 = vpop.eup %3923 }
 0x86f   :  { %v1056_v43 = vmul.f32 %v3924_v34, %v3916_v28  ;;  %v3840_v34 = vld [vmem:[#allocation5 + $0x48] sm:$0xff]  }
 0x870   :  { %3590 = vmatprep.subr.bf16.mxu0 %v3840_v34 }
 0x871   :  { %v1059_v27 = vpack.c.bf16 %v1056_v43, %v1055_v42  ;;  %3591 = vmatpush3.bf16.msra.mxu0 %v3840_v34  ;;  %v3841_v42 = vld [vmem:[#allocation5 + $0x60] sm:$0xff]   ;;  %v3842_v43 = vld [vmem:[#allocation5 + $0x68] sm:$0xff]  }
 0x873   :  { %3571 = vmatmul.mubr.msk.bf16.vlgmr.msra.gmra.mrb[8].mxu1 %vm296_vm6, %v1059_v27 }
 0x874   :  { %3581 = vmatpush3.bf16.msra.mxu1 %v3837_v24 }
 0x875   :  { %3582 = vmatprep.subr.bf16.mxu1 %v3838_v44 }
 0x878   :  { %3583 = vmatpush3.bf16.msra.mxu1 %v3838_v44 }
 0x879   :  { %3596 = vmatprep.subr.bf16.mxu1 %v3841_v42 }
 0x93e   :  { %v1156_v45 = vpop.f32.mrb[12].mxu0 }
 0x93f   :  { %v3578_v46 = vpop.f32.mrb[13].mxu0 }
 0x940   :  { %v1159_v47 = vpop.f32.mrb[14].mxu0 }
 0x941   :  { %v1168_v48 = vpack.c.bf16 %v1159_v47, %v1156_v45  ;;  %v3579_v49 = vpop.f32.mrb[15].mxu0 }
 0x946   :  { %v1108_v51 = vpop.f32.mrb[8].mxu1 }
 0x947   :  { %v3572_v52 = vpop.f32.mrb[9].mxu1 }
 0x948   :  { %v1111_v53 = vpop.f32.mrb[10].mxu1 }
 0x949   :  { %v1167_v54 = vpack.c.bf16 %v1111_v53, %v1108_v51  ;;  %v3573_v55 = vpop.f32.mrb[11].mxu1 }
 0x94b   :  { %3584 = vmatprep.mubr.msk.bf16.mxu1 %vm136_vm0, %v1167_v54 }
 0x94c   :  { %3585 = vmatmul.mubr.msk.bf16.vlgmr.msra.gmra.mrb[20].mxu1 %vm136_vm0, %v1168_v48 }
 0x94d   :  { %3597 = vmatpush3.bf16.msra.mxu1 %v3841_v42 }
 0x94e   :  { %3598 = vmatprep.subr.bf16.mxu1 %v3842_v43 }
 0x951   :  { %3599 = vmatpush3.bf16.msra.mxu1 %v3842_v43 }
 0xa1f   :  { %v3586_v56 = vpop.f32.mrb[20].mxu1 }
 0xa20   :  { %v1238_v59 = vadd.f32 %v3586_v56, %v4166_v4  ;;  %v1221_v60 = vpop.f32.mrb[21].mxu1 }
 0xa21   :  { %v1236_v61 = vadd.f32 %v1221_v60, %v4162_v2  ;;  %v3587_v62 = vpop.f32.mrb[22].mxu1 }
 0xa22   :  { %v1224_v63 = vpop.f32.mrb[23].mxu1  ;;  %v1246_v0 = vadd.f32 %v3286_v58, %v1238_v59  ;;  %v1239_v7 = vadd.f32 %v3587_v62, %v4170_v6  ;;  %v3288_v62 = vld [vmem:[#allocation7 + $0x5] ss:$0 sm:$0xff] }
 0xa23   :  { %v1237_v1 = vadd.f32 %v1224_v63, %v4164_v3  ;;  %v1244_v5 = vadd.f32 %v3286_v58, %v1236_v61 }
 0xa24   :  { %v1254_v9 = vsel %vm136_vm0, %v1246_v0, 0.0  ;;  %v1247_v13 = vadd.f32 %v3286_v58, %v1239_v7 }
 0xa25   :  { %1255 = vadd.xlane.f32.xlu1 %v1254_v9  ;;  %v1248_v10 = vsel %vm136_vm0, %v1244_v5, 0.0  ;;  %v1245_v12 = vadd.f32 %v3286_v58, %v1237_v1  ;;  %v3287_v58 = vld [vmem:[#allocation7 + $0x4] ss:$0 sm:$0xff] }
 0xa26   :  { %1249 = vadd.xlane.f32.xlu0 %v1248_v10  ;;  %v1257_v2 = vsel %vm136_vm0, %v1247_v13, 0.0 }
 0xa27   :  { %v1251_v4 = vsel %vm136_vm0, %v1245_v12, 0.0 }
 0xa29   :  { %1252 = vadd.xlane.f32.xlu1 %v1251_v4 }
 0xa2d   :  { %1258 = vadd.xlane.f32.xlu1 %v1257_v2 }
 0xab2   :  { %v1256_v17 = vpop.xlane.xlu1 %1255 }
 0xab3   :  { %v1250_v23 = vpop.xlane.xlu0 %1249  ;;  %v1263_v22 = vmul.f32 0.03125, %v1256_v17 }
 0xab4   :  { %v1261_v3 = vmul.f32 0.03125, %v1250_v23 }
 0xab5   :  { %v1267_v32 = vsub.f32 %v1246_v0, %v1263_v22  ;;  %v3844_v22 = vld [vmem:[#allocation5 + $0x78] sm:$0xff]  }
 0xab6   :  { %v1265_v26 = vsub.f32 %v1244_v5, %v1261_v3  ;;  %v1253_v6 = vpop.xlane.xlu1 %1252  ;;  %v3843_v3 = vld [vmem:[#allocation5 + $0x70] sm:$0xff]  }
 0xab7   :  { %v1262_v28 = vmul.f32 0.03125, %v1253_v6  ;;  %v1271_v14 = vmul.f32 %v1267_v32, %v1267_v32  ;;  %3600 = vmatprep.subr.bf16.mxu1 %v3843_v3 }
 0xab8   :  { %v1269_v29 = vmul.f32 %v1265_v26, %v1265_v26  ;;  %3601 = vmatpush3.bf16.msra.mxu1 %v3843_v3  ;;  %v3845_v3 = vld [vmem:[#allocation5 + $0x100] sm:$0xff]  }
 0xab9   :  { %v1266_v30 = vsub.f32 %v1245_v12, %v1262_v28  ;;  %v1279_v41 = vsel %vm136_vm0, %v1271_v14, 0.0  ;;  %3602 = vmatprep.subr.bf16.mxu1 %v3844_v22  ;;  %3608 = vmatprep.subr.bf16.mxu0 %v3845_v3 }
 0xaba   :  { %v1259_v33 = vpop.xlane.xlu1 %1258  ;;  %v1273_v35 = vsel %vm136_vm0, %v1269_v29, 0.0 }
 0xabb   :  { %v1264_v19 = vmul.f32 0.03125, %v1259_v33  ;;  %1274 = vadd.xlane.f32.xlu1 %v1273_v35  ;;  %v1270_v36 = vmul.f32 %v1266_v30, %v1266_v30 }
 0xabc   :  { %3603 = vmatpush3.bf16.msra.mxu1 %v3844_v22  ;;  %v3846_v22 = vld [vmem:[#allocation5 + $0x140] sm:$0xff]  }
 0xabd   :  { %v1268_v37 = vsub.f32 %v1247_v13, %v1264_v19  ;;  %v1276_v38 = vsel %vm136_vm0, %v1270_v36, 0.0  ;;  %3624 = vmatprep.subr.bf16.mxu1 %v3846_v22 }
 0xabf   :  { %1277 = vadd.xlane.f32.xlu1 %v1276_v38  ;;  %v1272_v16 = vmul.f32 %v1268_v37, %v1268_v37 }
 0xac1   :  { %v1282_v40 = vsel %vm136_vm0, %v1272_v16, 0.0 }
 0xac2   :  { %1283 = vadd.xlane.f32.xlu0 %v1282_v40 }
 0xac3   :  { %1280 = vadd.xlane.f32.xlu1 %v1279_v41  ;;  %v3294_v41 = vld [vmem:[#allocation7 + $0x3] ss:$0 sm:$0xff] }
 0xb48   :  { %v1275_v27 = vpop.xlane.xlu1 %1274 }
 0xb49   :  { %v1285_v24 = vmul.f32 0.03125, %v1275_v27 }
 0xb4b   :  { %v1289_v44 = vadd.f32 1e-05, %v1285_v24 }
 0xb4c   :  { %v1278_v45 = vpop.xlane.xlu1 %1277 }
 0xb4d   :  { %3925 = vrsqrt.f32 %v1289_v44  ;;  %v1286_v46 = vmul.f32 0.03125, %v1278_v45 }
 0xb4f   :  { %v1290_v47 = vadd.f32 1e-05, %v1286_v46  ;;  %v1284_v48 = vpop.xlane.xlu0 %1283 }
 0xb50   :  { %v1288_v49 = vmul.f32 0.03125, %v1284_v48  ;;  %v1281_v51 = vpop.xlane.xlu1 %1280 }
 0xb51   :  { %3927 = vrsqrt.f32 %v1290_v47  ;;  %v1287_v52 = vmul.f32 0.03125, %v1281_v51 }
 0xb52   :  { %v1292_v53 = vadd.f32 1e-05, %v1288_v49 }
 0xb53   :  { %v1291_v54 = vadd.f32 1e-05, %v1287_v52 }
 0xb54   :  { %3929 = vrsqrt.f32 %v1292_v53 }
 0xb55   :  { %3931 = vrsqrt.f32 %v1291_v54 }
 0xb57   :  { %v3926_v55 = vpop.eup %3925 }
 0xb58   :  { %v1297_v56 = vmul.f32 %v3926_v55, %v1265_v26  ;;  %v3289_v26 = vld [vmem:[#allocation7 + $0x2] ss:$0 sm:$0xff] }
 0xb5a   :  { %v1305_v61 = vmul.f32 %v3287_v58, %v1297_v56 }
 0xb5b   :  { %v3928_v59 = vpop.eup %3927 }
 0xb5c   :  { %v1298_v60 = vmul.f32 %v3928_v59, %v1266_v30  ;;  %v1313_v9 = vadd.f32 %v3288_v62, %v1305_v61 }
 0xb5e   :  { %v3930_v63 = vpop.eup %3929  ;;  %v1306_v0 = vmul.f32 %v3287_v58, %v1298_v60 }
 0xb5f   :  { %v3932_v1 = vpop.eup %3931  ;;  %v1300_v5 = vmul.f32 %v3930_v63, %v1268_v37 }
 0xb60   :  { %v1299_v7 = vmul.f32 %v3932_v1, %v1267_v32  ;;  %v1314_v10 = vadd.f32 %v3288_v62, %v1306_v0 }
 0xb61   :  { %v1308_v12 = vmul.f32 %v3287_v58, %v1300_v5 }
 0xb62   :  { %v1307_v4 = vmul.f32 %v3287_v58, %v1299_v7  ;;  %v1317_v13 = vpack.c.bf16 %v1314_v10, %v1313_v9 }
 0xb63   :  { %v1316_v2 = vadd.f32 %v3288_v62, %v1308_v12 }
 0xb64   :  { %3592 = vmatprep.mubr.msk.bf16.mxu0 %vm136_vm0, %v1317_v13  ;;  %v1315_v17 = vadd.f32 %v3288_v62, %v1307_v4 }
 0xb66   :  { %v1318_v23 = vpack.c.bf16 %v1316_v2, %v1315_v17 }
 0xb68   :  { %3593 = vmatmul.mubr.msk.bf16.vlgmr.msra.gmra.mrb[24].mxu0 %vm136_vm0, %v1318_v23 }
 0xb69   :  { %3609 = vmatpush3.bf16.msra.mxu0 %v3845_v3 }
 0xc3b   :  { %v3594_v6 = vpop.f32.mrb[24].mxu0 }
 0xc3c   :  { %v1384_v28 = vadd.f32 %v3594_v6, %v3289_v26  ;;  %v1375_v29 = vpop.f32.mrb[25].mxu0  ;;  %v3848_v6 = vld [vmem:[#allocation5 + $0x148] sm:$0xff]  }
 0xc3d   :  { %v1376_v30 = vadd.f32 %v3289_v26, %v1375_v29  ;;  %v3595_v32 = vpop.f32.mrb[26].mxu0 }
 0xc3e   :  { %v1387_v33 = vadd.f32 %v3595_v32, %v3289_v26  ;;  %v1378_v35 = vpop.f32.mrb[27].mxu0  ;;  %v1392_v36 = vmax.f32 %v1384_v28, 0.0  ;;  %v3849_v28 = vld [vmem:[#allocation5 + $0x120] sm:$0xff]  }
 0xc3f   :  { %v1379_v19 = vadd.f32 %v3289_v26, %v1378_v35  ;;  %v1390_v38 = vmax.f32 %v1376_v30, 0.0  ;;  %v3847_v26 = vld [vmem:[#allocation5 + $0x108] sm:$0xff]  }
 0xc40   :  { %v1393_v37 = vmax.f32 %v1387_v33, 0.0  ;;  %3610 = vmatprep.subr.bf16.mxu0 %v3847_v26 }
 0xc41   :  { %v1391_v14 = vmax.f32 %v1379_v19, 0.0  ;;  %3611 = vmatpush3.bf16.msra.mxu0 %v3847_v26 }
 0xc42   :  { %v1395_v16 = vpack.c.bf16 %v1393_v37, %v1392_v36  ;;  %3616 = vmatprep.subr.bf16.mxu0 %v3849_v28 }
 0xc43   :  { %v1394_v40 = vpack.c.bf16 %v1391_v14, %v1390_v38 }
 0xc45   :  { %3604 = vmatprep.mubr.msk.bf16.mxu1 %vm1424_vm13, %v1394_v40 }
 0xc46   :  { %3605 = vmatmul.mubr.msk.bf16.vlgmr.msra.gmra.mrb[24].mxu1 %vm1424_vm13, %v1395_v16 }
 0xc47   :  { %3625 = vmatpush3.bf16.msra.mxu1 %v3846_v22 }
 0xc48   :  { %3626 = vmatprep.subr.bf16.mxu1 %v3848_v6 }
 0xc4b   :  { %3627 = vmatpush3.bf16.msra.mxu1 %v3848_v6 }
 0xc4c   :  { %3638 = vmatprep.subr.bf16.mxu1 %v4094_v8 }
 0xd19   :  { %v3606_v18 = vpop.f32.mrb[24].mxu1 }
 0xd1a   :  { %v1465_v34 = vpop.f32.mrb[25].mxu1  ;;  %v1474_v42 = vadd.f32 %v3606_v18, %v3294_v41  ;;  %v3301_v18 = vld [vmem:[#allocation7 + $0x6] ss:$0 sm:$0xff] }
 0xd1b   :  { %v1466_v43 = vadd.f32 %v3294_v41, %v1465_v34  ;;  %v3607_v27 = vpop.f32.mrb[26].mxu1 }
 0xd1c   :  { %v1468_v24 = vpop.f32.mrb[27].mxu1  ;;  %v1477_v44 = vadd.f32 %v3607_v27, %v3294_v41  ;;  %v1482_v49 = vadd.f32 %v1474_v42, %v1315_v17 }
 0xd1d   :  { %v1469_v45 = vadd.f32 %v3294_v41, %v1468_v24  ;;  %v1480_v46 = vadd.f32 %v1466_v43, %v1313_v9 }
 0xd1e   :  { %v1483_v52 = vadd.f32 %v1477_v44, %v1316_v2  ;;  %v1490_v53 = vsel %vm136_vm0, %v1482_v49, 0.0  ;;  %v3302_v44 = vld [vmem:[#allocation7 + $0x7] ss:$0 sm:$0xff] }
 0xd1f   :  { %v1484_v47 = vsel %vm136_vm0, %v1480_v46, 0.0  ;;  %v1481_v48 = vadd.f32 %v1469_v45, %v1314_v10 }
 0xd20   :  { %1485 = vadd.xlane.f32.xlu1 %v1484_v47  ;;  %v1493_v54 = vsel %vm136_vm0, %v1483_v52, 0.0 }
 0xd21   :  { %v1487_v51 = vsel %vm136_vm0, %v1481_v48, 0.0 }
 0xd22   :  { %1488 = vadd.xlane.f32.xlu0 %v1487_v51 }
 0xd24   :  { %1491 = vadd.xlane.f32.xlu1 %v1490_v53 }
 0xd26   :  { %1494 = vadd.xlane.f32.xlu0 %v1493_v54 }
 0xdad   :  { %v1486_v55 = vpop.xlane.xlu1 %1485 }
 0xdae   :  { %v1496_v56 = vmul.f32 0.03125, %v1486_v55 }
 0xdaf   :  { %v1489_v58 = vpop.xlane.xlu0 %1488 }
 0xdb0   :  { %v1500_v59 = vsub.f32 %v1480_v46, %v1496_v56  ;;  %v1497_v60 = vmul.f32 0.03125, %v1489_v58 }
 0xdb1   :  { %v1492_v61 = vpop.xlane.xlu1 %1491 }
 0xdb2   :  { %v1501_v62 = vsub.f32 %v1481_v48, %v1497_v60  ;;  %v1498_v63 = vmul.f32 0.03125, %v1492_v61  ;;  %v1504_v0 = vmul.f32 %v1500_v59, %v1500_v59  ;;  %v4435_v60 = vshrl.u32 %v57_v20, 7 }
 0xdb3   :  { %v1495_v1 = vpop.xlane.xlu0 %1494 }
 0xdb4   :  { %v1502_v5 = vsub.f32 %v1482_v49, %v1498_v63  ;;  %v1499_v7 = vmul.f32 0.03125, %v1495_v1  ;;  %v1508_v9 = vsel %vm136_vm0, %v1504_v0, 0.0  ;;  %v1505_v10 = vmul.f32 %v1501_v62, %v1501_v62 }
 0xdb5   :  { %1509 = vadd.xlane.f32.xlu1 %v1508_v9  ;;  %vm1768_vm14 = vcmp.lt.s32.totalorder %v4435_v60, 1  ;;  %vm1775_vm15 = vcmp.lt.s32.totalorder %v4435_v60, 7  ;;  %vm1808_vm5 = vcmp.eq.s32.totalorder %v4435_v60, 0 }
 0xdb6   :  { %v1503_v12 = vsub.f32 %v1483_v52, %v1499_v7  ;;  %v1511_v4 = vsel %vm136_vm0, %v1505_v10, 0.0  ;;  %v1506_v13 = vmul.f32 %v1502_v5, %v1502_v5 }
 0xdb7   :  { %1512 = vadd.xlane.f32.xlu0 %v1511_v4 }
 0xdb8   :  { %v1514_v2 = vsel %vm136_vm0, %v1506_v13, 0.0  ;;  %v1507_v17 = vmul.f32 %v1503_v12, %v1503_v12 }
 0xdb9   :  { %1515 = vadd.xlane.f32.xlu1 %v1514_v2 }
 0xdba   :  { %v1517_v23 = vsel %vm136_vm0, %v1507_v17, 0.0 }
 0xdbb   :  { %1518 = vadd.xlane.f32.xlu0 %v1517_v23 }
 0xe42   :  { %v1510_v29 = vpop.xlane.xlu1 %1509 }
 0xe43   :  { %v1520_v30 = vmul.f32 0.03125, %v1510_v29 }
 0xe44   :  { %v1513_v32 = vpop.xlane.xlu0 %1512 }
 0xe45   :  { %v1524_v33 = vadd.f32 1e-05, %v1520_v30  ;;  %v1521_v35 = vmul.f32 0.03125, %v1513_v32 }
 0xe46   :  { %v1516_v19 = vpop.xlane.xlu1 %1515 }
 0xe47   :  { %3933 = vrsqrt.f32 %v1524_v33  ;;  %v1525_v36 = vadd.f32 1e-05, %v1521_v35  ;;  %v1522_v37 = vmul.f32 0.03125, %v1516_v19 }
 0xe48   :  { %v1519_v38 = vpop.xlane.xlu0 %1518 }
 0xe49   :  { %3935 = vrsqrt.f32 %v1525_v36  ;;  %v1526_v14 = vadd.f32 1e-05, %v1522_v37  ;;  %v1523_v16 = vmul.f32 0.03125, %v1519_v38  ;;  %v3315_v36 = vld [vmem:[#allocation7 + $0x10] ss:$0 sm:$0xff] }
 0xe4b   :  { %3937 = vrsqrt.f32 %v1526_v14  ;;  %v1527_v40 = vadd.f32 1e-05, %v1523_v16 }
 0xe4d   :  { %3939 = vrsqrt.f32 %v1527_v40 }
 0xe51   :  { %v3934_v41 = vpop.eup %3933 }
 0xe52   :  { %v1532_v34 = vmul.f32 %v3934_v41, %v1500_v59  ;;  %v3850_v59 = vld [vmem:[#allocation5 + $0x128] sm:$0xff]   ;;  %v3316_v41 = vld [vmem:[#allocation7 + $0x11] ss:$0 sm:$0xff] }
 0xe53   :  { %v3936_v42 = vpop.eup %3935 }
 0xe54   :  { %v1533_v43 = vmul.f32 %v3936_v42, %v1501_v62  ;;  %v1540_v27 = vmul.f32 %v3301_v18, %v1532_v34 }
 0xe55   :  { %v3938_v24 = vpop.eup %3937 }
 0xe56   :  { %v1534_v45 = vmul.f32 %v3938_v24, %v1502_v5  ;;  %v1541_v46 = vmul.f32 %v3301_v18, %v1533_v43  ;;  %v1548_v51 = vadd.f32 %v3302_v44, %v1540_v27  ;;  %v3317_v27 = vld [vmem:[#allocation7 + $0x12] ss:$0 sm:$0xff] }
 0xe57   :  { %v3940_v47 = vpop.eup %3939 }
 0xe58   :  { %v1542_v48 = vmul.f32 %v3301_v18, %v1534_v45  ;;  %v1535_v49 = vmul.f32 %v3940_v47, %v1503_v12  ;;  %v1549_v52 = vadd.f32 %v3302_v44, %v1541_v46 }
 0xe5a   :  { %v1543_v53 = vmul.f32 %v3301_v18, %v1535_v49  ;;  %v1572_v54 = vpack.c.bf16 %v1549_v52, %v1548_v51  ;;  %v1550_v55 = vadd.f32 %v3302_v44, %v1542_v48 }
 0xe5c   :  { %3612 = vmatprep.mubr.msk.bf16.mxu0 %vm136_vm0, %v1572_v54  ;;  %3628 = vmatprep.mubr.msk.bf16.mxu1 %vm136_vm0, %v1572_v54  ;;  %v1551_v56 = vadd.f32 %v3302_v44, %v1543_v53 }
 0xe5e   :  { %v1573_v58 = vpack.c.bf16 %v1551_v56, %v1550_v55 }
 0xe60   :  { %3613 = vmatmul.mubr.msk.bf16.vlgmr.msra.gmra.mrb[28].mxu0 %vm136_vm0, %v1573_v58  ;;  %3629 = vmatmul.mubr.msk.bf16.vlgmr.msra.gmra.mrb[28].mxu1 %vm136_vm0, %v1573_v58 }
 0xe61   :  { %3617 = vmatpush3.bf16.msra.mxu0 %v3849_v28  ;;  %3620 = vmatprep.mubr.msk.bf16.mxu0 %vm136_vm0, %v1572_v54 }
 0xe62   :  { %3618 = vmatprep.subr.bf16.mxu0 %v3850_v59  ;;  %3640 = vmatprep.mubr.msk.bf16.mxu1 %vm4095_vm1, %v4094_v8 }
 0xe65   :  { %3619 = vmatpush3.bf16.msra.mxu0 %v3850_v59 }
 0xe66   :  { %3632 = vmatprep.subr.bf16.mxu0 %v4094_v8 }
 0xe68   :  { %3621 = vmatmul.mubr.msk.bf16.vlgmr.msra.gmra.mrb[32].mxu0 %vm136_vm0, %v1573_v58 }
 0xe69   :  { %3634 = vmatprep.mubr.msk.bf16.mxu0 %vm4095_vm1, %v4094_v8 }
 0xf33   :  { %v3614_v61 = vpop.f32.mrb[28].mxu0  ;;  %v3630_v62 = vpop.f32.mrb[28].mxu1 }
 0xf34   :  { %v1626_v63 = vpop.f32.mrb[29].mxu0  ;;  %v1748_v0 = vpop.f32.mrb[29].mxu1  ;;  %v1872_v7 = vrot.slane %v3614_v61, 7  ;;  %v1878_v9 = vrot.slane %v3630_v62, 1 }
 0xf35   :  { %v3615_v1 = vpop.f32.mrb[30].mxu0  ;;  %v3631_v5 = vpop.f32.mrb[30].mxu1  ;;  %v1766_v2 = vrot.slane %v1626_v63, 7  ;;  %v1773_v17 = vrot.slane %v1748_v0, 1 }
 0xf36   :  { %v1873_v10 = vrot.slane %v3615_v1, 7  ;;  %v1879_v12 = vrot.slane %v3631_v5, 1  ;;  %v1629_v4 = vpop.f32.mrb[31].mxu0  ;;  %v1751_v13 = vpop.f32.mrb[31].mxu1  ;;  %v1765_v1 = vadd.s32 8, %v4435_v60  ;;  %v3852_v60 = vld [vmem:[#allocation5 + $0x88] sm:$0xff]  }
 0xf37   :  { %v1767_v20 = vrot.slane %v1629_v4, 7  ;;  %v1774_v23 = vrot.slane %v1751_v13, 1 }
 0xf38   :  { %v1875_v3 = vsel %vm1768_vm14, %v1873_v10, %v1872_v7  ;;  %v1880_v22 = vsel %vm1775_vm15, %v1878_v9, %v1879_v12  ;;  %v1874_v26 = vsel %vm1768_vm14, %v1872_v7, %v1873_v10  ;;  %v1881_v6 = vsel %vm1775_vm15, %v1879_v12, %v1878_v9 }
 0xf39   :  { %v1770_v28 = vsel %vm1768_vm14, %v1767_v20, %v1766_v2  ;;  %v1776_v29 = vsel %vm1775_vm15, %v1773_v17, %v1774_v23  ;;  %v1769_v30 = vsel %vm1768_vm14, %v1766_v2, %v1767_v20  ;;  %v1777_v32 = vsel %vm1775_vm15, %v1774_v23, %v1773_v17 }
 0xf3a   :  { %vm1817_vm8 = vcmp.eq.s32.totalorder %v1765_v1, 15 }
 0xf3b   :  { %v3622_v33 = vpop.f32.mrb[32].mxu0 }
 0xf3c   :  { %v1876_v35 = vadd.f32 %v3622_v33, %v1875_v3  ;;  %v1687_v19 = vpop.f32.mrb[33].mxu0 }
 0xf3d   :  { %v1771_v37 = vadd.f32 %v1770_v28, %v1687_v19  ;;  %v3623_v38 = vpop.f32.mrb[34].mxu0 }
 0xf3e   :  { %v1882_v14 = vadd.f32 %v1880_v22, %v1876_v35  ;;  %v1877_v16 = vadd.f32 %v3623_v38, %v1874_v26  ;;  %v1690_v40 = vpop.f32.mrb[35].mxu0 }
 0xf3f   :  { %v1778_v18 = vadd.f32 %v1776_v29, %v1771_v37  ;;  %v1772_v34 = vadd.f32 %v1769_v30, %v1690_v40 }
 0xf40   :  { %v1884_v42 = vadd.f32 %v3315_v36, %v1882_v14  ;;  %v1883_v43 = vadd.f32 %v1881_v6, %v1877_v16 }
 0xf41   :  { %v1784_v24 = vadd.f32 %v3315_v36, %v1778_v18  ;;  %v1779_v44 = vadd.f32 %v1777_v32, %v1772_v34 }
 0xf42   :  { %v1886_v45 = vmul.f32 %v3316_v41, %v1884_v42  ;;  %v1885_v46 = vadd.f32 %v3315_v36, %v1883_v43 }
 0xf43   :  { %v1790_v47 = vmul.f32 %v3316_v41, %v1784_v24  ;;  %v1785_v48 = vadd.f32 %v3315_v36, %v1779_v44 }
 0xf44   :  { %v1888_v49 = vadd.f32 %v3317_v27, %v1886_v45  ;;  %v1887_v51 = vmul.f32 %v3316_v41, %v1885_v46 }
 0xf45   :  { %v1796_v52 = vadd.f32 %v3317_v27, %v1790_v47  ;;  %v1791_v53 = vmul.f32 %v3316_v41, %v1785_v48  ;;  %v1568_v48 = vld [vmem:[#allocation5 + $0x160] sm:$0xf] }
 0xf46   :  { %v1892_v54 = vmul.f32 1.442695, %v1888_v49  ;;  %v1889_v55 = vadd.f32 %v3317_v27, %v1887_v51  ;;  %vm1890_vm2 = vcmp.gt.f32.partialorder %v1888_v49, 0.0 }
 0xf47   :  { %v1800_v56 = vmul.f32 1.442695, %v1796_v52  ;;  %v1797_v58 = vadd.f32 %v3317_v27, %v1791_v53  ;;  %vm1798_vm3 = vcmp.gt.f32.partialorder %v1796_v52, 0.0 }
 0xf48   :  { %3941 = vpow2.f32 %v1892_v54  ;;  %v1894_v59 = vmul.f32 1.442695, %v1889_v55  ;;  %vm1891_vm4 = vcmp.gt.f32.partialorder %v1889_v55, 0.0 }
 0xf49   :  { %3943 = vpow2.f32 %v1800_v56  ;;  %v1802_v61 = vmul.f32 1.442695, %v1797_v58  ;;  %vm1799_vm7 = vcmp.gt.f32.partialorder %v1797_v58, 0.0 }
 0xf4a   :  { %3945 = vpow2.f32 %v1894_v59 }
 0xf4b   :  { %3947 = vpow2.f32 %v1802_v61 }
 0xf52   :  { %v3942_v62 = vpop.eup %3941 }
 0xf53   :  { %v3944_v63 = vpop.eup %3943  ;;  %v3321_v0 = vadd.f32 -1.0, %v3942_v62  ;;  %v3324_v62 = vld [vmem:[#allocation7 + $0x8] ss:$0 sm:$0xff] }
 0xf54   :  { %v3946_v5 = vpop.eup %3945  ;;  %v3318_v7 = vadd.f32 -1.0, %v3944_v63 }
 0xf55   :  { %v3948_v9 = vpop.eup %3947  ;;  %v1898_v10 = vsel %vm1890_vm2, %v1888_v49, %v3321_v0  ;;  %v3322_v12 = vadd.f32 -1.0, %v3946_v5  ;;  %v3851_v49 = vld [vmem:[#allocation5 + $0x80] sm:$0xff]  }
 0xf56   :  { %v1806_v4 = vsel %vm1798_vm3, %v1796_v52, %v3318_v7  ;;  %v3319_v13 = vadd.f32 -1.0, %v3948_v9  ;;  %v1900_v2 = vrot.slane %v1898_v10, 7  ;;  %v1906_v3 = vrot.slane %v1898_v10, 1 }
 0xf57   :  { %v1899_v17 = vsel %vm1891_vm4, %v1889_v55, %v3322_v12  ;;  %v1810_v26 = vrot.slane %v1806_v4, 7  ;;  %v1818_v28 = vrot.slane %v1806_v4, 1 }
 0xf58   :  { %v1901_v20 = vrot.slane %v1899_v17, 7  ;;  %v1807_v23 = vsel %vm1799_vm7, %v1797_v58, %v3319_v13  ;;  %v1907_v22 = vrot.slane %v1899_v17, 1 }
 0xf59   :  { %v1811_v6 = vrot.slane %v1807_v23, 7  ;;  %v1819_v29 = vrot.slane %v1807_v23, 1 }
 0xf5a   :  { %v1902_v30 = vsel %vm1768_vm14, %v1900_v2, %v1901_v20  ;;  %v1903_v32 = vsel %vm1768_vm14, %v1901_v20, %v1900_v2  ;;  %v1908_v33 = vsel %vm1775_vm15, %v1906_v3, %v1907_v22  ;;  %v1909_v35 = vsel %vm1775_vm15, %v1907_v22, %v1906_v3 }
 0xf5b   :  { %v1904_v19 = vsel %vm1808_vm5, -1e+30, %v1903_v32  ;;  %v1911_v36 = vsel %vm1817_vm8, -1e+30, %v1909_v35  ;;  %v1913_v37 = vmax.f32 %v1902_v30, %v1899_v17  ;;  %v1812_v38 = vsel %vm1768_vm14, %v1810_v26, %v1811_v6 }
 0xf5c   :  { %v1912_v14 = vmax.f32 %v1904_v19, %v1898_v10  ;;  %v1813_v16 = vsel %vm1768_vm14, %v1811_v6, %v1810_v26  ;;  %v1820_v40 = vsel %vm1775_vm15, %v1818_v28, %v1819_v29  ;;  %v1821_v41 = vsel %vm1775_vm15, %v1819_v29, %v1818_v28 }
 0xf5d   :  { %v1915_v18 = vmax.f32 %v1913_v37, %v1911_v36  ;;  %v1814_v34 = vsel %vm1808_vm5, -1e+30, %v1813_v16  ;;  %v1823_v42 = vsel %vm1817_vm8, -1e+30, %v1821_v41  ;;  %v1825_v43 = vmax.f32 %v1812_v38, %v1807_v23 }
 0xf5e   :  { %v1914_v27 = vmax.f32 %v1912_v14, %v1908_v33  ;;  %v1824_v24 = vmax.f32 %v1814_v34, %v1806_v4 }
 0xf5f   :  { %v1827_v44 = vmax.f32 %v1825_v43, %v1823_v42 }
 0xf60   :  { %v1916_v45 = vpack.c.bf16 %v1915_v18, %v1914_v27  ;;  %v1826_v46 = vmax.f32 %v1824_v24, %v1820_v40 }
 0xf62   :  { %3639 = vmatpush3.bf16.msra.mxu1 %v1916_v45  ;;  %v1828_v47 = vpack.c.bf16 %v1827_v44, %v1826_v46 }
 0xf63   :  { %3652 = vmatprep.subr.bf16.mxu1 %v4094_v8 }
 0xf64   :  { %3633 = vmatpush3.bf16.msra.mxu0 %v1828_v47 }
 0xf65   :  { %3641 = vmatmul.mubr.msk.bf16.vlgmr.msra.gmra.mrb[32].mxu1 %vm296_vm6, %v1568_v48  ;;  %3644 = vmatprep.subr.bf16.mxu0 %v4094_v8 }
 0xf66   :  { %3654 = vmatprep.mubr.msk.bf16.mxu1 %vm4095_vm1, %v4094_v8 }
 0xf67   :  { %3635 = vmatmul.mubr.msk.bf16.vlgmr.msra.gmra.mrb[36].mxu0 %vm296_vm6, %v1568_v48  ;;  %vm2152_vm6 = vcmask 64512  }
 0xf68   :  { %3645 = vmatpush3.bf16.msra.mxu0 %v3851_v49  ;;  %3648 = vmatprep.mubr.msk.bf16.mxu0 %vm4095_vm1, %v4094_v8 }
 0xf69   :  { %3646 = vmatprep.subr.bf16.mxu0 %v4094_v8 }
 0xf6c   :  { %3647 = vmatpush3.bf16.msra.mxu0 %v3852_v60 }
 0xf6d   :  { %3658 = vmatprep.subr.bf16.mxu0 %v4094_v8 }
0x1038   :  { %v4489_v51 = vpop.f32.mrb[32].mxu1 }
0x1039   :  { %v3642_v52 = vpop.f32.mrb[33].mxu1 }
0x103a   :  { %v4491_v53 = vpop.f32.mrb[36].mxu0  ;;  %v1954_v54 = vpop.f32.mrb[34].mxu1 }
0x103b   :  { %v1989_v55 = vpack.c.bf16 %v4489_v51, %v4491_v53  ;;  %v3636_v56 = vpop.f32.mrb[37].mxu0  ;;  %v3643_v58 = vpop.f32.mrb[35].mxu1 }
0x103c   :  { %v1869_v59 = vpop.f32.mrb[38].mxu0 }
0x103d   :  { %3649 = vmatmul.mubr.msk.bf16.vlgmr.msra.gmra.mrb[40].mxu0 %vm136_vm0, %v1989_v55  ;;  %v3637_v61 = vpop.f32.mrb[39].mxu0 }
0x103e   :  { %3660 = vmatprep.mubr.msk.bf16.mxu0 %vm4095_vm1, %v4094_v8 }
0x1110   :  { %v2043_v63 = vpop.f32.mrb[40].mxu0 }
0x1111   :  { %v2044_v0 = vadd.f32 %v3324_v62, %v2043_v63  ;;  %v3650_v1 = vpop.f32.mrb[41].mxu0 }
0x1112   :  { %v2046_v5 = vpop.f32.mrb[42].mxu0 }
0x1113   :  { %v4498_v7 = vpack.c.bf16 %v2044_v0, %v2044_v0  ;;  %v2047_v9 = vadd.f32 %v3324_v62, %v2046_v5  ;;  %v3651_v10 = vpop.f32.mrb[43].mxu0 }
0x1115   :  { %v4500_v12 = vpack.c.bf16 %v2047_v9, %v2047_v9  ;;  %2055 = vrot.lane.b32.xlu1 %v4498_v7, %s4096_s2  ;;  %v2052_v20 = vmul.bf16 %v4498_v7, %v4201_v25  ;;  %v2179_v3 = vmul.bf16 %v4498_v7, %v4218_v31  ;;  %v2291_v42 = vmul.bf16 %v4498_v7, %v4251_v11 }
0x1116   :  { %v2177_v9 = vmul.bf16 %v4498_v7, %v4283_v50 }
0x1117   :  { %2104 = vrot.lane.b32.xlu0 %v4500_v12, %s4096_s2  ;;  %v2053_v23 = vmul.bf16 %v4500_v12, %v4201_v25  ;;  %v2180_v25 = vmul.bf16 %v4500_v12, %v4218_v31  ;;  %v2178_v10 = vmul.bf16 %v4500_v12, %v4283_v50 }
0x1187   :  { %v2056_v4 = vpop.permute.xlu1 %2055 }
0x1188   :  { %v4507_v13 = vsel %vm136_vm0, %v2056_v4, 0  ;;  %v2292_v4 = vmul.bf16 %v4500_v12, %v4251_v11 }
0x1189   :  { %3653 = vmatpush3.bf16.xpose.msra.mxu1 %v4507_v13  ;;  %v2105_v2 = vpop.permute.xlu0 %2104 }
0x118a   :  { %v4511_v17 = vsel %vm136_vm0, %v2105_v2, 0  ;;  %3664 = vmatprep.subr.bf16.mxu1 %v4094_v8 }
0x118b   :  { %3659 = vmatpush3.bf16.xpose.msra.mxu0 %v4511_v17 }
0x118c   :  { %3670 = vmatprep.subr.bf16.mxu0 %v4094_v8 }
0x1190   :  { %3655 = vmatmul.mubr.msk.bf16.vlgmr.msra.gmra.mrb[36].mxu1 %vm136_vm0, %v2052_v20 }
0x1191   :  { %3665 = vmatpush3.bf16.xpose.msra.mxu1 %v4507_v13  ;;  %3666 = vmatprep.mubr.msk.bf16.mxu1 %vm4095_vm1, %v4094_v8 }
0x1192   :  { %3661 = vmatmul.mubr.msk.bf16.vlgmr.msra.gmra.mrb[44].mxu0 %vm136_vm0, %v2053_v23  ;;  %3676 = vmatprep.subr.bf16.mxu1 %v4094_v8 }
0x1193   :  { %3671 = vmatpush3.bf16.xpose.msra.mxu0 %v4511_v17  ;;  %3672 = vmatprep.mubr.msk.bf16.mxu0 %vm4095_vm1, %v4094_v8 }
0x1194   :  { %3682 = vmatprep.subr.bf16.mxu0 %v4094_v8 }
0x1198   :  { %3667 = vmatmul.mubr.msk.bf16.vlgmr.msra.gmra.mrb[40].mxu1 %vm136_vm0, %v2179_v3 }
0x1199   :  { %3678 = vmatprep.mubr.msk.bf16.mxu1 %vm4095_vm1, %v4094_v8 }
0x119a   :  { %3673 = vmatmul.mubr.msk.bf16.vlgmr.msra.gmra.mrb[48].mxu0 %vm136_vm0, %v2180_v25 }
0x119b   :  { %3684 = vmatprep.mubr.msk.bf16.mxu0 %vm4095_vm1, %v4094_v8 }
0x1263   :  { %v2097_v22 = vpop.f32.mrb[36].mxu1 }
0x1264   :  { %v3656_v26 = vpop.f32.mrb[37].mxu1  ;;  %v2153_v18 = vsel %vm2152_vm6, %v2097_v22, -inf }
0x1265   :  { %v2100_v6 = vpop.f32.mrb[38].mxu1  ;;  %v2146_v28 = vpop.f32.mrb[44].mxu0 }
0x1266   :  { %v3657_v29 = vpop.f32.mrb[39].mxu1  ;;  %v3662_v30 = vpop.f32.mrb[45].mxu0  ;;  %v2156_v34 = vsel %vm2152_vm6, %v2146_v28, -inf }
0x1267   :  { %v2149_v32 = vpop.f32.mrb[46].mxu0 }
0x1268   :  { %v3663_v33 = vpop.f32.mrb[47].mxu0 }
0x126b   :  { %v2218_v35 = vpop.f32.mrb[40].mxu1 }
0x126c   :  { %v3668_v19 = vpop.f32.mrb[41].mxu1  ;;  %v2267_v31 = vsel %vm2152_vm6, %v2218_v35, -inf }
0x126d   :  { %2268 = vmax.xlane.f32.xlu1 %v2267_v31  ;;  %v2221_v36 = vpop.f32.mrb[42].mxu1  ;;  %v2261_v37 = vpop.f32.mrb[48].mxu0 }
0x126e   :  { %v3669_v38 = vpop.f32.mrb[43].mxu1  ;;  %v3674_v14 = vpop.f32.mrb[49].mxu0  ;;  %v2270_v16 = vsel %vm2152_vm6, %v2261_v37, -inf }
0x126f   :  { %2271 = vmax.xlane.f32.xlu0 %v2270_v16  ;;  %v2264_v40 = vpop.f32.mrb[50].mxu0  ;;  %v2490_v16 = vmul.bf16 %v4498_v7, %v4313_v39 }
0x1270   :  { %v3675_v41 = vpop.f32.mrb[51].mxu0  ;;  %v2491_v40 = vmul.bf16 %v4500_v12, %v4313_v39 }
0x1271   :  { %2154 = vmax.xlane.f32.xlu1 %v2153_v18 }
0x1273   :  { %2157 = vmax.xlane.f32.xlu0 %v2156_v34 }
0x1282   :  { %2294 = vrot.lane.b32.xlu1 %v2291_v42, %s4088_s22 }
0x12fa   :  { %v2269_v43 = vpop.xlane.xlu1 %2268 }
0x12fb   :  { %v2273_v27 = vsub.f32 %v2218_v35, %v2269_v43 }
0x12fc   :  { %v2272_v24 = vpop.xlane.xlu0 %2271 }
0x12fd   :  { %v2274_v45 = vsub.f32 %v2261_v37, %v2272_v24  ;;  %v2275_v47 = vmul.f32 1.442695, %v2273_v27 }
0x12fe   :  { %v2155_v44 = vpop.xlane.xlu1 %2154 }
0x12ff   :  { %v2159_v46 = vsub.f32 %v2097_v22, %v2155_v44  ;;  %v2277_v54 = vmul.f32 1.442695, %v2274_v45 }
0x1300   :  { %v2158_v48 = vpop.xlane.xlu0 %2157 }
0x1301   :  { %v2161_v49 = vmul.f32 1.442695, %v2159_v46  ;;  %v2160_v60 = vsub.f32 %v2146_v28, %v2158_v48  ;;  %v2602_v46 = vmul.bf16 %v4498_v7, %v4337_v57 }
0x1302   :  { %v2295_v52 = vpop.permute.xlu1 %2294 }
0x1303   :  { %3949 = vpow2.f32 %v2161_v49  ;;  %v2163_v55 = vmul.f32 1.442695, %v2160_v60  ;;  %v2301_v56 = vsel %vm2299_vm9, %v2295_v52, 0 }
0x1304   :  { %3951 = vpow2.f32 %v2275_v47  ;;  %3677 = vmatpush3.bf16.msra.mxu1 %v2301_v56 }
0x1305   :  { %3953 = vpow2.f32 %v2163_v55  ;;  %3688 = vmatprep.subr.bf16.mxu1 %v4094_v8 }
0x1306   :  { %3955 = vpow2.f32 %v2277_v54 }
0x130d   :  { %v3950_v58 = vpop.eup %3949 }
0x130e   :  { %v3952_v59 = vpop.eup %3951  ;;  %v2165_v61 = vsel %vm2152_vm6, %v3950_v58, 0.0 }
0x130f   :  { %v3954_v62 = vpop.eup %3953  ;;  %2166 = vadd.xlane.f32.xlu1 %v2165_v61  ;;  %v2279_v1 = vsel %vm2152_vm6, %v3952_v59, 0.0 }
0x1310   :  { %v2168_v63 = vsel %vm2152_vm6, %v3954_v62, 0.0  ;;  %v3956_v0 = vpop.eup %3955 }
0x1311   :  { %2169 = vadd.xlane.f32.xlu0 %v2168_v63  ;;  %v2282_v5 = vsel %vm2152_vm6, %v3956_v0, 0.0  ;;  %v2603_v63 = vmul.bf16 %v4500_v12, %v4337_v57 }
0x1313   :  { %2280 = vadd.xlane.f32.xlu1 %v2279_v1 }
0x1315   :  { %2283 = vadd.xlane.f32.xlu0 %v2282_v5 }
0x1324   :  { %2393 = vrot.lane.b32.xlu1 %v2177_v9, %s4088_s22 }
0x1328   :  { %2442 = vrot.lane.b32.xlu1 %v2178_v10, %s4088_s22 }
0x132b   :  { %2344 = vrot.lane.b32.xlu0 %v2292_v4, %s4088_s22 }
0x139c   :  { %v2167_v2 = vpop.xlane.xlu1 %2166 }
0x139e   :  { %v2170_v20 = vpop.xlane.xlu0 %2169 }
0x13a0   :  { %v2281_v23 = vpop.xlane.xlu1 %2280 }
0x13a1   :  { %3957 = vrcp.f32 %v2281_v23 }
0x13a2   :  { %v2284_v3 = vpop.xlane.xlu0 %2283 }
0x13a3   :  { %3959 = vrcp.f32 %v2284_v3  ;;  %v2704_v3 = vmul.bf16 %v4498_v7, %v4358_v21 }
0x13a4   :  { %3961 = vrcp.f32 %v2167_v2  ;;  %v2394_v26 = vpop.permute.xlu1 %2393 }
0x13a5   :  { %3963 = vrcp.f32 %v2170_v20  ;;  %v2399_v32 = vsel %vm2299_vm9, %v2394_v26, 0 }
0x13a6   :  { %v2345_v25 = vpop.permute.xlu0 %2344 }
0x13a7   :  { %v2350_v22 = vsel %vm2299_vm9, %v2345_v25, 0 }
0x13a8   :  { %3683 = vmatpush3.bf16.msra.mxu0 %v2350_v22  ;;  %v2443_v30 = vpop.permute.xlu1 %2442 }
0x13a9   :  { %3694 = vmatprep.subr.bf16.mxu0 %v4094_v8  ;;  %v2448_v35 = vsel %vm2299_vm9, %v2443_v30, 0 }
0x13ab   :  { %v3958_v50 = vpop.eup %3957 }
0x13ac   :  { %v2287_v6 = vmul.f32 %v3958_v50, %v3952_v59 }
0x13ad   :  { %v3960_v11 = vpop.eup %3959 }
0x13ae   :  { %v2288_v28 = vmul.f32 %v3960_v11, %v3956_v0  ;;  %v2289_v29 = vpack.c.bf16 %v2287_v6, %v2287_v6  ;;  %v3962_v19 = vpop.eup %3961 }
0x13af   :  { %v3964_v31 = vpop.eup %3963  ;;  %v2173_v36 = vmul.f32 %v3962_v19, %v3950_v58 }
0x13b0   :  { %3679 = vmatmul.mubr.msk.bf16.vlgmr.msra.gmra.mrb[44].mxu1 %vm2152_vm6, %v2289_v29  ;;  %v2290_v33 = vpack.c.bf16 %v2288_v28, %v2288_v28  ;;  %v2174_v37 = vmul.f32 %v3964_v31, %v3954_v62 }
0x13b1   :  { %3689 = vmatpush3.bf16.msra.mxu1 %v2399_v32  ;;  %3690 = vmatprep.mubr.msk.bf16.mxu1 %vm4095_vm1, %v4094_v8  ;;  %v2175_v38 = vpack.c.bf16 %v2173_v36, %v2173_v36 }
0x13b2   :  { %3685 = vmatmul.mubr.msk.bf16.vlgmr.msra.gmra.mrb[52].mxu0 %vm2152_vm6, %v2290_v33  ;;  %3700 = vmatprep.subr.bf16.mxu1 %v4094_v8  ;;  %v2176_v14 = vpack.c.bf16 %v2174_v37, %v2174_v37 }
0x13b3   :  { %3695 = vmatpush3.bf16.msra.mxu0 %v2448_v35  ;;  %3696 = vmatprep.mubr.msk.bf16.mxu0 %vm4095_vm1, %v4094_v8 }
0x13b4   :  { %3706 = vmatprep.subr.bf16.mxu0 %v4094_v8 }
0x13bc   :  { %3691 = vmatmul.mubr.msk.bf16.vlgmr.msra.gmra.mrb[44].mxu1 %vm2152_vm6, %v2175_v38 }
0x13bd   :  { %3701 = vmatpush3.bf16.xpose.msra.mxu1 %v4507_v13  ;;  %3702 = vmatprep.mubr.msk.bf16.mxu1 %vm4095_vm1, %v4094_v8 }
0x13be   :  { %3697 = vmatmul.mubr.msk.bf16.vlgmr.msra.gmra.mrb[52].mxu0 %vm2152_vm6, %v2176_v14  ;;  %3712 = vmatprep.subr.bf16.mxu1 %v4094_v8 }
0x13bf   :  { %3707 = vmatpush3.bf16.xpose.msra.mxu0 %v4511_v17  ;;  %3708 = vmatprep.mubr.msk.bf16.mxu0 %vm4095_vm1, %v4094_v8 }
0x13c0   :  { %3718 = vmatprep.subr.bf16.mxu0 %v4094_v8 }
0x13c4   :  { %3703 = vmatmul.mubr.msk.bf16.vlgmr.msra.gmra.mrb[48].mxu1 %vm136_vm0, %v2490_v16  ;;  %v2816_v16 = vmul.bf16 %v4498_v7, %v4385_v15 }
0x13c5   :  { %3714 = vmatprep.mubr.msk.bf16.mxu1 %vm4095_vm1, %v4094_v8 }
0x13c6   :  { %3709 = vmatmul.mubr.msk.bf16.vlgmr.msra.gmra.mrb[56].mxu0 %vm136_vm0, %v2491_v40  ;;  %v2817_v40 = vmul.bf16 %v4500_v12, %v4385_v15 }
0x13c7   :  { %3720 = vmatprep.mubr.msk.bf16.mxu0 %vm4095_vm1, %v4094_v8 }
0x1497   :  { %v2529_v41 = vpop.f32.mrb[48].mxu1 }
0x1498   :  { %v3704_v18 = vpop.f32.mrb[49].mxu1  ;;  %v2578_v34 = vsel %vm2152_vm6, %v2529_v41, -inf }
0x1499   :  { %v2532_v42 = vpop.f32.mrb[50].mxu1  ;;  %2579 = vmax.xlane.f32.xlu0 %v2578_v34  ;;  %v2572_v43 = vpop.f32.mrb[56].mxu0 }
0x149a   :  { %v3705_v27 = vpop.f32.mrb[51].mxu1  ;;  %v3710_v24 = vpop.f32.mrb[57].mxu0  ;;  %v2581_v44 = vsel %vm2152_vm6, %v2572_v43, -inf }
0x149b   :  { %2582 = vmax.xlane.f32.xlu1 %v2581_v44  ;;  %v2575_v39 = vpop.f32.mrb[58].mxu0 }
0x149c   :  { %v3711_v45 = vpop.f32.mrb[59].mxu0 }
0x149d   :  { %v3853_v45 = vld [vmem:[#allocation5 + $0xa0] sm:$0xff]  }
0x14ac   :  { %2605 = vrot.lane.b32.xlu1 %v2602_v46, %s4088_s22  ;;  %v3854_v46 = vld [vmem:[#allocation5 + $0xa8] sm:$0xff]  }
0x1526   :  { %v2580_v47 = vpop.xlane.xlu0 %2579 }
0x1527   :  { %v2584_v48 = vsub.f32 %v2529_v41, %v2580_v47 }
0x1528   :  { %v2583_v49 = vpop.xlane.xlu1 %2582 }
0x1529   :  { %v2586_v60 = vmul.f32 1.442695, %v2584_v48  ;;  %v2585_v52 = vsub.f32 %v2572_v43, %v2583_v49 }
0x152b   :  { %3965 = vpow2.f32 %v2586_v60  ;;  %v2588_v54 = vmul.f32 1.442695, %v2585_v52 }
0x152c   :  { %v2606_v55 = vpop.permute.xlu1 %2605 }
0x152d   :  { %3967 = vpow2.f32 %v2588_v54  ;;  %v2611_v56 = vsel %vm2299_vm9, %v2606_v55, 0 }
0x152e   :  { %3713 = vmatpush3.bf16.msra.mxu1 %v2611_v56 }
0x152f   :  { %3724 = vmatprep.subr.bf16.mxu1 %v4094_v8 }
0x1535   :  { %v3966_v58 = vpop.eup %3965 }
0x1536   :  { %v2590_v59 = vsel %vm2152_vm6, %v3966_v58, 0.0 }
0x1537   :  { %v3968_v61 = vpop.eup %3967  ;;  %2591 = vadd.xlane.f32.xlu0 %v2590_v59 }
0x1538   :  { %v2593_v62 = vsel %vm2152_vm6, %v3968_v61, 0.0 }
0x153b   :  { %2594 = vadd.xlane.f32.xlu0 %v2593_v62 }
0x1551   :  { %2654 = vrot.lane.b32.xlu0 %v2603_v63, %s4088_s22 }
0x15c4   :  { %v2592_v0 = vpop.xlane.xlu0 %2591 }
0x15c5   :  { %3969 = vrcp.f32 %v2592_v0 }
0x15c8   :  { %v2595_v1 = vpop.xlane.xlu0 %2594 }
0x15c9   :  { %3971 = vrcp.f32 %v2595_v1 }
0x15cc   :  { %v2655_v5 = vpop.permute.xlu0 %2654 }
0x15cd   :  { %v2660_v9 = vsel %vm2299_vm9, %v2655_v5, 0 }
0x15ce   :  { %3719 = vmatpush3.bf16.msra.mxu0 %v2660_v9 }
0x15cf   :  { %v3970_v10 = vpop.eup %3969  ;;  %3730 = vmatprep.subr.bf16.mxu0 %v4094_v8 }
0x15d0   :  { %v2598_v4 = vmul.f32 %v3970_v10, %v3966_v58 }
0x15d2   :  { %v2600_v2 = vpack.c.bf16 %v2598_v4, %v2598_v4 }
0x15d3   :  { %v3972_v20 = vpop.eup %3971 }
0x15d4   :  { %v2599_v23 = vmul.f32 %v3972_v20, %v3968_v61  ;;  %3715 = vmatmul.mubr.msk.bf16.vlgmr.msra.gmra.mrb[44].mxu1 %vm2152_vm6, %v2600_v2  ;;  %v3347_v61 = vld [vmem:[#allocation7 + $0x9] ss:$0 sm:$0xff] }
0x15d5   :  { %3725 = vmatpush3.bf16.xpose.msra.mxu1 %v4507_v13  ;;  %3726 = vmatprep.mubr.msk.bf16.mxu1 %vm4095_vm1, %v4094_v8  ;;  %v2705_v13 = vmul.bf16 %v4500_v12, %v4358_v21 }
0x15d6   :  { %v2601_v57 = vpack.c.bf16 %v2599_v23, %v2599_v23  ;;  %3736 = vmatprep.subr.bf16.mxu1 %v4094_v8 }
0x15d8   :  { %3721 = vmatmul.mubr.msk.bf16.vlgmr.msra.gmra.mrb[52].mxu0 %vm2152_vm6, %v2601_v57 }
0x15d9   :  { %3731 = vmatpush3.bf16.xpose.msra.mxu0 %v4511_v17  ;;  %3732 = vmatprep.mubr.msk.bf16.mxu0 %vm4095_vm1, %v4094_v8 }
0x15da   :  { %3742 = vmatprep.subr.bf16.mxu0 %v4094_v8 }
0x15dc   :  { %3727 = vmatmul.mubr.msk.bf16.vlgmr.msra.gmra.mrb[52].mxu1 %vm136_vm0, %v2704_v3 }
0x15dd   :  { %3738 = vmatprep.mubr.msk.bf16.mxu1 %vm4095_vm1, %v4094_v8 }
0x15e0   :  { %3733 = vmatmul.mubr.msk.bf16.vlgmr.msra.gmra.mrb[60].mxu0 %vm136_vm0, %v2705_v13 }
0x15e1   :  { %3744 = vmatprep.mubr.msk.bf16.mxu0 %vm4095_vm1, %v4094_v8 }
0x16af   :  { %v2743_v17 = vpop.f32.mrb[52].mxu1 }
0x16b0   :  { %v3728_v25 = vpop.f32.mrb[53].mxu1  ;;  %v2792_v22 = vsel %vm2152_vm6, %v2743_v17, -inf }
0x16b1   :  { %2793 = vmax.xlane.f32.xlu1 %v2792_v22  ;;  %v2746_v26 = vpop.f32.mrb[54].mxu1 }
0x16b2   :  { %v3729_v50 = vpop.f32.mrb[55].mxu1  ;;  %v3855_v26 = vld [vmem:[#allocation5 + $0xc0] sm:$0xff]  }
0x16b3   :  { %v2786_v6 = vpop.f32.mrb[60].mxu0  ;;  %v3856_v50 = vld [vmem:[#allocation5 + $0xc8] sm:$0xff]  }
0x16b4   :  { %v3734_v11 = vpop.f32.mrb[61].mxu0  ;;  %v2795_v28 = vsel %vm2152_vm6, %v2786_v6, -inf }
0x16b5   :  { %2796 = vmax.xlane.f32.xlu0 %v2795_v28  ;;  %v2789_v29 = vpop.f32.mrb[62].mxu0  ;;  %v3858_v11 = vld [vmem:[#allocation5 + $0xe8] sm:$0xff]  }
0x16b6   :  { %v3735_v30 = vpop.f32.mrb[63].mxu0 }
0x173e   :  { %v2794_v21 = vpop.xlane.xlu1 %2793 }
0x173f   :  { %v2798_v32 = vsub.f32 %v2743_v17, %v2794_v21 }
0x1741   :  { %v2800_v33 = vmul.f32 1.442695, %v2798_v32 }
0x1742   :  { %v2797_v35 = vpop.xlane.xlu0 %2796 }
0x1743   :  { %3973 = vpow2.f32 %v2800_v33  ;;  %v2799_v19 = vsub.f32 %v2786_v6, %v2797_v35  ;;  %v3857_v6 = vld [vmem:[#allocation5 + $0xe0] sm:$0xff]  }
0x1745   :  { %v2802_v31 = vmul.f32 1.442695, %v2799_v19  ;;  %v3348_v19 = vld [vmem:[#allocation7 + $0xc] ss:$0 sm:$0xff] }
0x1747   :  { %3975 = vpow2.f32 %v2802_v31 }
0x174d   :  { %v3974_v36 = vpop.eup %3973 }
0x174e   :  { %v2804_v37 = vsel %vm2152_vm6, %v3974_v36, 0.0 }
0x174f   :  { %2805 = vadd.xlane.f32.xlu1 %v2804_v37 }
0x1751   :  { %v3976_v38 = vpop.eup %3975 }
0x1752   :  { %v2807_v14 = vsel %vm2152_vm6, %v3976_v38, 0.0 }
0x1753   :  { %2808 = vadd.xlane.f32.xlu0 %v2807_v14  ;;  %v3349_v14 = vld [vmem:[#allocation7 + $0xd] ss:$0 sm:$0xff] }
0x1760   :  { %2819 = vrot.lane.b32.xlu1 %v2816_v16, %s4088_s22 }
0x1769   :  { %2868 = vrot.lane.b32.xlu0 %v2817_v40, %s4088_s22  ;;  %s4097_s22 = smov [#allocation8]  }
0x176a   :  { %s3244_s24 = sshll.u32 %s4097_s22, 4  ;;  %s3245_s24 = int_to_ptr.vmem [resolvable:$true] %s3244_s24 }
0x176b   :  { %s4059_s25 = scalar_lea.vmem %s3245_s24, 256  ;;  %p4064_p11 = scmp.lt.s32.totalorder %s3245_s24, %s3245_s24 }
0x176c   :  { %p4060_p10 = scmp.ne.s32.totalorder %s3245_s24, %s4059_s25  ;;  %p4065_p12 = scmp.lt.s32.totalorder %s4059_s25, %s4059_s25 }
0x176e   :  { %p4066_p13 = por %p4065_p12, %p4064_p11 }
0x1770   :  { %p4067_p0 = pnand %p4066_p13, %p4060_p10 }
0x17dc   :  { %v2806_v41 = vpop.xlane.xlu1 %2805 }
0x17dd   :  { %3977 = vrcp.f32 %v2806_v41 }
0x17e0   :  { %v2820_v18 = vpop.permute.xlu1 %2819  ;;  %v2809_v34 = vpop.xlane.xlu0 %2808 }
0x17e1   :  { %v2825_v42 = vsel %vm2299_vm9, %v2820_v18, 0  ;;  %3979 = vrcp.f32 %v2809_v34  ;;  %v3859_v34 = vld [vmem:[#allocation5 + $0xf0] sm:$0xff]  }
0x17e2   :  { %3737 = vmatpush3.bf16.msra.mxu1 %v2825_v42  ;;  %v3860_v42 = vld [vmem:[#allocation5 + $0xf8] sm:$0xff]  }
0x17e3   :  { %3748 = vmatprep.subr.bf16.mxu1 %v4094_v8 }
0x17e4   :  { %v2869_v43 = vpop.permute.xlu0 %2868 }
0x17e5   :  { %v2874_v7 = vsel %vm2299_vm9, %v2869_v43, 0  ;;  %v3350_v43 = vld [vmem:[#allocation7 + $0xa] ss:$0 sm:$0xff] }
0x17e6   :  { %3743 = vmatpush3.bf16.msra.mxu0 %v2874_v7 }
0x17e7   :  { %v3978_v27 = vpop.eup %3977  ;;  %3756 = vmatprep.subr.bf16.mxu0 %v4094_v8 }
0x17e8   :  { %v2812_v15 = vmul.f32 %v3978_v27, %v3974_v36 }
0x17ea   :  { %v2814_v12 = vpack.c.bf16 %v2812_v15, %v2812_v15 }
0x17eb   :  { %v3980_v24 = vpop.eup %3979 }
0x17ec   :  { %v2813_v44 = vmul.f32 %v3980_v24, %v3976_v38  ;;  %3739 = vmatmul.mubr.msk.bf16.vlgmr.msra.gmra.mrb[44].mxu1 %vm2152_vm6, %v2814_v12 }
0x17ed   :  { %3752 = vmatprep.mubr.msk.bf16.mxu1 %vm4095_vm1, %v4094_v8  ;;  %3749 = vmatpush3.bf16.msra.mxu1 %v3853_v45 }
0x17ee   :  { %v2815_v39 = vpack.c.bf16 %v2813_v44, %v2813_v44  ;;  %3750 = vmatprep.subr.bf16.mxu1 %v4094_v8 }
0x17f0   :  { %3745 = vmatmul.mubr.msk.bf16.vlgmr.msra.gmra.mrb[52].mxu0 %vm2152_vm6, %v2815_v39 }
0x17f1   :  { %3760 = vmatprep.mubr.msk.bf16.mxu0 %vm4095_vm1, %v4094_v8  ;;  %3751 = vmatpush3.bf16.msra.mxu1 %v3854_v46 }
0x17f2   :  { %3764 = vmatprep.subr.bf16.mxu1 %v4094_v8  ;;  %3757 = vmatpush3.bf16.msra.mxu0 %v3855_v26  ;;  %v3361_v26 = vld [vmem:[#allocation7 + $0xf] ss:$0 sm:$0xff] }
0x17f3   :  { %3758 = vmatprep.subr.bf16.mxu0 %v4094_v8 }
0x17f6   :  { %3759 = vmatpush3.bf16.msra.mxu0 %v3856_v50 }
0x18bf   :  { %v2861_v47 = vpop.f32.mrb[44].mxu1 }
0x18c0   :  { %v3740_v48 = vpop.f32.mrb[45].mxu1 }
0x18c1   :  { %v2864_v49 = vpop.f32.mrb[46].mxu1 }
0x18c2   :  { %v3741_v60 = vpop.f32.mrb[47].mxu1 }
0x18c3   :  { %v2910_v52 = vpop.f32.mrb[52].mxu0 }
0x18c4   :  { %v2918_v54 = vpack.c.bf16 %v2910_v52, %v2861_v47  ;;  %v3746_v55 = vpop.f32.mrb[53].mxu0  ;;  %v3354_v47 = vld [vmem:[#allocation7 + $0xb] ss:$0 sm:$0xff] }
0x18c5   :  { %v2913_v56 = vpop.f32.mrb[54].mxu0 }
0x18c6   :  { %v3747_v58 = vpop.f32.mrb[55].mxu0  ;;  %3753 = vmatmul.mubr.msk.bf16.vlgmr.msra.gmra.mrb[56].mxu1 %vm136_vm0, %v2918_v54 }
0x18c7   :  { %3772 = vmatprep.mubr.msk.bf16.mxu1 %vm4095_vm1, %v4094_v8  ;;  %3765 = vmatpush3.bf16.msra.mxu1 %v3857_v6 }
0x18c8   :  { %3766 = vmatprep.subr.bf16.mxu1 %v4094_v8 }
0x18cb   :  { %3767 = vmatpush3.bf16.msra.mxu1 %v3858_v11 }
0x18cc   :  { %3768 = vmatprep.subr.bf16.mxu1 %v4094_v8 }
0x18cf   :  { %3769 = vmatpush3.bf16.msra.mxu1 %v3859_v34 }
0x18d0   :  { %3770 = vmatprep.subr.bf16.mxu1 %v4094_v8 }
0x18d3   :  { %3771 = vmatpush3.bf16.msra.mxu1 %v3860_v42 }
0x1999   :  { %v2968_v59 = vpop.f32.mrb[56].mxu1 }
0x199a   :  { %v2975_v62 = vadd.f32 %v2968_v59, %v4491_v53  ;;  %v3754_v63 = vpop.f32.mrb[57].mxu1 }
0x199b   :  { %v2971_v0 = vpop.f32.mrb[58].mxu1 }
0x199c   :  { %v2976_v1 = vadd.f32 %v2971_v0, %v4489_v51  ;;  %v3755_v5 = vpop.f32.mrb[59].mxu1  ;;  %v2981_v9 = vadd.f32 %v3347_v61, %v2975_v62 }
0x199e   :  { %v2983_v10 = vsel %vm136_vm0, %v2981_v9, 0.0  ;;  %v2982_v4 = vadd.f32 %v3347_v61, %v2976_v1 }
0x199f   :  { %2984 = vadd.xlane.f32.xlu1 %v2983_v10 }
0x19a0   :  { %v2986_v2 = vsel %vm136_vm0, %v2982_v4, 0.0 }
0x19a1   :  { %2987 = vadd.xlane.f32.xlu0 %v2986_v2 }
0x1a2c   :  { %v2985_v20 = vpop.xlane.xlu1 %2984 }
0x1a2d   :  { %v2989_v23 = vmul.f32 0.03125, %v2985_v20 }
0x1a2e   :  { %v2988_v57 = vpop.xlane.xlu0 %2987 }
0x1a2f   :  { %v2991_v3 = vsub.f32 %v2981_v9, %v2989_v23  ;;  %v2990_v13 = vmul.f32 0.03125, %v2988_v57 }
0x1a31   :  { %v2992_v17 = vsub.f32 %v2982_v4, %v2990_v13  ;;  %v2993_v53 = vmul.f32 %v2991_v3, %v2991_v3 }
0x1a33   :  { %v2995_v25 = vsel %vm136_vm0, %v2993_v53, 0.0  ;;  %v2994_v22 = vmul.f32 %v2992_v17, %v2992_v17 }
0x1a34   :  { %2996 = vadd.xlane.f32.xlu1 %v2995_v25  ;;  %v3360_v25 = vld [vmem:[#allocation7 + $0xe] ss:$0 sm:$0xff] }
0x1a35   :  { %v2998_v51 = vsel %vm136_vm0, %v2994_v22, 0.0 }
0x1a36   :  { %2999 = vadd.xlane.f32.xlu0 %v2998_v51 }
0x1ac1   :  { %v2997_v28 = vpop.xlane.xlu1 %2996 }
0x1ac2   :  { %v3001_v29 = vmul.f32 0.03125, %v2997_v28 }
0x1ac3   :  { %v3000_v30 = vpop.xlane.xlu0 %2999 }
0x1ac4   :  { %v3003_v21 = vadd.f32 1e-05, %v3001_v29  ;;  %v3002_v32 = vmul.f32 0.03125, %v3000_v30 }
0x1ac6   :  { %3981 = vrsqrt.f32 %v3003_v21  ;;  %v3004_v33 = vadd.f32 1e-05, %v3002_v32 }
0x1ac8   :  { %3983 = vrsqrt.f32 %v3004_v33 }
0x1ad0   :  { %v3982_v35 = vpop.eup %3981 }
0x1ad1   :  { %v3007_v31 = vmul.f32 %v3982_v35, %v2991_v3 }
0x1ad2   :  { %v3984_v36 = vpop.eup %3983 }
0x1ad3   :  { %v3013_v37 = vmul.f32 %v3348_v19, %v3007_v31  ;;  %v3008_v38 = vmul.f32 %v3984_v36, %v2992_v17 }
0x1ad5   :  { %v3014_v16 = vmul.f32 %v3348_v19, %v3008_v38  ;;  %v3019_v40 = vadd.f32 %v3349_v14, %v3013_v37 }
0x1ad7   :  { %v3020_v41 = vadd.f32 %v3349_v14, %v3014_v16 }
0x1ad9   :  { %v3021_v18 = vpack.c.bf16 %v3020_v41, %v3019_v40 }
0x1adb   :  { %3761 = vmatmul.mubr.msk.bf16.vlgmr.msra.gmra.mrb[64].mxu0 %vm136_vm0, %v3021_v18 }
0x1bae   :  { %v3075_v7 = vpop.f32.mrb[64].mxu0 }
0x1baf   :  { %v3076_v27 = vadd.f32 %v3350_v43, %v3075_v7  ;;  %v3762_v15 = vpop.f32.mrb[65].mxu0 }
0x1bb0   :  { %v3078_v12 = vpop.f32.mrb[66].mxu0 }
0x1bb1   :  { %v3079_v24 = vadd.f32 %v3350_v43, %v3078_v12  ;;  %v3763_v44 = vpop.f32.mrb[67].mxu0  ;;  %v3082_v39 = vmax.f32 %v3076_v27, 0.0  ;;  %v3362_v27 = vld [vmem:[#allocation7 + $0x13] ss:$0 sm:$0xff] }
0x1bb3   :  { %v3083_v45 = vmax.f32 %v3079_v24, 0.0  ;;  %v3363_v24 = vld [vmem:[#allocation7 + $0x14] ss:$0 sm:$0xff] }
0x1bb5   :  { %v3084_v46 = vpack.c.bf16 %v3083_v45, %v3082_v39 }
0x1bb7   :  { %3773 = vmatmul.mubr.msk.bf16.vlgmr.msra.gmra.mrb[60].mxu1 %vm1424_vm13, %v3084_v46 }
0x1c8a   :  { %v3150_v48 = vpop.f32.mrb[60].mxu1 }
0x1c8b   :  { %v3151_v49 = vadd.f32 %v3354_v47, %v3150_v48  ;;  %v3774_v60 = vpop.f32.mrb[61].mxu1 }
0x1c8c   :  { %v3153_v52 = vpop.f32.mrb[62].mxu1 }
0x1c8d   :  { %v3157_v8 = vadd.f32 %v3151_v49, %v3019_v40  ;;  %v3154_v54 = vadd.f32 %v3354_v47, %v3153_v52  ;;  %v3775_v55 = vpop.f32.mrb[63].mxu1 }
0x1c8f   :  { %v3159_v56 = vsel %vm136_vm0, %v3157_v8, 0.0  ;;  %v3158_v58 = vadd.f32 %v3154_v54, %v3020_v41 }
0x1c90   :  { %3160 = vadd.xlane.f32.xlu1 %v3159_v56 }
0x1c91   :  { %v3162_v59 = vsel %vm136_vm0, %v3158_v58, 0.0 }
0x1c92   :  { %3163 = vadd.xlane.f32.xlu0 %v3162_v59 }
0x1d1d   :  { %v3161_v61 = vpop.xlane.xlu1 %3160 }
0x1d1e   :  { %v3165_v62 = vmul.f32 0.03125, %v3161_v61 }
0x1d1f   :  { %v3164_v63 = vpop.xlane.xlu0 %3163 }
0x1d20   :  { %v3167_v0 = vsub.f32 %v3157_v8, %v3165_v62  ;;  %v3166_v1 = vmul.f32 0.03125, %v3164_v63 }
0x1d22   :  { %v3168_v5 = vsub.f32 %v3158_v58, %v3166_v1  ;;  %v3169_v9 = vmul.f32 %v3167_v0, %v3167_v0 }
0x1d24   :  { %v3171_v10 = vsel %vm136_vm0, %v3169_v9, 0.0  ;;  %v3170_v4 = vmul.f32 %v3168_v5, %v3168_v5 }
0x1d25   :  { %3172 = vadd.xlane.f32.xlu1 %v3171_v10 }
0x1d26   :  { %v3174_v2 = vsel %vm136_vm0, %v3170_v4, 0.0 }
0x1d27   :  { %3175 = vadd.xlane.f32.xlu0 %v3174_v2 }
0x1db2   :  { %v3173_v20 = vpop.xlane.xlu1 %3172 }
0x1db3   :  { %v3177_v23 = vmul.f32 0.03125, %v3173_v20 }
0x1db4   :  { %v3176_v57 = vpop.xlane.xlu0 %3175 }
0x1db5   :  { %v3179_v3 = vadd.f32 1e-05, %v3177_v23  ;;  %v3178_v13 = vmul.f32 0.03125, %v3176_v57 }
0x1db7   :  { %3985 = vrsqrt.f32 %v3179_v3  ;;  %v3180_v17 = vadd.f32 1e-05, %v3178_v13 }
0x1db9   :  { %3987 = vrsqrt.f32 %v3180_v17 }
0x1dc1   :  { %v3986_v53 = vpop.eup %3985 }
0x1dc2   :  { %v3183_v22 = vmul.f32 %v3986_v53, %v3167_v0 }
0x1dc3   :  { %v3988_v51 = vpop.eup %3987 }
0x1dc4   :  { %v3189_v50 = vmul.f32 %v3360_v25, %v3183_v22  ;;  %v3184_v6 = vmul.f32 %v3988_v51, %v3168_v5 }
0x1dc6   :  { %v3195_v11 = vadd.f32 %v3361_v26, %v3189_v50  ;;  %v3190_v28 = vmul.f32 %v3360_v25, %v3184_v6 }
0x1dc8   :  { %v3199_v29 = vsel %vm136_vm0, %v3195_v11, 0.0  ;;  %v3196_v30 = vadd.f32 %v3361_v26, %v3190_v28 }
0x1dc9   :  { %3200 = vadd.xlane.f32.xlu1 %v3199_v29 }
0x1dca   :  { %v3202_v21 = vsel %vm136_vm0, %v3196_v30, 0.0 }
0x1dcb   :  { %3203 = vadd.xlane.f32.xlu0 %v3202_v21 }
0x1e56   :  { %v3201_v32 = vpop.xlane.xlu1 %3200 }
0x1e57   :  { %v3205_v33 = vmul.f32 0.03125, %v3201_v32 }
0x1e58   :  { %v3204_v35 = vpop.xlane.xlu0 %3203 }
0x1e59   :  { %v3207_v19 = vsub.f32 %v3195_v11, %v3205_v33  ;;  %v3206_v31 = vmul.f32 0.03125, %v3204_v35 }
0x1e5b   :  { %v3208_v36 = vsub.f32 %v3196_v30, %v3206_v31  ;;  %v3209_v37 = vmul.f32 %v3207_v19, %v3207_v19 }
0x1e5d   :  { %v3211_v38 = vsel %vm136_vm0, %v3209_v37, 0.0  ;;  %v3210_v14 = vmul.f32 %v3208_v36, %v3208_v36 }
0x1e5e   :  { %3212 = vadd.xlane.f32.xlu1 %v3211_v38 }
0x1e5f   :  { %v3214_v16 = vsel %vm136_vm0, %v3210_v14, 0.0 }
0x1e60   :  { %3215 = vadd.xlane.f32.xlu0 %v3214_v16 }
0x1eeb   :  { %v3213_v40 = vpop.xlane.xlu1 %3212 }
0x1eec   :  { %v3217_v41 = vmul.f32 0.03125, %v3213_v40 }
0x1eed   :  { %v3216_v18 = vpop.xlane.xlu0 %3215 }
0x1eee   :  { %v3219_v34 = vadd.f32 1e-05, %v3217_v41  ;;  %v3218_v42 = vmul.f32 0.03125, %v3216_v18 }
0x1ef0   :  { %3989 = vrsqrt.f32 %v3219_v34  ;;  %v3220_v43 = vadd.f32 1e-05, %v3218_v42 }
0x1ef2   :  { %3991 = vrsqrt.f32 %v3220_v43 }
0x1efa   :  { %v3990_v7 = vpop.eup %3989 }
0x1efb   :  { %v3223_v15 = vmul.f32 %v3990_v7, %v3207_v19 }
0x1efc   :  { %v3992_v12 = vpop.eup %3991 }
0x1efd   :  { %v3224_v44 = vmul.f32 %v3992_v12, %v3208_v36  ;;  %v3229_v39 = vmul.f32 %v3362_v27, %v3223_v15 }
0x1eff   :  { %v3230_v45 = vmul.f32 %v3362_v27, %v3224_v44  ;;  %v3235_v46 = vadd.f32 %v3363_v24, %v3229_v39 }
0x1f01   :  { %v3236_v47 = vadd.f32 %v3363_v24, %v3230_v45  ;;  %3237 = vst.msk [vmem:[#allocation8] sm:$0xff] %vm136_vm0, %v3235_v46 }
0x1f03   :  { %3238 = vst.msk [vmem:[#allocation8 + $0x8] sm:$0xff] %vm136_vm0, %v3236_v47 }
0x1f04   :  { %4070 = shalt.err (!%p4067_p0)
}
0x1f05   :  { %s4071_s28 = scalar_lea.hbm %s4693_s3, 256 }
0x1f06   :  { %p4072_p1 = scmp.ne.s32.totalorder %s4693_s3, %s4071_s28  ;;  %p4075_p2 = scmp.lt.u32.totalorder %s4071_s28, %s4693_s3 }
0x1f08   :  { %p4077_p3 = pnand %p4075_p2, %p4072_p1 }
0x1f0a   :  { %4080 = shalt.err (!%p4077_p3)
}
0x1f0b   :  { %3250 = dma.vmem_to_hbm [thread:$0]  %s3245_s24, 256, %s4693_s3, [#allocation4], %s4091_s1, %s4091_s1, %s4092_s9  }
0x1f0c   :  { %4085 = dma.done.wait [#allocation4], 256  }
0x1f0d   :  { %4086 = vsyncadd [#allocation4], 4294967040 }
0x1f0e   :  { %3254 = vsyncpa [#allocation3], 1 }
0x1f0f   :  { %3255 = vsyncpa [#allocation6], 1 }
0x1f10   :  { %3256 = vsyncpa [#allocation4], 1 }

</bundles_post_ra>
